<compile_context>
chip_gen: v7x
topology: tpu7x:2x2x1
jax: 0.10.0
libtpu: 0.0.40
codegen_flags: <defaults>
</compile_context>

<pallas_src>
import math
import functools

import jax
import jax.numpy as jnp
from jax import random
from jax.experimental import pallas as pl
from jax.experimental.pallas import tpu as pltpu


# ----------------------------------------------------------------------------
# activation (used inside the kernel epilogues and in the f32 reference)
# ----------------------------------------------------------------------------
def _apply_act(y, act):
    if act == "none":
        return y
    if act == "relu":
        return jnp.maximum(y, 0.0)
    if act == "gelu":
        return jax.nn.gelu(y, approximate=False)
    if act == "sigmoid":
        return jax.nn.sigmoid(y)
    if act == "tanh":
        return jnp.tanh(y)
    # TODO(synk): 'glu' / 'leaky_relu' not implemented (unused by defaults).
    raise ValueError(f"unsupported activation: {act}")


# ----------------------------------------------------------------------------
# single fused kernel: all encoder layers + final LN + Conv1d + activation
# (one grid step == one batch element; everything stays in VMEM/vregs)
# ----------------------------------------------------------------------------
def _fused_encoder_conv_kernel(x_ref, pos_ref,
                               wqk_ref, bqk_ref, wv_ref, bv_ref,
                               wo_ref, bo_ref, w1_ref, b1_ref, w2_ref, b2_ref,
                               ln1g_ref, ln1b_ref, ln2g_ref, ln2b_ref,
                               lnfg_ref, lnfb_ref,
                               cw_ref, cb_ref, sel_ref,
                               o_ref, *,
                               num_layers, nhead, act, eps, use_final_norm):
    f32, bf16 = jnp.float32, jnp.bfloat16
    x = x_ref[0]                                       # [L, D] f32 residual stream
    pos = pos_ref[0]                                   # [L, D] f32
    L, D = x.shape
    hd = D // nhead

    def layer_norm(v, g, b):
        mu = jnp.mean(v, axis=-1, keepdims=True)
        c = v - mu
        var = jnp.mean(c * c, axis=-1, keepdims=True)
        return c * jax.lax.rsqrt(var + eps) * g + b

    for l in range(num_layers):
        # ---- self-attention sub-block (pre-norm; residual folded in) -------
        src2 = layer_norm(x, ln1g_ref[l], ln1b_ref[l])             # [L, D]
        qk_in = (src2 + pos).astype(bf16)                          # q = k input
        # fused Q|K projection (1/sqrt(hd) scale pre-folded into the Q half)
        qk = jnp.dot(qk_in, wqk_ref[l],
                     preferred_element_type=f32) + bqk_ref[l]      # [L, 2D]
        v = jnp.dot(src2.astype(bf16), wv_ref[l],
                    preferred_element_type=f32) + bv_ref[l]        # [L, D]

        attn = jnp.zeros((L, D), f32)
        for h in range(nhead):                                     # static unroll
            qh = qk[:, h * hd:(h + 1) * hd].astype(bf16)           # [L, hd]
            kh = qk[:, D + h * hd:D + (h + 1) * hd].astype(bf16)   # [L, hd]
            vh = v[:, h * hd:(h + 1) * hd].astype(bf16)            # [L, hd]
            s = jax.lax.dot_general(qh, kh, (((1,), (1,)), ((), ())),
                                    preferred_element_type=f32)    # [L, L]
            s = s - jnp.max(s, axis=-1, keepdims=True)
            p = jnp.exp(s)
            p = p * pl.reciprocal(jnp.sum(p, axis=-1, keepdims=True), approx=True)
            oh = jnp.dot(p.astype(bf16), vh,
                         preferred_element_type=f32)               # [L, hd]
            # head merge fused with O-projection: accumulate oh @ Wo[head rows]
            attn = attn + jnp.dot(oh.astype(bf16), wo_ref[l * nhead + h],
                                  preferred_element_type=f32)      # [L, D]
        x = x + attn + bo_ref[l]                                   # residual + bias

        # ---- FFN sub-block (pre-norm; residual folded in) -------------------
        src2 = layer_norm(x, ln2g_ref[l], ln2b_ref[l])
        h1 = _apply_act(jnp.dot(src2.astype(bf16), w1_ref[l],
                                preferred_element_type=f32) + b1_ref[l], act)
        x = x + jnp.dot(h1.astype(bf16), w2_ref[l],
                        preferred_element_type=f32) + b2_ref[l]

    if use_final_norm:                                             # encoder norm
        x = layer_norm(x, lnfg_ref[...], lnfb_ref[...])

    # ---- Conv1d(channels = L, length = D, stride 2, pad k//2) + activation --
    # y = sum_k W_k @ x @ Sel_k ; Sel_k is a 0/1 [D, Lout] matrix implementing
    # the stride-2 / padded gather, so the whole conv runs on the MXU with no
    # im2col tensor or transpose.
    xb = x.astype(bf16)
    K = cw_ref.shape[0]
    Lout = sel_ref.shape[2]
    y = jnp.zeros((L, Lout), f32)
    for k in range(K):                                             # static unroll
        t = jnp.dot(cw_ref[k], xb, preferred_element_type=f32)     # [C, D]
        y = y + jnp.dot(t.astype(bf16), sel_ref[k],
                        preferred_element_type=f32)                # [C, Lout]
    o_ref[0] = _apply_act(y + cb_ref[...], act)


# ----------------------------------------------------------------------------
# wrapper: one pallas_call for the whole module forward
# ----------------------------------------------------------------------------
def trans_encoder_conv1d_act_forward(src, pos, params, cfg):
    """src: [B, sequence_length, d_model] -> [B, sequence_length, Lout]."""
    B, L, D = src.shape
    nhead = cfg["nhead"]
    assert D % nhead == 0
    Kk = cfg["kernel"]
    stride, padw = 2, Kk // 2
    Lout = (D + 2 * padw - Kk) // stride + 1
    if pos is None:
        pos = jnp.zeros_like(src)

    weight_args = (params["wqk"], params["bqk"], params["wv"], params["bv"],
                   params["wo"], params["bo"], params["w1"], params["b1"],
                   params["w2"], params["b2"],
                   params["ln1_g"], params["ln1_b"], params["ln2_g"], params["ln2_b"],
                   params["lnf_g"], params["lnf_b"],
                   params["conv_w"], params["conv_b"], params["sel"])

    # VMEM budget guard (double-buffered inputs + output block); keeps us well
    # inside v5e's 16 MiB / v6e-v7x's 32 MiB scoped VMEM even if scaled up.
    total_bytes = (src[0].size + pos[0].size) * 4 + Lout * L * 4
    total_bytes += sum(int(a.size) * a.dtype.itemsize for a in weight_args)
    assert 2 * total_bytes < 12 * 1024 * 1024, "config too large for fused kernel VMEM budget"

    def batch_spec(arr):
        shp = (1,) + arr.shape[1:]
        return pl.BlockSpec(shp, lambda b, _n=arr.ndim - 1: (b,) + (0,) * _n)

    def full_spec(arr):
        return pl.BlockSpec(arr.shape, lambda b, _n=arr.ndim: (0,) * _n)

    kernel = functools.partial(
        _fused_encoder_conv_kernel,
        num_layers=cfg["num_layers"], nhead=nhead, act=cfg["activation"],
        eps=1e-5, use_final_norm=cfg["normalize_before"])

    return pl.pallas_call(
        kernel,
        out_shape=jax.ShapeDtypeStruct((B, L, Lout), jnp.float32),
        grid_spec=pltpu.PrefetchScalarGridSpec(
            num_scalar_prefetch=0,
            grid=(B,),
            in_specs=[batch_spec(src), batch_spec(pos)]
                     + [full_spec(a) for a in weight_args],
            out_specs=pl.BlockSpec((1, L, Lout), lambda b: (b, 0, 0))),
        compiler_params=pltpu.CompilerParams(
            dimension_semantics=("parallel",)),   # shards batch across v7x TCs
    )(src, pos, *weight_args)


# ----------------------------------------------------------------------------
# deterministic synthetic parameters (stacked per-layer, bf16 weights,
# attention scale folded into Q, conv expressed as tap + selection matrices)
# ----------------------------------------------------------------------------
class KeyGen:
    def __init__(self, seed):
        self._key = random.PRNGKey(seed)

    def __call__(self):
        self._key, sub = random.split(self._key)
        return sub


def build_params(kg, cfg):
    D, ff, NL = cfg["d_model"], cfg["dim_feedforward"], cfg["num_layers"]
    nhead = cfg["nhead"]
    hd = D // nhead
    L, K = cfg["sequence_length"], cfg["kernel"]
    scale = 1.0 / math.sqrt(hd)

    def lin(d_in, d_out):
        std = math.sqrt(2.0 / (d_in + d_out))
        w = std * random.normal(kg(), (d_in, d_out), dtype=jnp.float32)
        b = 0.01 * random.normal(kg(), (d_out,), dtype=jnp.float32)
        return w, b

    wqk_l, bqk_l, wv_l, bv_l, wo_l, bo_l = [], [], [], [], [], []
    w1_l, b1_l, w2_l, b2_l = [], [], [], []
    for _ in range(NL):
        wqk, bqk = lin(D, 2 * D)
        wqk = wqk.at[:, :D].multiply(scale)       # fold 1/sqrt(hd) into Q
        bqk = bqk.at[:D].multiply(scale)
        wv, bv = lin(D, D)
        wo, bo = lin(D, D)
        w1, b1 = lin(D, ff)
        w2, b2 = lin(ff, D)
        wqk_l.append(wqk);                 bqk_l.append(bqk.reshape(1, 2 * D))
        wv_l.append(wv);                   bv_l.append(bv.reshape(1, D))
        wo_l.append(wo.reshape(nhead, hd, D)); bo_l.append(bo.reshape(1, D))
        w1_l.append(w1);                   b1_l.append(b1.reshape(1, ff))
        w2_l.append(w2);                   b2_l.append(b2.reshape(1, D))

    params = dict(
        wqk=jnp.stack(wqk_l).astype(jnp.bfloat16), bqk=jnp.stack(bqk_l),
        wv=jnp.stack(wv_l).astype(jnp.bfloat16),   bv=jnp.stack(bv_l),
        wo=jnp.concatenate(wo_l, axis=0).astype(jnp.bfloat16),  # [NL*nhead, hd, D]
        bo=jnp.stack(bo_l),
        w1=jnp.stack(w1_l).astype(jnp.bfloat16),   b1=jnp.stack(b1_l),
        w2=jnp.stack(w2_l).astype(jnp.bfloat16),   b2=jnp.stack(b2_l),
        ln1_g=jnp.ones((NL, 1, D), jnp.float32), ln1_b=jnp.zeros((NL, 1, D), jnp.float32),
        ln2_g=jnp.ones((NL, 1, D), jnp.float32), ln2_b=jnp.zeros((NL, 1, D), jnp.float32),
        lnf_g=jnp.ones((1, D), jnp.float32),     lnf_b=jnp.zeros((1, D), jnp.float32),
    )

    # Conv1d(seq_len -> seq_len, kernel, stride=2, padding=kernel//2)
    std = 1.0 / math.sqrt(L * K)
    conv_w = std * random.normal(kg(), (L, L, K), dtype=jnp.float32)   # [Cout, Cin, K]
    params["conv_w"] = jnp.transpose(conv_w, (2, 0, 1)).astype(jnp.bfloat16)  # [K, Cout, Cin]
    params["conv_b"] = (0.01 * random.normal(kg(), (L,), dtype=jnp.float32)).reshape(L, 1)

    # 0/1 selection matrices implementing the stride-2 padded gather as matmuls
    stride, padw = 2, K // 2
    Lout = (D + 2 * padw - K) // stride + 1
    j = jnp.arange(D)[:, None]
    o = jnp.arange(Lout)[None, :]
    sel = jnp.stack([(j == (stride * o + k - padw)).astype(jnp.float32)
                     for k in range(K)])                               # [K, D, Lout]
    params["sel"] = sel.astype(jnp.bfloat16)
    return params


def sine_pos_embed(B, L, D):
    position = jnp.arange(L, dtype=jnp.float32)[:, None]
    div = jnp.exp(jnp.arange(0, D, 2, dtype=jnp.float32) * (-math.log(10000.0) / D))
    pe = jnp.zeros((L, D), jnp.float32)
    pe = pe.at[:, 0::2].set(jnp.sin(position * div))
    pe = pe.at[:, 1::2].set(jnp.cos(position * div))
    return jnp.broadcast_to(pe[None], (B, L, D))


# ----------------------------------------------------------------------------
# pure-JAX f32 reference (for a loose numerical sanity check)
# ----------------------------------------------------------------------------
def reference_forward(src, pos, params, cfg):
    f32 = jnp.float32
    B, L, D = src.shape
    NL, nhead = cfg["num_layers"], cfg["nhead"]
    hd = D // nhead
    eps = 1e-5
    act = functools.partial(_apply_act, act=cfg["activation"])

    def ln(v, g, b):
        mu = v.mean(-1, keepdims=True)
        c = v - mu
        var = (c * c).mean(-1, keepdims=True)
        return c / jnp.sqrt(var + eps) * g + b

    if pos is None:
        pos = jnp.zeros_like(src)
    x = src.astype(f32)
    for l in range(NL):
        src2 = ln(x, params["ln1_g"][l, 0], params["ln1_b"][l, 0])
        qk_in = src2 + pos
        qk = qk_in @ params["wqk"][l].astype(f32) + params["bqk"][l, 0]
        v = src2 @ params["wv"][l].astype(f32) + params["bv"][l, 0]
        q = qk[..., :D].reshape(B, L, nhead, hd).transpose(0, 2, 1, 3)
        k = qk[..., D:].reshape(B, L, nhead, hd).transpose(0, 2, 1, 3)
        vh = v.reshape(B, L, nhead, hd).transpose(0, 2, 1, 3)
        s = jnp.einsum("bhqd,bhkd->bhqk", q, k)        # scale already in wqk
        p = jax.nn.softmax(s, axis=-1)
        o = jnp.einsum("bhqk,bhkd->bhqd", p, vh).transpose(0, 2, 1, 3).reshape(B, L, D)
        wo = params["wo"][l * nhead:(l + 1) * nhead].reshape(D, D).astype(f32)
        x = x + o @ wo + params["bo"][l, 0]
        src2 = ln(x, params["ln2_g"][l, 0], params["ln2_b"][l, 0])
        h1 = act(src2 @ params["w1"][l].astype(f32) + params["b1"][l, 0])
        x = x + h1 @ params["w2"][l].astype(f32) + params["b2"][l, 0]
    if cfg["normalize_before"]:
        x = ln(x, params["lnf_g"][0], params["lnf_b"][0])
    # Conv1d over (channels = seq_len, length = d_model), stride 2, pad k//2.
    Kk = cfg["kernel"]
    stride, padw = 2, Kk // 2
    Lout = (D + 2 * padw - Kk) // stride + 1
    w = params["conv_w"].astype(f32)                   # [K, Cout, Cin]
    xp = jnp.pad(x, ((0, 0), (0, 0), (padw, padw)))
    idx = jnp.arange(Lout) * stride
    patches = jnp.stack([xp[:, :, idx + k] for k in range(Kk)], axis=-1)  # [B,Cin,Lout,K]
    y = jnp.einsum("kac,bcek->bae", w, patches) + params["conv_b"].reshape(1, L, 1)
    return act(y)


# ----------------------------------------------------------------------------
# main
# ----------------------------------------------------------------------------
if __name__ == "__main__":
    cfg = dict(num_layers=2, d_model=128, nhead=4, dim_feedforward=256,
               activation="relu", normalize_before=True, kernel=7,
               sequence_length=16)

    params = build_params(KeyGen(0), cfg)

    B = 2
    src = random.normal(random.PRNGKey(0),
                        (B, cfg["sequence_length"], cfg["d_model"]),
                        dtype=jnp.float32)
    pos = sine_pos_embed(B, cfg["sequence_length"], cfg["d_model"])

    fwd = jax.jit(lambda s, pe, p: trans_encoder_conv1d_act_forward(s, pe, p, cfg))
    out = jax.block_until_ready(fwd(src, pos, params))

    l_out = (cfg["d_model"] + 2 * (cfg["kernel"] // 2) - cfg["kernel"]) // 2 + 1
    assert out.shape == (B, cfg["sequence_length"], l_out), out.shape
    assert bool(jnp.all(jnp.isfinite(out)))

    # loose tolerance: bf16 MXU operands + approx reciprocal vs f32 reference
    ref = reference_forward(src, pos, params, cfg)
    err = float(jnp.max(jnp.abs(out - ref)))
    assert err < 2e-1, f"max abs error vs f32 reference: {err}"
    print("KERNEL_OK")
</pallas_src>

<mosaic_0001>
module attributes {stable_mosaic.version = 11 : i64} {
  func.func @_fused_encoder_conv_kernel(%arg0: i32, %arg1: memref<1x16x128xf32, #tpu.memory_space<vmem>>, %arg2: memref<1x16x128xf32, #tpu.memory_space<vmem>>, %arg3: memref<2x128x256xbf16, #tpu.memory_space<vmem>>, %arg4: memref<2x1x256xf32, #tpu.memory_space<vmem>>, %arg5: memref<2x128x128xbf16, #tpu.memory_space<vmem>>, %arg6: memref<2x1x128xf32, #tpu.memory_space<vmem>>, %arg7: memref<8x32x128xbf16, #tpu.memory_space<vmem>>, %arg8: memref<2x1x128xf32, #tpu.memory_space<vmem>>, %arg9: memref<2x128x256xbf16, #tpu.memory_space<vmem>>, %arg10: memref<2x1x256xf32, #tpu.memory_space<vmem>>, %arg11: memref<2x256x128xbf16, #tpu.memory_space<vmem>>, %arg12: memref<2x1x128xf32, #tpu.memory_space<vmem>>, %arg13: memref<2x1x128xf32, #tpu.memory_space<vmem>>, %arg14: memref<2x1x128xf32, #tpu.memory_space<vmem>>, %arg15: memref<2x1x128xf32, #tpu.memory_space<vmem>>, %arg16: memref<2x1x128xf32, #tpu.memory_space<vmem>>, %arg17: memref<1x128xf32, #tpu.memory_space<vmem>>, %arg18: memref<1x128xf32, #tpu.memory_space<vmem>>, %arg19: memref<7x16x16xbf16, #tpu.memory_space<vmem>>, %arg20: memref<16x1xf32, #tpu.memory_space<vmem>>, %arg21: memref<7x128x64xbf16, #tpu.memory_space<vmem>>, %arg22: memref<1x16x64xf32, #tpu.memory_space<vmem>>) attributes {dimension_semantics = [#tpu.dimension_semantics<parallel>], iteration_bounds = array<i64: 2>, scalar_prefetch = 0 : i64, scratch_operands = 0 : i64, tpu.core_type = #tpu.core_type<tc>, window_params = [{transform_indices = @transform_0, window_bounds = array<i64: 1, 16, 128>}, {transform_indices = @transform_1, window_bounds = array<i64: 1, 16, 128>}, {pipeline_mode = #tpu.pipeline_mode<synchronous>, transform_indices = @transform_2, window_bounds = array<i64: 2, 128, 256>}, {pipeline_mode = #tpu.pipeline_mode<synchronous>, transform_indices = @transform_3, window_bounds = array<i64: 2, 1, 256>}, {pipeline_mode = #tpu.pipeline_mode<synchronous>, transform_indices = @transform_4, window_bounds = array<i64: 2, 128, 128>}, {pipeline_mode = #tpu.pipeline_mode<synchronous>, transform_indices = @transform_5, window_bounds = array<i64: 2, 1, 128>}, {pipeline_mode = #tpu.pipeline_mode<synchronous>, transform_indices = @transform_6, window_bounds = array<i64: 8, 32, 128>}, {pipeline_mode = #tpu.pipeline_mode<synchronous>, transform_indices = @transform_7, window_bounds = array<i64: 2, 1, 128>}, {pipeline_mode = #tpu.pipeline_mode<synchronous>, transform_indices = @transform_8, window_bounds = array<i64: 2, 128, 256>}, {pipeline_mode = #tpu.pipeline_mode<synchronous>, transform_indices = @transform_9, window_bounds = array<i64: 2, 1, 256>}, {pipeline_mode = #tpu.pipeline_mode<synchronous>, transform_indices = @transform_10, window_bounds = array<i64: 2, 256, 128>}, {pipeline_mode = #tpu.pipeline_mode<synchronous>, transform_indices = @transform_11, window_bounds = array<i64: 2, 1, 128>}, {pipeline_mode = #tpu.pipeline_mode<synchronous>, transform_indices = @transform_12, window_bounds = array<i64: 2, 1, 128>}, {pipeline_mode = #tpu.pipeline_mode<synchronous>, transform_indices = @transform_13, window_bounds = array<i64: 2, 1, 128>}, {pipeline_mode = #tpu.pipeline_mode<synchronous>, transform_indices = @transform_14, window_bounds = array<i64: 2, 1, 128>}, {pipeline_mode = #tpu.pipeline_mode<synchronous>, transform_indices = @transform_15, window_bounds = array<i64: 2, 1, 128>}, {pipeline_mode = #tpu.pipeline_mode<synchronous>, transform_indices = @transform_16, window_bounds = array<i64: 1, 128>}, {pipeline_mode = #tpu.pipeline_mode<synchronous>, transform_indices = @transform_17, window_bounds = array<i64: 1, 128>}, {pipeline_mode = #tpu.pipeline_mode<synchronous>, transform_indices = @transform_18, window_bounds = array<i64: 7, 16, 16>}, {pipeline_mode = #tpu.pipeline_mode<synchronous>, transform_indices = @transform_19, window_bounds = array<i64: 16, 1>}, {pipeline_mode = #tpu.pipeline_mode<synchronous>, transform_indices = @transform_20, window_bounds = array<i64: 7, 128, 64>}, {transform_indices = @transform_21, window_bounds = array<i64: 1, 16, 64>}]} {
    %c0 = arith.constant 0 : index
    %c0_0 = arith.constant 0 : index
    %c0_1 = arith.constant 0 : index
    %0 = vector.load %arg1[%c0, %c0_0, %c0_1] : memref<1x16x128xf32, #tpu.memory_space<vmem>>, vector<1x16x128xf32>
    %1 = vector.shape_cast %0 : vector<1x16x128xf32> to vector<16x128xf32>
    %c0_2 = arith.constant 0 : index
    %c0_3 = arith.constant 0 : index
    %c0_4 = arith.constant 0 : index
    %2 = vector.load %arg2[%c0_2, %c0_3, %c0_4] : memref<1x16x128xf32, #tpu.memory_space<vmem>>, vector<1x16x128xf32>
    %3 = vector.shape_cast %2 : vector<1x16x128xf32> to vector<16x128xf32>
    %c0_5 = arith.constant 0 : index
    %c0_6 = arith.constant 0 : index
    %c0_7 = arith.constant 0 : index
    %4 = vector.load %arg13[%c0_5, %c0_6, %c0_7] : memref<2x1x128xf32, #tpu.memory_space<vmem>>, vector<1x1x128xf32>
    %5 = vector.shape_cast %4 : vector<1x1x128xf32> to vector<1x128xf32>
    %c0_8 = arith.constant 0 : index
    %c0_9 = arith.constant 0 : index
    %c0_10 = arith.constant 0 : index
    %6 = vector.load %arg14[%c0_8, %c0_9, %c0_10] : memref<2x1x128xf32, #tpu.memory_space<vmem>>, vector<1x1x128xf32>
    %7 = vector.shape_cast %6 : vector<1x1x128xf32> to vector<1x128xf32>
    %cst = arith.constant dense<0.000000e+00> : vector<16xf32>
    %8 = vector.multi_reduction <add>, %1, %cst [1] : vector<16x128xf32> to vector<16xf32>
    %9 = vector.shape_cast %8 : vector<16xf32> to vector<16x1xf32>
    %cst_11 = arith.constant 1.280000e+02 : f32
    %10 = vector.broadcast %cst_11 : f32 to vector<16x1xf32>
    %11 = arith.divf %9, %10 : vector<16x1xf32>
    %12 = vector.broadcast %11 : vector<16x1xf32> to vector<16x128xf32>
    %13 = arith.subf %1, %12 : vector<16x128xf32>
    %14 = arith.mulf %13, %13 : vector<16x128xf32>
    %cst_12 = arith.constant dense<0.000000e+00> : vector<16xf32>
    %15 = vector.multi_reduction <add>, %14, %cst_12 [1] : vector<16x128xf32> to vector<16xf32>
    %16 = vector.shape_cast %15 : vector<16xf32> to vector<16x1xf32>
    %cst_13 = arith.constant 1.280000e+02 : f32
    %17 = vector.broadcast %cst_13 : f32 to vector<16x1xf32>
    %18 = arith.divf %16, %17 : vector<16x1xf32>
    %cst_14 = arith.constant 9.99999974E-6 : f32
    %19 = vector.broadcast %cst_14 : f32 to vector<16x1xf32>
    %20 = arith.addf %18, %19 : vector<16x1xf32>
    %21 = math.rsqrt %20 : vector<16x1xf32>
    %22 = vector.broadcast %21 : vector<16x1xf32> to vector<16x128xf32>
    %23 = arith.mulf %13, %22 : vector<16x128xf32>
    %24 = vector.broadcast %5 : vector<1x128xf32> to vector<16x128xf32>
    %25 = arith.mulf %23, %24 : vector<16x128xf32>
    %26 = vector.broadcast %7 : vector<1x128xf32> to vector<16x128xf32>
    %27 = arith.addf %25, %26 : vector<16x128xf32>
    %28 = arith.addf %27, %3 : vector<16x128xf32>
    %29 = arith.truncf %28 : vector<16x128xf32> to vector<16x128xbf16>
    %c0_15 = arith.constant 0 : index
    %c0_16 = arith.constant 0 : index
    %c0_17 = arith.constant 0 : index
    %30 = vector.load %arg3[%c0_15, %c0_16, %c0_17] : memref<2x128x256xbf16, #tpu.memory_space<vmem>>, vector<1x128x256xbf16>
    %31 = vector.shape_cast %30 : vector<1x128x256xbf16> to vector<128x256xbf16>
    %cst_18 = arith.constant dense<0.000000e+00> : vector<16x256xf32>
    %32 = tpu.matmul %29, %31, %cst_18 {dimension_numbers = #tpu.dot_dimension_numbers<[1], [0], [0], [1], [0, 0, 1, 1], [], []>} : vector<16x128xbf16>, vector<128x256xbf16>, vector<16x256xf32> -> vector<16x256xf32>
    %c0_19 = arith.constant 0 : index
    %c0_20 = arith.constant 0 : index
    %c0_21 = arith.constant 0 : index
    %33 = vector.load %arg4[%c0_19, %c0_20, %c0_21] : memref<2x1x256xf32, #tpu.memory_space<vmem>>, vector<1x1x256xf32>
    %34 = vector.shape_cast %33 : vector<1x1x256xf32> to vector<1x256xf32>
    %35 = vector.broadcast %34 : vector<1x256xf32> to vector<16x256xf32>
    %36 = arith.addf %32, %35 : vector<16x256xf32>
    %37 = arith.truncf %27 : vector<16x128xf32> to vector<16x128xbf16>
    %c0_22 = arith.constant 0 : index
    %c0_23 = arith.constant 0 : index
    %c0_24 = arith.constant 0 : index
    %38 = vector.load %arg5[%c0_22, %c0_23, %c0_24] : memref<2x128x128xbf16, #tpu.memory_space<vmem>>, vector<1x128x128xbf16>
    %39 = vector.shape_cast %38 : vector<1x128x128xbf16> to vector<128x128xbf16>
    %cst_25 = arith.constant dense<0.000000e+00> : vector<16x128xf32>
    %40 = tpu.matmul %37, %39, %cst_25 {dimension_numbers = #tpu.dot_dimension_numbers<[1], [0], [0], [1], [0, 0, 1, 1], [], []>} : vector<16x128xbf16>, vector<128x128xbf16>, vector<16x128xf32> -> vector<16x128xf32>
    %c0_26 = arith.constant 0 : index
    %c0_27 = arith.constant 0 : index
    %c0_28 = arith.constant 0 : index
    %41 = vector.load %arg6[%c0_26, %c0_27, %c0_28] : memref<2x1x128xf32, #tpu.memory_space<vmem>>, vector<1x1x128xf32>
    %42 = vector.shape_cast %41 : vector<1x1x128xf32> to vector<1x128xf32>
    %43 = vector.broadcast %42 : vector<1x128xf32> to vector<16x128xf32>
    %44 = arith.addf %40, %43 : vector<16x128xf32>
    %cst_29 = arith.constant 0.000000e+00 : f32
    %45 = vector.broadcast %cst_29 : f32 to vector<16x128xf32>
    %46 = vector.extract_strided_slice %36 {offsets = [0, 0], sizes = [16, 32], strides = [1, 1]} : vector<16x256xf32> to vector<16x32xf32>
    %47 = arith.truncf %46 : vector<16x32xf32> to vector<16x32xbf16>
    %48 = vector.extract_strided_slice %36 {offsets = [0, 128], sizes = [16, 32], strides = [1, 1]} : vector<16x256xf32> to vector<16x32xf32>
    %49 = arith.truncf %48 : vector<16x32xf32> to vector<16x32xbf16>
    %50 = vector.extract_strided_slice %44 {offsets = [0, 0], sizes = [16, 32], strides = [1, 1]} : vector<16x128xf32> to vector<16x32xf32>
    %51 = arith.truncf %50 : vector<16x32xf32> to vector<16x32xbf16>
    %cst_30 = arith.constant dense<0.000000e+00> : vector<16x16xf32>
    %52 = tpu.matmul %47, %49, %cst_30 {dimension_numbers = #tpu.dot_dimension_numbers<[1], [1], [0], [0], [0, 0, 1, 0], [], []>} : vector<16x32xbf16>, vector<16x32xbf16>, vector<16x16xf32> -> vector<16x16xf32>
    %cst_31 = arith.constant dense<0xFF800000> : vector<16xf32>
    %53 = vector.multi_reduction <maximumf>, %52, %cst_31 [1] : vector<16x16xf32> to vector<16xf32>
    %54 = vector.shape_cast %53 : vector<16xf32> to vector<16x1xf32>
    %55 = vector.broadcast %54 : vector<16x1xf32> to vector<16x16xf32>
    %56 = arith.subf %52, %55 : vector<16x16xf32>
    %57 = math.exp %56 : vector<16x16xf32>
    %cst_32 = arith.constant dense<0.000000e+00> : vector<16xf32>
    %58 = vector.multi_reduction <add>, %57, %cst_32 [1] : vector<16x16xf32> to vector<16xf32>
    %59 = vector.shape_cast %58 : vector<16xf32> to vector<16x1xf32>
    %60 = tpu.reciprocal %59 {approx = true} : vector<16x1xf32> -> vector<16x1xf32>
    %61 = vector.broadcast %60 : vector<16x1xf32> to vector<16x16xf32>
    %62 = arith.mulf %57, %61 : vector<16x16xf32>
    %63 = arith.truncf %62 : vector<16x16xf32> to vector<16x16xbf16>
    %cst_33 = arith.constant dense<0.000000e+00> : vector<16x32xf32>
    %64 = tpu.matmul %63, %51, %cst_33 {dimension_numbers = #tpu.dot_dimension_numbers<[1], [0], [0], [1], [0, 0, 1, 1], [], []>} : vector<16x16xbf16>, vector<16x32xbf16>, vector<16x32xf32> -> vector<16x32xf32>
    %65 = arith.truncf %64 : vector<16x32xf32> to vector<16x32xbf16>
    %c0_34 = arith.constant 0 : index
    %c0_35 = arith.constant 0 : index
    %c0_36 = arith.constant 0 : index
    %66 = vector.load %arg7[%c0_34, %c0_35, %c0_36] : memref<8x32x128xbf16, #tpu.memory_space<vmem>>, vector<1x32x128xbf16>
    %67 = vector.shape_cast %66 : vector<1x32x128xbf16> to vector<32x128xbf16>
    %cst_37 = arith.constant dense<0.000000e+00> : vector<16x128xf32>
    %68 = tpu.matmul %65, %67, %cst_37 {dimension_numbers = #tpu.dot_dimension_numbers<[1], [0], [0], [1], [0, 0, 1, 1], [], []>} : vector<16x32xbf16>, vector<32x128xbf16>, vector<16x128xf32> -> vector<16x128xf32>
    %69 = arith.addf %45, %68 : vector<16x128xf32>
    %70 = vector.extract_strided_slice %36 {offsets = [0, 32], sizes = [16, 32], strides = [1, 1]} : vector<16x256xf32> to vector<16x32xf32>
    %71 = arith.truncf %70 : vector<16x32xf32> to vector<16x32xbf16>
    %72 = vector.extract_strided_slice %36 {offsets = [0, 160], sizes = [16, 32], strides = [1, 1]} : vector<16x256xf32> to vector<16x32xf32>
    %73 = arith.truncf %72 : vector<16x32xf32> to vector<16x32xbf16>
    %74 = vector.extract_strided_slice %44 {offsets = [0, 32], sizes = [16, 32], strides = [1, 1]} : vector<16x128xf32> to vector<16x32xf32>
    %75 = arith.truncf %74 : vector<16x32xf32> to vector<16x32xbf16>
    %cst_38 = arith.constant dense<0.000000e+00> : vector<16x16xf32>
    %76 = tpu.matmul %71, %73, %cst_38 {dimension_numbers = #tpu.dot_dimension_numbers<[1], [1], [0], [0], [0, 0, 1, 0], [], []>} : vector<16x32xbf16>, vector<16x32xbf16>, vector<16x16xf32> -> vector<16x16xf32>
    %cst_39 = arith.constant dense<0xFF800000> : vector<16xf32>
    %77 = vector.multi_reduction <maximumf>, %76, %cst_39 [1] : vector<16x16xf32> to vector<16xf32>
    %78 = vector.shape_cast %77 : vector<16xf32> to vector<16x1xf32>
    %79 = vector.broadcast %78 : vector<16x1xf32> to vector<16x16xf32>
    %80 = arith.subf %76, %79 : vector<16x16xf32>
    %81 = math.exp %80 : vector<16x16xf32>
    %cst_40 = arith.constant dense<0.000000e+00> : vector<16xf32>
    %82 = vector.multi_reduction <add>, %81, %cst_40 [1] : vector<16x16xf32> to vector<16xf32>
    %83 = vector.shape_cast %82 : vector<16xf32> to vector<16x1xf32>
    %84 = tpu.reciprocal %83 {approx = true} : vector<16x1xf32> -> vector<16x1xf32>
    %85 = vector.broadcast %84 : vector<16x1xf32> to vector<16x16xf32>
    %86 = arith.mulf %81, %85 : vector<16x16xf32>
    %87 = arith.truncf %86 : vector<16x16xf32> to vector<16x16xbf16>
    %cst_41 = arith.constant dense<0.000000e+00> : vector<16x32xf32>
    %88 = tpu.matmul %87, %75, %cst_41 {dimension_numbers = #tpu.dot_dimension_numbers<[1], [0], [0], [1], [0, 0, 1, 1], [], []>} : vector<16x16xbf16>, vector<16x32xbf16>, vector<16x32xf32> -> vector<16x32xf32>
    %89 = arith.truncf %88 : vector<16x32xf32> to vector<16x32xbf16>
    %c1 = arith.constant 1 : index
    %c0_42 = arith.constant 0 : index
    %c0_43 = arith.constant 0 : index
    %90 = vector.load %arg7[%c1, %c0_42, %c0_43] : memref<8x32x128xbf16, #tpu.memory_space<vmem>>, vector<1x32x128xbf16>
    %91 = vector.shape_cast %90 : vector<1x32x128xbf16> to vector<32x128xbf16>
    %cst_44 = arith.constant dense<0.000000e+00> : vector<16x128xf32>
    %92 = tpu.matmul %89, %91, %cst_44 {dimension_numbers = #tpu.dot_dimension_numbers<[1], [0], [0], [1], [0, 0, 1, 1], [], []>} : vector<16x32xbf16>, vector<32x128xbf16>, vector<16x128xf32> -> vector<16x128xf32>
    %93 = arith.addf %69, %92 : vector<16x128xf32>
    %94 = vector.extract_strided_slice %36 {offsets = [0, 64], sizes = [16, 32], strides = [1, 1]} : vector<16x256xf32> to vector<16x32xf32>
    %95 = arith.truncf %94 : vector<16x32xf32> to vector<16x32xbf16>
    %96 = vector.extract_strided_slice %36 {offsets = [0, 192], sizes = [16, 32], strides = [1, 1]} : vector<16x256xf32> to vector<16x32xf32>
    %97 = arith.truncf %96 : vector<16x32xf32> to vector<16x32xbf16>
    %98 = vector.extract_strided_slice %44 {offsets = [0, 64], sizes = [16, 32], strides = [1, 1]} : vector<16x128xf32> to vector<16x32xf32>
    %99 = arith.truncf %98 : vector<16x32xf32> to vector<16x32xbf16>
    %cst_45 = arith.constant dense<0.000000e+00> : vector<16x16xf32>
    %100 = tpu.matmul %95, %97, %cst_45 {dimension_numbers = #tpu.dot_dimension_numbers<[1], [1], [0], [0], [0, 0, 1, 0], [], []>} : vector<16x32xbf16>, vector<16x32xbf16>, vector<16x16xf32> -> vector<16x16xf32>
    %cst_46 = arith.constant dense<0xFF800000> : vector<16xf32>
    %101 = vector.multi_reduction <maximumf>, %100, %cst_46 [1] : vector<16x16xf32> to vector<16xf32>
    %102 = vector.shape_cast %101 : vector<16xf32> to vector<16x1xf32>
    %103 = vector.broadcast %102 : vector<16x1xf32> to vector<16x16xf32>
    %104 = arith.subf %100, %103 : vector<16x16xf32>
    %105 = math.exp %104 : vector<16x16xf32>
    %cst_47 = arith.constant dense<0.000000e+00> : vector<16xf32>
    %106 = vector.multi_reduction <add>, %105, %cst_47 [1] : vector<16x16xf32> to vector<16xf32>
    %107 = vector.shape_cast %106 : vector<16xf32> to vector<16x1xf32>
    %108 = tpu.reciprocal %107 {approx = true} : vector<16x1xf32> -> vector<16x1xf32>
    %109 = vector.broadcast %108 : vector<16x1xf32> to vector<16x16xf32>
    %110 = arith.mulf %105, %109 : vector<16x16xf32>
    %111 = arith.truncf %110 : vector<16x16xf32> to vector<16x16xbf16>
    %cst_48 = arith.constant dense<0.000000e+00> : vector<16x32xf32>
    %112 = tpu.matmul %111, %99, %cst_48 {dimension_numbers = #tpu.dot_dimension_numbers<[1], [0], [0], [1], [0, 0, 1, 1], [], []>} : vector<16x16xbf16>, vector<16x32xbf16>, vector<16x32xf32> -> vector<16x32xf32>
    %113 = arith.truncf %112 : vector<16x32xf32> to vector<16x32xbf16>
    %c2 = arith.constant 2 : index
    %c0_49 = arith.constant 0 : index
    %c0_50 = arith.constant 0 : index
    %114 = vector.load %arg7[%c2, %c0_49, %c0_50] : memref<8x32x128xbf16, #tpu.memory_space<vmem>>, vector<1x32x128xbf16>
    %115 = vector.shape_cast %114 : vector<1x32x128xbf16> to vector<32x128xbf16>
    %cst_51 = arith.constant dense<0.000000e+00> : vector<16x128xf32>
    %116 = tpu.matmul %113, %115, %cst_51 {dimension_numbers = #tpu.dot_dimension_numbers<[1], [0], [0], [1], [0, 0, 1, 1], [], []>} : vector<16x32xbf16>, vector<32x128xbf16>, vector<16x128xf32> -> vector<16x128xf32>
    %117 = arith.addf %93, %116 : vector<16x128xf32>
    %118 = vector.extract_strided_slice %36 {offsets = [0, 96], sizes = [16, 32], strides = [1, 1]} : vector<16x256xf32> to vector<16x32xf32>
    %119 = arith.truncf %118 : vector<16x32xf32> to vector<16x32xbf16>
    %120 = vector.extract_strided_slice %36 {offsets = [0, 224], sizes = [16, 32], strides = [1, 1]} : vector<16x256xf32> to vector<16x32xf32>
    %121 = arith.truncf %120 : vector<16x32xf32> to vector<16x32xbf16>
    %122 = vector.extract_strided_slice %44 {offsets = [0, 96], sizes = [16, 32], strides = [1, 1]} : vector<16x128xf32> to vector<16x32xf32>
    %123 = arith.truncf %122 : vector<16x32xf32> to vector<16x32xbf16>
    %cst_52 = arith.constant dense<0.000000e+00> : vector<16x16xf32>
    %124 = tpu.matmul %119, %121, %cst_52 {dimension_numbers = #tpu.dot_dimension_numbers<[1], [1], [0], [0], [0, 0, 1, 0], [], []>} : vector<16x32xbf16>, vector<16x32xbf16>, vector<16x16xf32> -> vector<16x16xf32>
    %cst_53 = arith.constant dense<0xFF800000> : vector<16xf32>
    %125 = vector.multi_reduction <maximumf>, %124, %cst_53 [1] : vector<16x16xf32> to vector<16xf32>
    %126 = vector.shape_cast %125 : vector<16xf32> to vector<16x1xf32>
    %127 = vector.broadcast %126 : vector<16x1xf32> to vector<16x16xf32>
    %128 = arith.subf %124, %127 : vector<16x16xf32>
    %129 = math.exp %128 : vector<16x16xf32>
    %cst_54 = arith.constant dense<0.000000e+00> : vector<16xf32>
    %130 = vector.multi_reduction <add>, %129, %cst_54 [1] : vector<16x16xf32> to vector<16xf32>
    %131 = vector.shape_cast %130 : vector<16xf32> to vector<16x1xf32>
    %132 = tpu.reciprocal %131 {approx = true} : vector<16x1xf32> -> vector<16x1xf32>
    %133 = vector.broadcast %132 : vector<16x1xf32> to vector<16x16xf32>
    %134 = arith.mulf %129, %133 : vector<16x16xf32>
    %135 = arith.truncf %134 : vector<16x16xf32> to vector<16x16xbf16>
    %cst_55 = arith.constant dense<0.000000e+00> : vector<16x32xf32>
    %136 = tpu.matmul %135, %123, %cst_55 {dimension_numbers = #tpu.dot_dimension_numbers<[1], [0], [0], [1], [0, 0, 1, 1], [], []>} : vector<16x16xbf16>, vector<16x32xbf16>, vector<16x32xf32> -> vector<16x32xf32>
    %137 = arith.truncf %136 : vector<16x32xf32> to vector<16x32xbf16>
    %c3 = arith.constant 3 : index
    %c0_56 = arith.constant 0 : index
    %c0_57 = arith.constant 0 : index
    %138 = vector.load %arg7[%c3, %c0_56, %c0_57] : memref<8x32x128xbf16, #tpu.memory_space<vmem>>, vector<1x32x128xbf16>
    %139 = vector.shape_cast %138 : vector<1x32x128xbf16> to vector<32x128xbf16>
    %cst_58 = arith.constant dense<0.000000e+00> : vector<16x128xf32>
    %140 = tpu.matmul %137, %139, %cst_58 {dimension_numbers = #tpu.dot_dimension_numbers<[1], [0], [0], [1], [0, 0, 1, 1], [], []>} : vector<16x32xbf16>, vector<32x128xbf16>, vector<16x128xf32> -> vector<16x128xf32>
    %141 = arith.addf %117, %140 : vector<16x128xf32>
    %142 = arith.addf %1, %141 : vector<16x128xf32>
    %c0_59 = arith.constant 0 : index
    %c0_60 = arith.constant 0 : index
    %c0_61 = arith.constant 0 : index
    %143 = vector.load %arg8[%c0_59, %c0_60, %c0_61] : memref<2x1x128xf32, #tpu.memory_space<vmem>>, vector<1x1x128xf32>
    %144 = vector.shape_cast %143 : vector<1x1x128xf32> to vector<1x128xf32>
    %145 = vector.broadcast %144 : vector<1x128xf32> to vector<16x128xf32>
    %146 = arith.addf %142, %145 : vector<16x128xf32>
    %c0_62 = arith.constant 0 : index
    %c0_63 = arith.constant 0 : index
    %c0_64 = arith.constant 0 : index
    %147 = vector.load %arg15[%c0_62, %c0_63, %c0_64] : memref<2x1x128xf32, #tpu.memory_space<vmem>>, vector<1x1x128xf32>
    %148 = vector.shape_cast %147 : vector<1x1x128xf32> to vector<1x128xf32>
    %c0_65 = arith.constant 0 : index
    %c0_66 = arith.constant 0 : index
    %c0_67 = arith.constant 0 : index
    %149 = vector.load %arg16[%c0_65, %c0_66, %c0_67] : memref<2x1x128xf32, #tpu.memory_space<vmem>>, vector<1x1x128xf32>
    %150 = vector.shape_cast %149 : vector<1x1x128xf32> to vector<1x128xf32>
    %cst_68 = arith.constant dense<0.000000e+00> : vector<16xf32>
    %151 = vector.multi_reduction <add>, %146, %cst_68 [1] : vector<16x128xf32> to vector<16xf32>
    %152 = vector.shape_cast %151 : vector<16xf32> to vector<16x1xf32>
    %cst_69 = arith.constant 1.280000e+02 : f32
    %153 = vector.broadcast %cst_69 : f32 to vector<16x1xf32>
    %154 = arith.divf %152, %153 : vector<16x1xf32>
    %155 = vector.broadcast %154 : vector<16x1xf32> to vector<16x128xf32>
    %156 = arith.subf %146, %155 : vector<16x128xf32>
    %157 = arith.mulf %156, %156 : vector<16x128xf32>
    %cst_70 = arith.constant dense<0.000000e+00> : vector<16xf32>
    %158 = vector.multi_reduction <add>, %157, %cst_70 [1] : vector<16x128xf32> to vector<16xf32>
    %159 = vector.shape_cast %158 : vector<16xf32> to vector<16x1xf32>
    %cst_71 = arith.constant 1.280000e+02 : f32
    %160 = vector.broadcast %cst_71 : f32 to vector<16x1xf32>
    %161 = arith.divf %159, %160 : vector<16x1xf32>
    %cst_72 = arith.constant 9.99999974E-6 : f32
    %162 = vector.broadcast %cst_72 : f32 to vector<16x1xf32>
    %163 = arith.addf %161, %162 : vector<16x1xf32>
    %164 = math.rsqrt %163 : vector<16x1xf32>
    %165 = vector.broadcast %164 : vector<16x1xf32> to vector<16x128xf32>
    %166 = arith.mulf %156, %165 : vector<16x128xf32>
    %167 = vector.broadcast %148 : vector<1x128xf32> to vector<16x128xf32>
    %168 = arith.mulf %166, %167 : vector<16x128xf32>
    %169 = vector.broadcast %150 : vector<1x128xf32> to vector<16x128xf32>
    %170 = arith.addf %168, %169 : vector<16x128xf32>
    %171 = arith.truncf %170 : vector<16x128xf32> to vector<16x128xbf16>
    %c0_73 = arith.constant 0 : index
    %c0_74 = arith.constant 0 : index
    %c0_75 = arith.constant 0 : index
    %172 = vector.load %arg9[%c0_73, %c0_74, %c0_75] : memref<2x128x256xbf16, #tpu.memory_space<vmem>>, vector<1x128x256xbf16>
    %173 = vector.shape_cast %172 : vector<1x128x256xbf16> to vector<128x256xbf16>
    %cst_76 = arith.constant dense<0.000000e+00> : vector<16x256xf32>
    %174 = tpu.matmul %171, %173, %cst_76 {dimension_numbers = #tpu.dot_dimension_numbers<[1], [0], [0], [1], [0, 0, 1, 1], [], []>} : vector<16x128xbf16>, vector<128x256xbf16>, vector<16x256xf32> -> vector<16x256xf32>
    %c0_77 = arith.constant 0 : index
    %c0_78 = arith.constant 0 : index
    %c0_79 = arith.constant 0 : index
    %175 = vector.load %arg10[%c0_77, %c0_78, %c0_79] : memref<2x1x256xf32, #tpu.memory_space<vmem>>, vector<1x1x256xf32>
    %176 = vector.shape_cast %175 : vector<1x1x256xf32> to vector<1x256xf32>
    %177 = vector.broadcast %176 : vector<1x256xf32> to vector<16x256xf32>
    %178 = arith.addf %174, %177 : vector<16x256xf32>
    %cst_80 = arith.constant 0.000000e+00 : f32
    %179 = vector.broadcast %cst_80 : f32 to vector<16x256xf32>
    %180 = arith.maximumf %178, %179 : vector<16x256xf32>
    %181 = arith.truncf %180 : vector<16x256xf32> to vector<16x256xbf16>
    %c0_81 = arith.constant 0 : index
    %c0_82 = arith.constant 0 : index
    %c0_83 = arith.constant 0 : index
    %182 = vector.load %arg11[%c0_81, %c0_82, %c0_83] : memref<2x256x128xbf16, #tpu.memory_space<vmem>>, vector<1x256x128xbf16>
    %183 = vector.shape_cast %182 : vector<1x256x128xbf16> to vector<256x128xbf16>
    %cst_84 = arith.constant dense<0.000000e+00> : vector<16x128xf32>
    %184 = tpu.matmul %181, %183, %cst_84 {dimension_numbers = #tpu.dot_dimension_numbers<[1], [0], [0], [1], [0, 0, 1, 1], [], []>} : vector<16x256xbf16>, vector<256x128xbf16>, vector<16x128xf32> -> vector<16x128xf32>
    %185 = arith.addf %146, %184 : vector<16x128xf32>
    %c0_85 = arith.constant 0 : index
    %c0_86 = arith.constant 0 : index
    %c0_87 = arith.constant 0 : index
    %186 = vector.load %arg12[%c0_85, %c0_86, %c0_87] : memref<2x1x128xf32, #tpu.memory_space<vmem>>, vector<1x1x128xf32>
    %187 = vector.shape_cast %186 : vector<1x1x128xf32> to vector<1x128xf32>
    %188 = vector.broadcast %187 : vector<1x128xf32> to vector<16x128xf32>
    %189 = arith.addf %185, %188 : vector<16x128xf32>
    %c1_88 = arith.constant 1 : index
    %c0_89 = arith.constant 0 : index
    %c0_90 = arith.constant 0 : index
    %190 = vector.load %arg13[%c1_88, %c0_89, %c0_90] : memref<2x1x128xf32, #tpu.memory_space<vmem>>, vector<1x1x128xf32>
    %191 = vector.shape_cast %190 : vector<1x1x128xf32> to vector<1x128xf32>
    %c1_91 = arith.constant 1 : index
    %c0_92 = arith.constant 0 : index
    %c0_93 = arith.constant 0 : index
    %192 = vector.load %arg14[%c1_91, %c0_92, %c0_93] : memref<2x1x128xf32, #tpu.memory_space<vmem>>, vector<1x1x128xf32>
    %193 = vector.shape_cast %192 : vector<1x1x128xf32> to vector<1x128xf32>
    %cst_94 = arith.constant dense<0.000000e+00> : vector<16xf32>
    %194 = vector.multi_reduction <add>, %189, %cst_94 [1] : vector<16x128xf32> to vector<16xf32>
    %195 = vector.shape_cast %194 : vector<16xf32> to vector<16x1xf32>
    %cst_95 = arith.constant 1.280000e+02 : f32
    %196 = vector.broadcast %cst_95 : f32 to vector<16x1xf32>
    %197 = arith.divf %195, %196 : vector<16x1xf32>
    %198 = vector.broadcast %197 : vector<16x1xf32> to vector<16x128xf32>
    %199 = arith.subf %189, %198 : vector<16x128xf32>
    %200 = arith.mulf %199, %199 : vector<16x128xf32>
    %cst_96 = arith.constant dense<0.000000e+00> : vector<16xf32>
    %201 = vector.multi_reduction <add>, %200, %cst_96 [1] : vector<16x128xf32> to vector<16xf32>
    %202 = vector.shape_cast %201 : vector<16xf32> to vector<16x1xf32>
    %cst_97 = arith.constant 1.280000e+02 : f32
    %203 = vector.broadcast %cst_97 : f32 to vector<16x1xf32>
    %204 = arith.divf %202, %203 : vector<16x1xf32>
    %cst_98 = arith.constant 9.99999974E-6 : f32
    %205 = vector.broadcast %cst_98 : f32 to vector<16x1xf32>
    %206 = arith.addf %204, %205 : vector<16x1xf32>
    %207 = math.rsqrt %206 : vector<16x1xf32>
    %208 = vector.broadcast %207 : vector<16x1xf32> to vector<16x128xf32>
    %209 = arith.mulf %199, %208 : vector<16x128xf32>
    %210 = vector.broadcast %191 : vector<1x128xf32> to vector<16x128xf32>
    %211 = arith.mulf %209, %210 : vector<16x128xf32>
    %212 = vector.broadcast %193 : vector<1x128xf32> to vector<16x128xf32>
    %213 = arith.addf %211, %212 : vector<16x128xf32>
    %214 = arith.addf %213, %3 : vector<16x128xf32>
    %215 = arith.truncf %214 : vector<16x128xf32> to vector<16x128xbf16>
    %c1_99 = arith.constant 1 : index
    %c0_100 = arith.constant 0 : index
    %c0_101 = arith.constant 0 : index
    %216 = vector.load %arg3[%c1_99, %c0_100, %c0_101] : memref<2x128x256xbf16, #tpu.memory_space<vmem>>, vector<1x128x256xbf16>
    %217 = vector.shape_cast %216 : vector<1x128x256xbf16> to vector<128x256xbf16>
    %cst_102 = arith.constant dense<0.000000e+00> : vector<16x256xf32>
    %218 = tpu.matmul %215, %217, %cst_102 {dimension_numbers = #tpu.dot_dimension_numbers<[1], [0], [0], [1], [0, 0, 1, 1], [], []>} : vector<16x128xbf16>, vector<128x256xbf16>, vector<16x256xf32> -> vector<16x256xf32>
    %c1_103 = arith.constant 1 : index
    %c0_104 = arith.constant 0 : index
    %c0_105 = arith.constant 0 : index
    %219 = vector.load %arg4[%c1_103, %c0_104, %c0_105] : memref<2x1x256xf32, #tpu.memory_space<vmem>>, vector<1x1x256xf32>
    %220 = vector.shape_cast %219 : vector<1x1x256xf32> to vector<1x256xf32>
    %221 = vector.broadcast %220 : vector<1x256xf32> to vector<16x256xf32>
    %222 = arith.addf %218, %221 : vector<16x256xf32>
    %223 = arith.truncf %213 : vector<16x128xf32> to vector<16x128xbf16>
    %c1_106 = arith.constant 1 : index
    %c0_107 = arith.constant 0 : index
    %c0_108 = arith.constant 0 : index
    %224 = vector.load %arg5[%c1_106, %c0_107, %c0_108] : memref<2x128x128xbf16, #tpu.memory_space<vmem>>, vector<1x128x128xbf16>
    %225 = vector.shape_cast %224 : vector<1x128x128xbf16> to vector<128x128xbf16>
    %cst_109 = arith.constant dense<0.000000e+00> : vector<16x128xf32>
    %226 = tpu.matmul %223, %225, %cst_109 {dimension_numbers = #tpu.dot_dimension_numbers<[1], [0], [0], [1], [0, 0, 1, 1], [], []>} : vector<16x128xbf16>, vector<128x128xbf16>, vector<16x128xf32> -> vector<16x128xf32>
    %c1_110 = arith.constant 1 : index
    %c0_111 = arith.constant 0 : index
    %c0_112 = arith.constant 0 : index
    %227 = vector.load %arg6[%c1_110, %c0_111, %c0_112] : memref<2x1x128xf32, #tpu.memory_space<vmem>>, vector<1x1x128xf32>
    %228 = vector.shape_cast %227 : vector<1x1x128xf32> to vector<1x128xf32>
    %229 = vector.broadcast %228 : vector<1x128xf32> to vector<16x128xf32>
    %230 = arith.addf %226, %229 : vector<16x128xf32>
    %cst_113 = arith.constant 0.000000e+00 : f32
    %231 = vector.broadcast %cst_113 : f32 to vector<16x128xf32>
    %232 = vector.extract_strided_slice %222 {offsets = [0, 0], sizes = [16, 32], strides = [1, 1]} : vector<16x256xf32> to vector<16x32xf32>
    %233 = arith.truncf %232 : vector<16x32xf32> to vector<16x32xbf16>
    %234 = vector.extract_strided_slice %222 {offsets = [0, 128], sizes = [16, 32], strides = [1, 1]} : vector<16x256xf32> to vector<16x32xf32>
    %235 = arith.truncf %234 : vector<16x32xf32> to vector<16x32xbf16>
    %236 = vector.extract_strided_slice %230 {offsets = [0, 0], sizes = [16, 32], strides = [1, 1]} : vector<16x128xf32> to vector<16x32xf32>
    %237 = arith.truncf %236 : vector<16x32xf32> to vector<16x32xbf16>
    %cst_114 = arith.constant dense<0.000000e+00> : vector<16x16xf32>
    %238 = tpu.matmul %233, %235, %cst_114 {dimension_numbers = #tpu.dot_dimension_numbers<[1], [1], [0], [0], [0, 0, 1, 0], [], []>} : vector<16x32xbf16>, vector<16x32xbf16>, vector<16x16xf32> -> vector<16x16xf32>
    %cst_115 = arith.constant dense<0xFF800000> : vector<16xf32>
    %239 = vector.multi_reduction <maximumf>, %238, %cst_115 [1] : vector<16x16xf32> to vector<16xf32>
    %240 = vector.shape_cast %239 : vector<16xf32> to vector<16x1xf32>
    %241 = vector.broadcast %240 : vector<16x1xf32> to vector<16x16xf32>
    %242 = arith.subf %238, %241 : vector<16x16xf32>
    %243 = math.exp %242 : vector<16x16xf32>
    %cst_116 = arith.constant dense<0.000000e+00> : vector<16xf32>
    %244 = vector.multi_reduction <add>, %243, %cst_116 [1] : vector<16x16xf32> to vector<16xf32>
    %245 = vector.shape_cast %244 : vector<16xf32> to vector<16x1xf32>
    %246 = tpu.reciprocal %245 {approx = true} : vector<16x1xf32> -> vector<16x1xf32>
    %247 = vector.broadcast %246 : vector<16x1xf32> to vector<16x16xf32>
    %248 = arith.mulf %243, %247 : vector<16x16xf32>
    %249 = arith.truncf %248 : vector<16x16xf32> to vector<16x16xbf16>
    %cst_117 = arith.constant dense<0.000000e+00> : vector<16x32xf32>
    %250 = tpu.matmul %249, %237, %cst_117 {dimension_numbers = #tpu.dot_dimension_numbers<[1], [0], [0], [1], [0, 0, 1, 1], [], []>} : vector<16x16xbf16>, vector<16x32xbf16>, vector<16x32xf32> -> vector<16x32xf32>
    %251 = arith.truncf %250 : vector<16x32xf32> to vector<16x32xbf16>
    %c4 = arith.constant 4 : index
    %c0_118 = arith.constant 0 : index
    %c0_119 = arith.constant 0 : index
    %252 = vector.load %arg7[%c4, %c0_118, %c0_119] : memref<8x32x128xbf16, #tpu.memory_space<vmem>>, vector<1x32x128xbf16>
    %253 = vector.shape_cast %252 : vector<1x32x128xbf16> to vector<32x128xbf16>
    %cst_120 = arith.constant dense<0.000000e+00> : vector<16x128xf32>
    %254 = tpu.matmul %251, %253, %cst_120 {dimension_numbers = #tpu.dot_dimension_numbers<[1], [0], [0], [1], [0, 0, 1, 1], [], []>} : vector<16x32xbf16>, vector<32x128xbf16>, vector<16x128xf32> -> vector<16x128xf32>
    %255 = arith.addf %231, %254 : vector<16x128xf32>
    %256 = vector.extract_strided_slice %222 {offsets = [0, 32], sizes = [16, 32], strides = [1, 1]} : vector<16x256xf32> to vector<16x32xf32>
    %257 = arith.truncf %256 : vector<16x32xf32> to vector<16x32xbf16>
    %258 = vector.extract_strided_slice %222 {offsets = [0, 160], sizes = [16, 32], strides = [1, 1]} : vector<16x256xf32> to vector<16x32xf32>
    %259 = arith.truncf %258 : vector<16x32xf32> to vector<16x32xbf16>
    %260 = vector.extract_strided_slice %230 {offsets = [0, 32], sizes = [16, 32], strides = [1, 1]} : vector<16x128xf32> to vector<16x32xf32>
    %261 = arith.truncf %260 : vector<16x32xf32> to vector<16x32xbf16>
    %cst_121 = arith.constant dense<0.000000e+00> : vector<16x16xf32>
    %262 = tpu.matmul %257, %259, %cst_121 {dimension_numbers = #tpu.dot_dimension_numbers<[1], [1], [0], [0], [0, 0, 1, 0], [], []>} : vector<16x32xbf16>, vector<16x32xbf16>, vector<16x16xf32> -> vector<16x16xf32>
    %cst_122 = arith.constant dense<0xFF800000> : vector<16xf32>
    %263 = vector.multi_reduction <maximumf>, %262, %cst_122 [1] : vector<16x16xf32> to vector<16xf32>
    %264 = vector.shape_cast %263 : vector<16xf32> to vector<16x1xf32>
    %265 = vector.broadcast %264 : vector<16x1xf32> to vector<16x16xf32>
    %266 = arith.subf %262, %265 : vector<16x16xf32>
    %267 = math.exp %266 : vector<16x16xf32>
    %cst_123 = arith.constant dense<0.000000e+00> : vector<16xf32>
    %268 = vector.multi_reduction <add>, %267, %cst_123 [1] : vector<16x16xf32> to vector<16xf32>
    %269 = vector.shape_cast %268 : vector<16xf32> to vector<16x1xf32>
    %270 = tpu.reciprocal %269 {approx = true} : vector<16x1xf32> -> vector<16x1xf32>
    %271 = vector.broadcast %270 : vector<16x1xf32> to vector<16x16xf32>
    %272 = arith.mulf %267, %271 : vector<16x16xf32>
    %273 = arith.truncf %272 : vector<16x16xf32> to vector<16x16xbf16>
    %cst_124 = arith.constant dense<0.000000e+00> : vector<16x32xf32>
    %274 = tpu.matmul %273, %261, %cst_124 {dimension_numbers = #tpu.dot_dimension_numbers<[1], [0], [0], [1], [0, 0, 1, 1], [], []>} : vector<16x16xbf16>, vector<16x32xbf16>, vector<16x32xf32> -> vector<16x32xf32>
    %275 = arith.truncf %274 : vector<16x32xf32> to vector<16x32xbf16>
    %c5 = arith.constant 5 : index
    %c0_125 = arith.constant 0 : index
    %c0_126 = arith.constant 0 : index
    %276 = vector.load %arg7[%c5, %c0_125, %c0_126] : memref<8x32x128xbf16, #tpu.memory_space<vmem>>, vector<1x32x128xbf16>
    %277 = vector.shape_cast %276 : vector<1x32x128xbf16> to vector<32x128xbf16>
    %cst_127 = arith.constant dense<0.000000e+00> : vector<16x128xf32>
    %278 = tpu.matmul %275, %277, %cst_127 {dimension_numbers = #tpu.dot_dimension_numbers<[1], [0], [0], [1], [0, 0, 1, 1], [], []>} : vector<16x32xbf16>, vector<32x128xbf16>, vector<16x128xf32> -> vector<16x128xf32>
    %279 = arith.addf %255, %278 : vector<16x128xf32>
    %280 = vector.extract_strided_slice %222 {offsets = [0, 64], sizes = [16, 32], strides = [1, 1]} : vector<16x256xf32> to vector<16x32xf32>
    %281 = arith.truncf %280 : vector<16x32xf32> to vector<16x32xbf16>
    %282 = vector.extract_strided_slice %222 {offsets = [0, 192], sizes = [16, 32], strides = [1, 1]} : vector<16x256xf32> to vector<16x32xf32>
    %283 = arith.truncf %282 : vector<16x32xf32> to vector<16x32xbf16>
    %284 = vector.extract_strided_slice %230 {offsets = [0, 64], sizes = [16, 32], strides = [1, 1]} : vector<16x128xf32> to vector<16x32xf32>
    %285 = arith.truncf %284 : vector<16x32xf32> to vector<16x32xbf16>
    %cst_128 = arith.constant dense<0.000000e+00> : vector<16x16xf32>
    %286 = tpu.matmul %281, %283, %cst_128 {dimension_numbers = #tpu.dot_dimension_numbers<[1], [1], [0], [0], [0, 0, 1, 0], [], []>} : vector<16x32xbf16>, vector<16x32xbf16>, vector<16x16xf32> -> vector<16x16xf32>
    %cst_129 = arith.constant dense<0xFF800000> : vector<16xf32>
    %287 = vector.multi_reduction <maximumf>, %286, %cst_129 [1] : vector<16x16xf32> to vector<16xf32>
    %288 = vector.shape_cast %287 : vector<16xf32> to vector<16x1xf32>
    %289 = vector.broadcast %288 : vector<16x1xf32> to vector<16x16xf32>
    %290 = arith.subf %286, %289 : vector<16x16xf32>
    %291 = math.exp %290 : vector<16x16xf32>
    %cst_130 = arith.constant dense<0.000000e+00> : vector<16xf32>
    %292 = vector.multi_reduction <add>, %291, %cst_130 [1] : vector<16x16xf32> to vector<16xf32>
    %293 = vector.shape_cast %292 : vector<16xf32> to vector<16x1xf32>
    %294 = tpu.reciprocal %293 {approx = true} : vector<16x1xf32> -> vector<16x1xf32>
    %295 = vector.broadcast %294 : vector<16x1xf32> to vector<16x16xf32>
    %296 = arith.mulf %291, %295 : vector<16x16xf32>
    %297 = arith.truncf %296 : vector<16x16xf32> to vector<16x16xbf16>
    %cst_131 = arith.constant dense<0.000000e+00> : vector<16x32xf32>
    %298 = tpu.matmul %297, %285, %cst_131 {dimension_numbers = #tpu.dot_dimension_numbers<[1], [0], [0], [1], [0, 0, 1, 1], [], []>} : vector<16x16xbf16>, vector<16x32xbf16>, vector<16x32xf32> -> vector<16x32xf32>
    %299 = arith.truncf %298 : vector<16x32xf32> to vector<16x32xbf16>
    %c6 = arith.constant 6 : index
    %c0_132 = arith.constant 0 : index
    %c0_133 = arith.constant 0 : index
    %300 = vector.load %arg7[%c6, %c0_132, %c0_133] : memref<8x32x128xbf16, #tpu.memory_space<vmem>>, vector<1x32x128xbf16>
    %301 = vector.shape_cast %300 : vector<1x32x128xbf16> to vector<32x128xbf16>
    %cst_134 = arith.constant dense<0.000000e+00> : vector<16x128xf32>
    %302 = tpu.matmul %299, %301, %cst_134 {dimension_numbers = #tpu.dot_dimension_numbers<[1], [0], [0], [1], [0, 0, 1, 1], [], []>} : vector<16x32xbf16>, vector<32x128xbf16>, vector<16x128xf32> -> vector<16x128xf32>
    %303 = arith.addf %279, %302 : vector<16x128xf32>
    %304 = vector.extract_strided_slice %222 {offsets = [0, 96], sizes = [16, 32], strides = [1, 1]} : vector<16x256xf32> to vector<16x32xf32>
    %305 = arith.truncf %304 : vector<16x32xf32> to vector<16x32xbf16>
    %306 = vector.extract_strided_slice %222 {offsets = [0, 224], sizes = [16, 32], strides = [1, 1]} : vector<16x256xf32> to vector<16x32xf32>
    %307 = arith.truncf %306 : vector<16x32xf32> to vector<16x32xbf16>
    %308 = vector.extract_strided_slice %230 {offsets = [0, 96], sizes = [16, 32], strides = [1, 1]} : vector<16x128xf32> to vector<16x32xf32>
    %309 = arith.truncf %308 : vector<16x32xf32> to vector<16x32xbf16>
    %cst_135 = arith.constant dense<0.000000e+00> : vector<16x16xf32>
    %310 = tpu.matmul %305, %307, %cst_135 {dimension_numbers = #tpu.dot_dimension_numbers<[1], [1], [0], [0], [0, 0, 1, 0], [], []>} : vector<16x32xbf16>, vector<16x32xbf16>, vector<16x16xf32> -> vector<16x16xf32>
    %cst_136 = arith.constant dense<0xFF800000> : vector<16xf32>
    %311 = vector.multi_reduction <maximumf>, %310, %cst_136 [1] : vector<16x16xf32> to vector<16xf32>
    %312 = vector.shape_cast %311 : vector<16xf32> to vector<16x1xf32>
    %313 = vector.broadcast %312 : vector<16x1xf32> to vector<16x16xf32>
    %314 = arith.subf %310, %313 : vector<16x16xf32>
    %315 = math.exp %314 : vector<16x16xf32>
    %cst_137 = arith.constant dense<0.000000e+00> : vector<16xf32>
    %316 = vector.multi_reduction <add>, %315, %cst_137 [1] : vector<16x16xf32> to vector<16xf32>
    %317 = vector.shape_cast %316 : vector<16xf32> to vector<16x1xf32>
    %318 = tpu.reciprocal %317 {approx = true} : vector<16x1xf32> -> vector<16x1xf32>
    %319 = vector.broadcast %318 : vector<16x1xf32> to vector<16x16xf32>
    %320 = arith.mulf %315, %319 : vector<16x16xf32>
    %321 = arith.truncf %320 : vector<16x16xf32> to vector<16x16xbf16>
    %cst_138 = arith.constant dense<0.000000e+00> : vector<16x32xf32>
    %322 = tpu.matmul %321, %309, %cst_138 {dimension_numbers = #tpu.dot_dimension_numbers<[1], [0], [0], [1], [0, 0, 1, 1], [], []>} : vector<16x16xbf16>, vector<16x32xbf16>, vector<16x32xf32> -> vector<16x32xf32>
    %323 = arith.truncf %322 : vector<16x32xf32> to vector<16x32xbf16>
    %c7 = arith.constant 7 : index
    %c0_139 = arith.constant 0 : index
    %c0_140 = arith.constant 0 : index
    %324 = vector.load %arg7[%c7, %c0_139, %c0_140] : memref<8x32x128xbf16, #tpu.memory_space<vmem>>, vector<1x32x128xbf16>
    %325 = vector.shape_cast %324 : vector<1x32x128xbf16> to vector<32x128xbf16>
    %cst_141 = arith.constant dense<0.000000e+00> : vector<16x128xf32>
    %326 = tpu.matmul %323, %325, %cst_141 {dimension_numbers = #tpu.dot_dimension_numbers<[1], [0], [0], [1], [0, 0, 1, 1], [], []>} : vector<16x32xbf16>, vector<32x128xbf16>, vector<16x128xf32> -> vector<16x128xf32>
    %327 = arith.addf %303, %326 : vector<16x128xf32>
    %328 = arith.addf %189, %327 : vector<16x128xf32>
    %c1_142 = arith.constant 1 : index
    %c0_143 = arith.constant 0 : index
    %c0_144 = arith.constant 0 : index
    %329 = vector.load %arg8[%c1_142, %c0_143, %c0_144] : memref<2x1x128xf32, #tpu.memory_space<vmem>>, vector<1x1x128xf32>
    %330 = vector.shape_cast %329 : vector<1x1x128xf32> to vector<1x128xf32>
    %331 = vector.broadcast %330 : vector<1x128xf32> to vector<16x128xf32>
    %332 = arith.addf %328, %331 : vector<16x128xf32>
    %c1_145 = arith.constant 1 : index
    %c0_146 = arith.constant 0 : index
    %c0_147 = arith.constant 0 : index
    %333 = vector.load %arg15[%c1_145, %c0_146, %c0_147] : memref<2x1x128xf32, #tpu.memory_space<vmem>>, vector<1x1x128xf32>
    %334 = vector.shape_cast %333 : vector<1x1x128xf32> to vector<1x128xf32>
    %c1_148 = arith.constant 1 : index
    %c0_149 = arith.constant 0 : index
    %c0_150 = arith.constant 0 : index
    %335 = vector.load %arg16[%c1_148, %c0_149, %c0_150] : memref<2x1x128xf32, #tpu.memory_space<vmem>>, vector<1x1x128xf32>
    %336 = vector.shape_cast %335 : vector<1x1x128xf32> to vector<1x128xf32>
    %cst_151 = arith.constant dense<0.000000e+00> : vector<16xf32>
    %337 = vector.multi_reduction <add>, %332, %cst_151 [1] : vector<16x128xf32> to vector<16xf32>
    %338 = vector.shape_cast %337 : vector<16xf32> to vector<16x1xf32>
    %cst_152 = arith.constant 1.280000e+02 : f32
    %339 = vector.broadcast %cst_152 : f32 to vector<16x1xf32>
    %340 = arith.divf %338, %339 : vector<16x1xf32>
    %341 = vector.broadcast %340 : vector<16x1xf32> to vector<16x128xf32>
    %342 = arith.subf %332, %341 : vector<16x128xf32>
    %343 = arith.mulf %342, %342 : vector<16x128xf32>
    %cst_153 = arith.constant dense<0.000000e+00> : vector<16xf32>
    %344 = vector.multi_reduction <add>, %343, %cst_153 [1] : vector<16x128xf32> to vector<16xf32>
    %345 = vector.shape_cast %344 : vector<16xf32> to vector<16x1xf32>
    %cst_154 = arith.constant 1.280000e+02 : f32
    %346 = vector.broadcast %cst_154 : f32 to vector<16x1xf32>
    %347 = arith.divf %345, %346 : vector<16x1xf32>
    %cst_155 = arith.constant 9.99999974E-6 : f32
    %348 = vector.broadcast %cst_155 : f32 to vector<16x1xf32>
    %349 = arith.addf %347, %348 : vector<16x1xf32>
    %350 = math.rsqrt %349 : vector<16x1xf32>
    %351 = vector.broadcast %350 : vector<16x1xf32> to vector<16x128xf32>
    %352 = arith.mulf %342, %351 : vector<16x128xf32>
    %353 = vector.broadcast %334 : vector<1x128xf32> to vector<16x128xf32>
    %354 = arith.mulf %352, %353 : vector<16x128xf32>
    %355 = vector.broadcast %336 : vector<1x128xf32> to vector<16x128xf32>
    %356 = arith.addf %354, %355 : vector<16x128xf32>
    %357 = arith.truncf %356 : vector<16x128xf32> to vector<16x128xbf16>
    %c1_156 = arith.constant 1 : index
    %c0_157 = arith.constant 0 : index
    %c0_158 = arith.constant 0 : index
    %358 = vector.load %arg9[%c1_156, %c0_157, %c0_158] : memref<2x128x256xbf16, #tpu.memory_space<vmem>>, vector<1x128x256xbf16>
    %359 = vector.shape_cast %358 : vector<1x128x256xbf16> to vector<128x256xbf16>
    %cst_159 = arith.constant dense<0.000000e+00> : vector<16x256xf32>
    %360 = tpu.matmul %357, %359, %cst_159 {dimension_numbers = #tpu.dot_dimension_numbers<[1], [0], [0], [1], [0, 0, 1, 1], [], []>} : vector<16x128xbf16>, vector<128x256xbf16>, vector<16x256xf32> -> vector<16x256xf32>
    %c1_160 = arith.constant 1 : index
    %c0_161 = arith.constant 0 : index
    %c0_162 = arith.constant 0 : index
    %361 = vector.load %arg10[%c1_160, %c0_161, %c0_162] : memref<2x1x256xf32, #tpu.memory_space<vmem>>, vector<1x1x256xf32>
    %362 = vector.shape_cast %361 : vector<1x1x256xf32> to vector<1x256xf32>
    %363 = vector.broadcast %362 : vector<1x256xf32> to vector<16x256xf32>
    %364 = arith.addf %360, %363 : vector<16x256xf32>
    %cst_163 = arith.constant 0.000000e+00 : f32
    %365 = vector.broadcast %cst_163 : f32 to vector<16x256xf32>
    %366 = arith.maximumf %364, %365 : vector<16x256xf32>
    %367 = arith.truncf %366 : vector<16x256xf32> to vector<16x256xbf16>
    %c1_164 = arith.constant 1 : index
    %c0_165 = arith.constant 0 : index
    %c0_166 = arith.constant 0 : index
    %368 = vector.load %arg11[%c1_164, %c0_165, %c0_166] : memref<2x256x128xbf16, #tpu.memory_space<vmem>>, vector<1x256x128xbf16>
    %369 = vector.shape_cast %368 : vector<1x256x128xbf16> to vector<256x128xbf16>
    %cst_167 = arith.constant dense<0.000000e+00> : vector<16x128xf32>
    %370 = tpu.matmul %367, %369, %cst_167 {dimension_numbers = #tpu.dot_dimension_numbers<[1], [0], [0], [1], [0, 0, 1, 1], [], []>} : vector<16x256xbf16>, vector<256x128xbf16>, vector<16x128xf32> -> vector<16x128xf32>
    %371 = arith.addf %332, %370 : vector<16x128xf32>
    %c1_168 = arith.constant 1 : index
    %c0_169 = arith.constant 0 : index
    %c0_170 = arith.constant 0 : index
    %372 = vector.load %arg12[%c1_168, %c0_169, %c0_170] : memref<2x1x128xf32, #tpu.memory_space<vmem>>, vector<1x1x128xf32>
    %373 = vector.shape_cast %372 : vector<1x1x128xf32> to vector<1x128xf32>
    %374 = vector.broadcast %373 : vector<1x128xf32> to vector<16x128xf32>
    %375 = arith.addf %371, %374 : vector<16x128xf32>
    %c0_171 = arith.constant 0 : index
    %c0_172 = arith.constant 0 : index
    %376 = vector.load %arg17[%c0_171, %c0_172] : memref<1x128xf32, #tpu.memory_space<vmem>>, vector<1x128xf32>
    %c0_173 = arith.constant 0 : index
    %c0_174 = arith.constant 0 : index
    %377 = vector.load %arg18[%c0_173, %c0_174] : memref<1x128xf32, #tpu.memory_space<vmem>>, vector<1x128xf32>
    %cst_175 = arith.constant dense<0.000000e+00> : vector<16xf32>
    %378 = vector.multi_reduction <add>, %375, %cst_175 [1] : vector<16x128xf32> to vector<16xf32>
    %379 = vector.shape_cast %378 : vector<16xf32> to vector<16x1xf32>
    %cst_176 = arith.constant 1.280000e+02 : f32
    %380 = vector.broadcast %cst_176 : f32 to vector<16x1xf32>
    %381 = arith.divf %379, %380 : vector<16x1xf32>
    %382 = vector.broadcast %381 : vector<16x1xf32> to vector<16x128xf32>
    %383 = arith.subf %375, %382 : vector<16x128xf32>
    %384 = arith.mulf %383, %383 : vector<16x128xf32>
    %cst_177 = arith.constant dense<0.000000e+00> : vector<16xf32>
    %385 = vector.multi_reduction <add>, %384, %cst_177 [1] : vector<16x128xf32> to vector<16xf32>
    %386 = vector.shape_cast %385 : vector<16xf32> to vector<16x1xf32>
    %cst_178 = arith.constant 1.280000e+02 : f32
    %387 = vector.broadcast %cst_178 : f32 to vector<16x1xf32>
    %388 = arith.divf %386, %387 : vector<16x1xf32>
    %cst_179 = arith.constant 9.99999974E-6 : f32
    %389 = vector.broadcast %cst_179 : f32 to vector<16x1xf32>
    %390 = arith.addf %388, %389 : vector<16x1xf32>
    %391 = math.rsqrt %390 : vector<16x1xf32>
    %392 = vector.broadcast %391 : vector<16x1xf32> to vector<16x128xf32>
    %393 = arith.mulf %383, %392 : vector<16x128xf32>
    %394 = vector.broadcast %376 : vector<1x128xf32> to vector<16x128xf32>
    %395 = arith.mulf %393, %394 : vector<16x128xf32>
    %396 = vector.broadcast %377 : vector<1x128xf32> to vector<16x128xf32>
    %397 = arith.addf %395, %396 : vector<16x128xf32>
    %398 = arith.truncf %397 : vector<16x128xf32> to vector<16x128xbf16>
    %cst_180 = arith.constant 0.000000e+00 : f32
    %399 = vector.broadcast %cst_180 : f32 to vector<16x64xf32>
    %c0_181 = arith.constant 0 : index
    %c0_182 = arith.constant 0 : index
    %c0_183 = arith.constant 0 : index
    %400 = vector.load %arg19[%c0_181, %c0_182, %c0_183] : memref<7x16x16xbf16, #tpu.memory_space<vmem>>, vector<1x16x16xbf16>
    %401 = vector.shape_cast %400 : vector<1x16x16xbf16> to vector<16x16xbf16>
    %cst_184 = arith.constant dense<0.000000e+00> : vector<16x128xf32>
    %402 = tpu.matmul %401, %398, %cst_184 {dimension_numbers = #tpu.dot_dimension_numbers<[1], [0], [0], [1], [0, 0, 1, 1], [], []>} : vector<16x16xbf16>, vector<16x128xbf16>, vector<16x128xf32> -> vector<16x128xf32>
    %403 = arith.truncf %402 : vector<16x128xf32> to vector<16x128xbf16>
    %c0_185 = arith.constant 0 : index
    %c0_186 = arith.constant 0 : index
    %c0_187 = arith.constant 0 : index
    %404 = vector.load %arg21[%c0_185, %c0_186, %c0_187] : memref<7x128x64xbf16, #tpu.memory_space<vmem>>, vector<1x128x64xbf16>
    %405 = vector.shape_cast %404 : vector<1x128x64xbf16> to vector<128x64xbf16>
    %cst_188 = arith.constant dense<0.000000e+00> : vector<16x64xf32>
    %406 = tpu.matmul %403, %405, %cst_188 {dimension_numbers = #tpu.dot_dimension_numbers<[1], [0], [0], [1], [0, 0, 1, 1], [], []>} : vector<16x128xbf16>, vector<128x64xbf16>, vector<16x64xf32> -> vector<16x64xf32>
    %407 = arith.addf %399, %406 : vector<16x64xf32>
    %c1_189 = arith.constant 1 : index
    %c0_190 = arith.constant 0 : index
    %c0_191 = arith.constant 0 : index
    %408 = vector.load %arg19[%c1_189, %c0_190, %c0_191] : memref<7x16x16xbf16, #tpu.memory_space<vmem>>, vector<1x16x16xbf16>
    %409 = vector.shape_cast %408 : vector<1x16x16xbf16> to vector<16x16xbf16>
    %cst_192 = arith.constant dense<0.000000e+00> : vector<16x128xf32>
    %410 = tpu.matmul %409, %398, %cst_192 {dimension_numbers = #tpu.dot_dimension_numbers<[1], [0], [0], [1], [0, 0, 1, 1], [], []>} : vector<16x16xbf16>, vector<16x128xbf16>, vector<16x128xf32> -> vector<16x128xf32>
    %411 = arith.truncf %410 : vector<16x128xf32> to vector<16x128xbf16>
    %c1_193 = arith.constant 1 : index
    %c0_194 = arith.constant 0 : index
    %c0_195 = arith.constant 0 : index
    %412 = vector.load %arg21[%c1_193, %c0_194, %c0_195] : memref<7x128x64xbf16, #tpu.memory_space<vmem>>, vector<1x128x64xbf16>
    %413 = vector.shape_cast %412 : vector<1x128x64xbf16> to vector<128x64xbf16>
    %cst_196 = arith.constant dense<0.000000e+00> : vector<16x64xf32>
    %414 = tpu.matmul %411, %413, %cst_196 {dimension_numbers = #tpu.dot_dimension_numbers<[1], [0], [0], [1], [0, 0, 1, 1], [], []>} : vector<16x128xbf16>, vector<128x64xbf16>, vector<16x64xf32> -> vector<16x64xf32>
    %415 = arith.addf %407, %414 : vector<16x64xf32>
    %c2_197 = arith.constant 2 : index
    %c0_198 = arith.constant 0 : index
    %c0_199 = arith.constant 0 : index
    %416 = vector.load %arg19[%c2_197, %c0_198, %c0_199] : memref<7x16x16xbf16, #tpu.memory_space<vmem>>, vector<1x16x16xbf16>
    %417 = vector.shape_cast %416 : vector<1x16x16xbf16> to vector<16x16xbf16>
    %cst_200 = arith.constant dense<0.000000e+00> : vector<16x128xf32>
    %418 = tpu.matmul %417, %398, %cst_200 {dimension_numbers = #tpu.dot_dimension_numbers<[1], [0], [0], [1], [0, 0, 1, 1], [], []>} : vector<16x16xbf16>, vector<16x128xbf16>, vector<16x128xf32> -> vector<16x128xf32>
    %419 = arith.truncf %418 : vector<16x128xf32> to vector<16x128xbf16>
    %c2_201 = arith.constant 2 : index
    %c0_202 = arith.constant 0 : index
    %c0_203 = arith.constant 0 : index
    %420 = vector.load %arg21[%c2_201, %c0_202, %c0_203] : memref<7x128x64xbf16, #tpu.memory_space<vmem>>, vector<1x128x64xbf16>
    %421 = vector.shape_cast %420 : vector<1x128x64xbf16> to vector<128x64xbf16>
    %cst_204 = arith.constant dense<0.000000e+00> : vector<16x64xf32>
    %422 = tpu.matmul %419, %421, %cst_204 {dimension_numbers = #tpu.dot_dimension_numbers<[1], [0], [0], [1], [0, 0, 1, 1], [], []>} : vector<16x128xbf16>, vector<128x64xbf16>, vector<16x64xf32> -> vector<16x64xf32>
    %423 = arith.addf %415, %422 : vector<16x64xf32>
    %c3_205 = arith.constant 3 : index
    %c0_206 = arith.constant 0 : index
    %c0_207 = arith.constant 0 : index
    %424 = vector.load %arg19[%c3_205, %c0_206, %c0_207] : memref<7x16x16xbf16, #tpu.memory_space<vmem>>, vector<1x16x16xbf16>
    %425 = vector.shape_cast %424 : vector<1x16x16xbf16> to vector<16x16xbf16>
    %cst_208 = arith.constant dense<0.000000e+00> : vector<16x128xf32>
    %426 = tpu.matmul %425, %398, %cst_208 {dimension_numbers = #tpu.dot_dimension_numbers<[1], [0], [0], [1], [0, 0, 1, 1], [], []>} : vector<16x16xbf16>, vector<16x128xbf16>, vector<16x128xf32> -> vector<16x128xf32>
    %427 = arith.truncf %426 : vector<16x128xf32> to vector<16x128xbf16>
    %c3_209 = arith.constant 3 : index
    %c0_210 = arith.constant 0 : index
    %c0_211 = arith.constant 0 : index
    %428 = vector.load %arg21[%c3_209, %c0_210, %c0_211] : memref<7x128x64xbf16, #tpu.memory_space<vmem>>, vector<1x128x64xbf16>
    %429 = vector.shape_cast %428 : vector<1x128x64xbf16> to vector<128x64xbf16>
    %cst_212 = arith.constant dense<0.000000e+00> : vector<16x64xf32>
    %430 = tpu.matmul %427, %429, %cst_212 {dimension_numbers = #tpu.dot_dimension_numbers<[1], [0], [0], [1], [0, 0, 1, 1], [], []>} : vector<16x128xbf16>, vector<128x64xbf16>, vector<16x64xf32> -> vector<16x64xf32>
    %431 = arith.addf %423, %430 : vector<16x64xf32>
    %c4_213 = arith.constant 4 : index
    %c0_214 = arith.constant 0 : index
    %c0_215 = arith.constant 0 : index
    %432 = vector.load %arg19[%c4_213, %c0_214, %c0_215] : memref<7x16x16xbf16, #tpu.memory_space<vmem>>, vector<1x16x16xbf16>
    %433 = vector.shape_cast %432 : vector<1x16x16xbf16> to vector<16x16xbf16>
    %cst_216 = arith.constant dense<0.000000e+00> : vector<16x128xf32>
    %434 = tpu.matmul %433, %398, %cst_216 {dimension_numbers = #tpu.dot_dimension_numbers<[1], [0], [0], [1], [0, 0, 1, 1], [], []>} : vector<16x16xbf16>, vector<16x128xbf16>, vector<16x128xf32> -> vector<16x128xf32>
    %435 = arith.truncf %434 : vector<16x128xf32> to vector<16x128xbf16>
    %c4_217 = arith.constant 4 : index
    %c0_218 = arith.constant 0 : index
    %c0_219 = arith.constant 0 : index
    %436 = vector.load %arg21[%c4_217, %c0_218, %c0_219] : memref<7x128x64xbf16, #tpu.memory_space<vmem>>, vector<1x128x64xbf16>
    %437 = vector.shape_cast %436 : vector<1x128x64xbf16> to vector<128x64xbf16>
    %cst_220 = arith.constant dense<0.000000e+00> : vector<16x64xf32>
    %438 = tpu.matmul %435, %437, %cst_220 {dimension_numbers = #tpu.dot_dimension_numbers<[1], [0], [0], [1], [0, 0, 1, 1], [], []>} : vector<16x128xbf16>, vector<128x64xbf16>, vector<16x64xf32> -> vector<16x64xf32>
    %439 = arith.addf %431, %438 : vector<16x64xf32>
    %c5_221 = arith.constant 5 : index
    %c0_222 = arith.constant 0 : index
    %c0_223 = arith.constant 0 : index
    %440 = vector.load %arg19[%c5_221, %c0_222, %c0_223] : memref<7x16x16xbf16, #tpu.memory_space<vmem>>, vector<1x16x16xbf16>
    %441 = vector.shape_cast %440 : vector<1x16x16xbf16> to vector<16x16xbf16>
    %cst_224 = arith.constant dense<0.000000e+00> : vector<16x128xf32>
    %442 = tpu.matmul %441, %398, %cst_224 {dimension_numbers = #tpu.dot_dimension_numbers<[1], [0], [0], [1], [0, 0, 1, 1], [], []>} : vector<16x16xbf16>, vector<16x128xbf16>, vector<16x128xf32> -> vector<16x128xf32>
    %443 = arith.truncf %442 : vector<16x128xf32> to vector<16x128xbf16>
    %c5_225 = arith.constant 5 : index
    %c0_226 = arith.constant 0 : index
    %c0_227 = arith.constant 0 : index
    %444 = vector.load %arg21[%c5_225, %c0_226, %c0_227] : memref<7x128x64xbf16, #tpu.memory_space<vmem>>, vector<1x128x64xbf16>
    %445 = vector.shape_cast %444 : vector<1x128x64xbf16> to vector<128x64xbf16>
    %cst_228 = arith.constant dense<0.000000e+00> : vector<16x64xf32>
    %446 = tpu.matmul %443, %445, %cst_228 {dimension_numbers = #tpu.dot_dimension_numbers<[1], [0], [0], [1], [0, 0, 1, 1], [], []>} : vector<16x128xbf16>, vector<128x64xbf16>, vector<16x64xf32> -> vector<16x64xf32>
    %447 = arith.addf %439, %446 : vector<16x64xf32>
    %c6_229 = arith.constant 6 : index
    %c0_230 = arith.constant 0 : index
    %c0_231 = arith.constant 0 : index
    %448 = vector.load %arg19[%c6_229, %c0_230, %c0_231] : memref<7x16x16xbf16, #tpu.memory_space<vmem>>, vector<1x16x16xbf16>
    %449 = vector.shape_cast %448 : vector<1x16x16xbf16> to vector<16x16xbf16>
    %cst_232 = arith.constant dense<0.000000e+00> : vector<16x128xf32>
    %450 = tpu.matmul %449, %398, %cst_232 {dimension_numbers = #tpu.dot_dimension_numbers<[1], [0], [0], [1], [0, 0, 1, 1], [], []>} : vector<16x16xbf16>, vector<16x128xbf16>, vector<16x128xf32> -> vector<16x128xf32>
    %451 = arith.truncf %450 : vector<16x128xf32> to vector<16x128xbf16>
    %c6_233 = arith.constant 6 : index
    %c0_234 = arith.constant 0 : index
    %c0_235 = arith.constant 0 : index
    %452 = vector.load %arg21[%c6_233, %c0_234, %c0_235] : memref<7x128x64xbf16, #tpu.memory_space<vmem>>, vector<1x128x64xbf16>
    %453 = vector.shape_cast %452 : vector<1x128x64xbf16> to vector<128x64xbf16>
    %cst_236 = arith.constant dense<0.000000e+00> : vector<16x64xf32>
    %454 = tpu.matmul %451, %453, %cst_236 {dimension_numbers = #tpu.dot_dimension_numbers<[1], [0], [0], [1], [0, 0, 1, 1], [], []>} : vector<16x128xbf16>, vector<128x64xbf16>, vector<16x64xf32> -> vector<16x64xf32>
    %455 = arith.addf %447, %454 : vector<16x64xf32>
    %c0_237 = arith.constant 0 : index
    %c0_238 = arith.constant 0 : index
    %456 = vector.load %arg20[%c0_237, %c0_238] : memref<16x1xf32, #tpu.memory_space<vmem>>, vector<16x1xf32>
    %457 = vector.broadcast %456 : vector<16x1xf32> to vector<16x64xf32>
    %458 = arith.addf %455, %457 : vector<16x64xf32>
    %cst_239 = arith.constant 0.000000e+00 : f32
    %459 = vector.broadcast %cst_239 : f32 to vector<16x64xf32>
    %460 = arith.maximumf %458, %459 : vector<16x64xf32>
    %c0_240 = arith.constant 0 : index
    %c0_241 = arith.constant 0 : index
    %c0_242 = arith.constant 0 : index
    %461 = vector.load %arg22[%c0_240, %c0_241, %c0_242] : memref<1x16x64xf32, #tpu.memory_space<vmem>>, vector<1x16x64xf32>
    %462 = vector.shape_cast %461 : vector<1x16x64xf32> to vector<16x64xf32>
    %463 = vector.shape_cast %460 : vector<16x64xf32> to vector<1x16x64xf32>
    tpu.vector_store %arg22[%c0_240, %c0_241, %c0_242], %463 {strides = array<i32>} : memref<1x16x64xf32, #tpu.memory_space<vmem>>, vector<1x16x64xf32>,
    return
  }
  func.func @transform_0(%arg0: i32) -> (i32, i32, i32) {
    %c0_i32 = arith.constant 0 : i32
    %c0_i32_0 = arith.constant 0 : i32
    %c0_i32_1 = arith.constant 0 : i32
    return %arg0, %c0_i32, %c0_i32_0 : i32, i32, i32
  }
  func.func @transform_1(%arg0: i32) -> (i32, i32, i32) {
    %c0_i32 = arith.constant 0 : i32
    %c0_i32_0 = arith.constant 0 : i32
    %c0_i32_1 = arith.constant 0 : i32
    return %arg0, %c0_i32, %c0_i32_0 : i32, i32, i32
  }
  func.func @transform_2(%arg0: i32) -> (i32, i32, i32) {
    %c0_i32 = arith.constant 0 : i32
    %c0_i32_0 = arith.constant 0 : i32
    %c0_i32_1 = arith.constant 0 : i32
    %c0_i32_2 = arith.constant 0 : i32
    return %c0_i32, %c0_i32_0, %c0_i32_1 : i32, i32, i32
  }
  func.func @transform_3(%arg0: i32) -> (i32, i32, i32) {
    %c0_i32 = arith.constant 0 : i32
    %c0_i32_0 = arith.constant 0 : i32
    %c0_i32_1 = arith.constant 0 : i32
    %c0_i32_2 = arith.constant 0 : i32
    return %c0_i32, %c0_i32_0, %c0_i32_1 : i32, i32, i32
  }
  func.func @transform_4(%arg0: i32) -> (i32, i32, i32) {
    %c0_i32 = arith.constant 0 : i32
    %c0_i32_0 = arith.constant 0 : i32
    %c0_i32_1 = arith.constant 0 : i32
    %c0_i32_2 = arith.constant 0 : i32
    return %c0_i32, %c0_i32_0, %c0_i32_1 : i32, i32, i32
  }
  func.func @transform_5(%arg0: i32) -> (i32, i32, i32) {
    %c0_i32 = arith.constant 0 : i32
    %c0_i32_0 = arith.constant 0 : i32
    %c0_i32_1 = arith.constant 0 : i32
    %c0_i32_2 = arith.constant 0 : i32
    return %c0_i32, %c0_i32_0, %c0_i32_1 : i32, i32, i32
  }
  func.func @transform_6(%arg0: i32) -> (i32, i32, i32) {
    %c0_i32 = arith.constant 0 : i32
    %c0_i32_0 = arith.constant 0 : i32
    %c0_i32_1 = arith.constant 0 : i32
    %c0_i32_2 = arith.constant 0 : i32
    return %c0_i32, %c0_i32_0, %c0_i32_1 : i32, i32, i32
  }
  func.func @transform_7(%arg0: i32) -> (i32, i32, i32) {
    %c0_i32 = arith.constant 0 : i32
    %c0_i32_0 = arith.constant 0 : i32
    %c0_i32_1 = arith.constant 0 : i32
    %c0_i32_2 = arith.constant 0 : i32
    return %c0_i32, %c0_i32_0, %c0_i32_1 : i32, i32, i32
  }
  func.func @transform_8(%arg0: i32) -> (i32, i32, i32) {
    %c0_i32 = arith.constant 0 : i32
    %c0_i32_0 = arith.constant 0 : i32
    %c0_i32_1 = arith.constant 0 : i32
    %c0_i32_2 = arith.constant 0 : i32
    return %c0_i32, %c0_i32_0, %c0_i32_1 : i32, i32, i32
  }
  func.func @transform_9(%arg0: i32) -> (i32, i32, i32) {
    %c0_i32 = arith.constant 0 : i32
    %c0_i32_0 = arith.constant 0 : i32
    %c0_i32_1 = arith.constant 0 : i32
    %c0_i32_2 = arith.constant 0 : i32
    return %c0_i32, %c0_i32_0, %c0_i32_1 : i32, i32, i32
  }
  func.func @transform_10(%arg0: i32) -> (i32, i32, i32) {
    %c0_i32 = arith.constant 0 : i32
    %c0_i32_0 = arith.constant 0 : i32
    %c0_i32_1 = arith.constant 0 : i32
    %c0_i32_2 = arith.constant 0 : i32
    return %c0_i32, %c0_i32_0, %c0_i32_1 : i32, i32, i32
  }
  func.func @transform_11(%arg0: i32) -> (i32, i32, i32) {
    %c0_i32 = arith.constant 0 : i32
    %c0_i32_0 = arith.constant 0 : i32
    %c0_i32_1 = arith.constant 0 : i32
    %c0_i32_2 = arith.constant 0 : i32
    return %c0_i32, %c0_i32_0, %c0_i32_1 : i32, i32, i32
  }
  func.func @transform_12(%arg0: i32) -> (i32, i32, i32) {
    %c0_i32 = arith.constant 0 : i32
    %c0_i32_0 = arith.constant 0 : i32
    %c0_i32_1 = arith.constant 0 : i32
    %c0_i32_2 = arith.constant 0 : i32
    return %c0_i32, %c0_i32_0, %c0_i32_1 : i32, i32, i32
  }
  func.func @transform_13(%arg0: i32) -> (i32, i32, i32) {
    %c0_i32 = arith.constant 0 : i32
    %c0_i32_0 = arith.constant 0 : i32
    %c0_i32_1 = arith.constant 0 : i32
    %c0_i32_2 = arith.constant 0 : i32
    return %c0_i32, %c0_i32_0, %c0_i32_1 : i32, i32, i32
  }
  func.func @transform_14(%arg0: i32) -> (i32, i32, i32) {
    %c0_i32 = arith.constant 0 : i32
    %c0_i32_0 = arith.constant 0 : i32
    %c0_i32_1 = arith.constant 0 : i32
    %c0_i32_2 = arith.constant 0 : i32
    return %c0_i32, %c0_i32_0, %c0_i32_1 : i32, i32, i32
  }
  func.func @transform_15(%arg0: i32) -> (i32, i32, i32) {
    %c0_i32 = arith.constant 0 : i32
    %c0_i32_0 = arith.constant 0 : i32
    %c0_i32_1 = arith.constant 0 : i32
    %c0_i32_2 = arith.constant 0 : i32
    return %c0_i32, %c0_i32_0, %c0_i32_1 : i32, i32, i32
  }
  func.func @transform_16(%arg0: i32) -> (i32, i32) {
    %c0_i32 = arith.constant 0 : i32
    %c0_i32_0 = arith.constant 0 : i32
    %c0_i32_1 = arith.constant 0 : i32
    return %c0_i32, %c0_i32_0 : i32, i32
  }
  func.func @transform_17(%arg0: i32) -> (i32, i32) {
    %c0_i32 = arith.constant 0 : i32
    %c0_i32_0 = arith.constant 0 : i32
    %c0_i32_1 = arith.constant 0 : i32
    return %c0_i32, %c0_i32_0 : i32, i32
  }
  func.func @transform_18(%arg0: i32) -> (i32, i32, i32) {
    %c0_i32 = arith.constant 0 : i32
    %c0_i32_0 = arith.constant 0 : i32
    %c0_i32_1 = arith.constant 0 : i32
    %c0_i32_2 = arith.constant 0 : i32
    return %c0_i32, %c0_i32_0, %c0_i32_1 : i32, i32, i32
  }
  func.func @transform_19(%arg0: i32) -> (i32, i32) {
    %c0_i32 = arith.constant 0 : i32
    %c0_i32_0 = arith.constant 0 : i32
    %c0_i32_1 = arith.constant 0 : i32
    return %c0_i32, %c0_i32_0 : i32, i32
  }
  func.func @transform_20(%arg0: i32) -> (i32, i32, i32) {
    %c0_i32 = arith.constant 0 : i32
    %c0_i32_0 = arith.constant 0 : i32
    %c0_i32_1 = arith.constant 0 : i32
    %c0_i32_2 = arith.constant 0 : i32
    return %c0_i32, %c0_i32_0, %c0_i32_1 : i32, i32, i32
  }
  func.func @transform_21(%arg0: i32) -> (i32, i32, i32) {
    %c0_i32 = arith.constant 0 : i32
    %c0_i32_0 = arith.constant 0 : i32
    %c0_i32_1 = arith.constant 0 : i32
    return %arg0, %c0_i32, %c0_i32_0 : i32, i32, i32
  }
}

</mosaic_0001>

<bundles_post_ra>
// kernel: _lambda_.1
= control target key start
LH: loop header
LB: loop body
LE: loop exit
PB: predicated region body
PF: predicated region fallthrough
CT: control target
= control target key end

     0   :  { %s8071_s0 = inlined_call_operand.hbm [shape: f32[2,16,128], index: 0, kind: input, shape index: {}]   ;;  %s8072_s1 = inlined_call_operand.hbm [shape: f32[2,16,128], index: 1, kind: input, shape index: {}]   ;;  %s8073_s2 = inlined_call_operand.vmem [shape: bf16[2,128,256], index: 2, kind: input, shape index: {}]   ;;  %s8074_s3 = inlined_call_operand.vmem [shape: f32[2,1,256], index: 3, kind: input, shape index: {}]   ;;  %s8075_s4 = inlined_call_operand.vmem [shape: bf16[2,128,128], index: 4, kind: input, shape index: {}]   ;;  %s8076_s5 = inlined_call_operand.vmem [shape: f32[2,1,128], index: 5, kind: input, shape index: {}]   ;;  %s8077_s6 = inlined_call_operand.hbm [shape: bf16[8,32,128], index: 6, kind: input, shape index: {}]   ;;  %s8078_s7 = inlined_call_operand.vmem [shape: f32[2,1,128], index: 7, kind: input, shape index: {}]   ;;  %s8079_s8 = inlined_call_operand.vmem [shape: bf16[2,128,256], index: 8, kind: input, shape index: {}]   ;;  %s8080_s9 = inlined_call_operand.hbm [shape: f32[2,1,256], index: 9, kind: input, shape index: {}]   ;;  %s8081_s10 = inlined_call_operand.hbm [shape: bf16[2,256,128], index: 10, kind: input, shape index: {}]   ;;  %s8082_s11 = inlined_call_operand.hbm [shape: f32[2,1,128], index: 11, kind: input, shape index: {}]   ;;  %s8083_s12 = inlined_call_operand.vmem [shape: f32[2,1,128], index: 12, kind: input, shape index: {}]   ;;  %s8084_s13 = inlined_call_operand.vmem [shape: f32[2,1,128], index: 13, kind: input, shape index: {}]   ;;  %s8085_s14 = inlined_call_operand.vmem [shape: f32[2,1,128], index: 14, kind: input, shape index: {}]   ;;  %s8086_s15 = inlined_call_operand.vmem [shape: f32[2,1,128], index: 15, kind: input, shape index: {}]   ;;  %s8087_s16 = inlined_call_operand.vmem [shape: f32[1,128], index: 16, kind: input, shape index: {}]   ;;  %s8088_s17 = inlined_call_operand.vmem [shape: f32[1,128], index: 17, kind: input, shape index: {}]   ;;  %s8089_s18 = inlined_call_operand.vmem [shape: bf16[7,16,16], index: 18, kind: input, shape index: {}]   ;;  %s8090_s19 = inlined_call_operand.vmem [shape: f32[16,1], index: 19, kind: input, shape index: {}]   ;;  %s8091_s20 = inlined_call_operand.vmem [shape: bf16[7,128,64], index: 20, kind: input, shape index: {}]   ;;  %s8092_s21 = inlined_call_operand.hbm [shape: f32[2,16,64], index: 21, kind: output, shape index: {}]  }
   0x1   :  { %8117 = sst [smem:[#allocation23_spill]] %s8071_s0 }
   0x2   :  { %8118 = sst [smem:[#allocation24_spill]] %s8072_s1 }
   0x3   :  { %8119 = sst [smem:[#allocation25_spill]] %s8073_s2 }
   0x4   :  { %8120 = sst [smem:[#allocation26_spill]] %s8074_s3 }
   0x5   :  { %8121 = sst [smem:[#allocation27_spill]] %s8075_s4 }
   0x6   :  { %8122 = sst [smem:[#allocation28_spill]] %s8076_s5 }
   0x7   :  { %8123 = sst [smem:[#allocation29_spill]] %s8077_s6 }
   0x8   :  { %8124 = sst [smem:[#allocation30_spill]] %s8080_s9 }
   0x9   :  { %8125 = sst [smem:[#allocation31_spill]] %s8081_s10 }
   0xa   :  { %8126 = sst [smem:[#allocation32_spill]] %s8082_s11 }
   0xb   :  { %8127 = sst [smem:[#allocation33_spill]] %s8087_s16 }
   0xc   :  { %8128 = sst [smem:[#allocation34_spill]] %s8088_s17 }
   0xd   :  { %8129 = sst [smem:[#allocation35_spill]] %s8089_s18 }
   0xe   :  { %8130 = sst [smem:[#allocation36_spill]] %s8090_s19 }
   0xf   :  { %8131 = sst [smem:[#allocation37_spill]] %s8091_s20 }
  0x10   :  { %8132 = sst [smem:[#allocation38_spill]] %s8092_s21 }
  0x11   :  { %26 = vsyncpa [#allocation3], 0 }
  0x12   :  { %28 = vsyncpa [#allocation3 + $0x1], 0 }
  0x13   :  { %29 = vsyncpa [#allocation6], 0 }
  0x14   :  { %31 = vsyncpa [#allocation6 + $0x1], 0 }
  0x15   :  { %32 = vsyncpa [#allocation9], 0 }
  0x16   :  { %33 = vsyncpa [#allocation12], 0 }
  0x17   :  { %34 = vsyncpa [#allocation4], 0 }
  0x18   :  { %36 = vsyncpa [#allocation4 + $0x1], 0  ;;  %s6801_s2 = smov 0   ;;  %s6803_s25 = smov 0  }
  0x19   :  { %s6805_s26 = smov 0   ;;  %s6807_s27 = smov 0  }
  0x1a LB: > { %8133 = sst [smem:[#allocation20_spill]] %s6654_s2  ;;  %s6822_s3 = sadd.s32 4294967295, %s6666_s27   ;;  %s6666_s27 = sphi %s6807_s27, %s8183_s27   ;;  %s6662_s26 = sphi %s6805_s26, %s8182_s26   ;;  %s6658_s25 = sphi %s6803_s25, %s8181_s25   ;;  %s6654_s2 = sphi %s6801_s2, %s8180_s2  }
  0x1b   : > { %s4984_s28 = sadd.s32 4294967294, %s6666_s27   ;;  %p62_p0 = scmp.ne.s32.totalorder %s6658_s25, %s6654_s2 }
  0x1c   : > { %p8103_p1 = scmp.eq.s32.totalorder %s6822_s3, 0  ;;  %p517_p3 = scmp.eq.s32.totalorder %s4984_s28, 1 }
  0x1d   : > { %p4985_p5 = scmp.ge.s32.totalorder %s6666_s27, 1  ;;  %p524_p7 = scmp.lt.s32.totalorder %s6666_s27, 3 }
  0x1e   : > { %p6831_p4 = por %p8103_p1, %p62_p0  ;;  %p6836_p6 = por %p517_p3, %p62_p0 }
  0x1f   : > { %p6841_p8 = pnand %p4985_p5, %p524_p7  ;;  %s6668_s30 = smov [#allocation7]  }
  0x20   : > { %s8134_s29 = scalar_select %p6831_p4, 1, 0 }
  0x21   : > { %s8135_s0 = scalar_select %p6836_p6, 1, 0 }
  0x22   : > { %s8137_s4 = scalar_select %p6841_p8, 1, 0 }
  0x23   : > { %8136 = sst [smem:[#allocation21_spill]] %s8135_s0  ;;  %s548_s5 = sshll.u32 %s6668_s30, 4  ;;  %s6845_s5 = int_to_ptr.vmem [resolvable:$true] %s548_s5 }
  0x24   : > { %p6013_p9 = pneg %p6841_p8  ;;  %s6669_s23 = smov [#allocation8]  }
  0x25   : > { %s567_s1 = sshll.u32 %s6669_s23, 4  ;;  %s8139_s6 = sld [smem:[#allocation29_spill]]  ;;  %s6856_s1 = int_to_ptr.vmem [resolvable:$true] %s567_s1 }
  0x26   : > { %p6852_p11 = pnand %p6013_p9, %p8103_p1 }
  0x28   : > { %p6866_p13 = pneg %p6852_p11 }
  0x2b   : > { %s6412_s0 = scalar_lea.hbm %s8139_s6, 2048 }
  0x2c   : > { %p6413_p12 = scmp.ne.s32.totalorder %s8139_s6, %s6412_s0  ;;  %p6419_p5 = scmp.lt.u32.totalorder %s6412_s0, %s8139_s6 }
  0x2e   : > { %p6415_p0 = pnand %p6866_p13, %p6413_p12 }
  0x30   : > { %p6416_p3 = pneg %p6415_p0 }
  0x32   : > { %p6421_p7 = pnand %p6419_p5, %p6416_p3 }
  0x34   : > { %6424 = shalt.err (!%p6421_p7)
}
  0x35   : > { %s6425_s2 = scalar_lea.vmem %s6845_s5, 2048  ;;  %p6433_p2 = scmp.lt.s32.totalorder %s6845_s5, %s6845_s5 }
  0x36   : > { %p6426_p9 = scmp.ne.s32.totalorder %s6845_s5, %s6425_s2  ;;  %p6434_p6 = scmp.lt.s32.totalorder %s6425_s2, %s6425_s2 }
  0x38   : > { %p6428_p10 = pnand %p6426_p9, %p6866_p13  ;;  %p6435_p12 = por %p6434_p6, %p6433_p2 }
  0x3a   : > { %p6429_p1 = pneg %p6428_p10 }
  0x3c   : > { %p6436_p0 = pnand %p6435_p12, %p6429_p1 }
  0x3e   : > { %6439 = shalt.err (!%p6436_p0)
}
  0x3f   : > { %s8106_s24 = smov 64   ;;  %s8107_s19 = smov 4  }
  0x40   : > { %6016 = dma.hbm_to_vmem [thread:$0]  (!%p6852_p11), %s8139_s6, 2048, %s6845_s5, [#allocation6], %s8106_s24, %s8106_s24, %s8107_s19  }
  0x41   : > { %s8141_s9 = sld [smem:[#allocation30_spill]] }
  0x47   : > { %s6440_s2 = scalar_lea.hbm %s8141_s9, 64 }
  0x48   : > { %p6441_p1 = scmp.ne.s32.totalorder %s8141_s9, %s6440_s2  ;;  %p6447_p10 = scmp.lt.u32.totalorder %s6440_s2, %s8141_s9 }
  0x4a   : > { %p6443_p2 = pnand %p6441_p1, %p6866_p13 }
  0x4c   : > { %p6444_p6 = pneg %p6443_p2 }
  0x4e   : > { %p6449_p3 = pnand %p6447_p10, %p6444_p6 }
  0x50   : > { %6452 = shalt.err (!%p6449_p3)
}
  0x51   : > { %s6453_s5 = scalar_lea.vmem %s6856_s1, 64  ;;  %p6461_p12 = scmp.lt.s32.totalorder %s6856_s1, %s6856_s1 }
  0x52   : > { %p6454_p5 = scmp.ne.s32.totalorder %s6856_s1, %s6453_s5  ;;  %p6462_p0 = scmp.lt.s32.totalorder %s6453_s5, %s6453_s5 }
  0x54   : > { %p6456_p7 = pnand %p6454_p5, %p6866_p13  ;;  %p6463_p1 = por %p6462_p0, %p6461_p12 }
  0x56   : > { %p6457_p9 = pneg %p6456_p7 }
  0x58   : > { %p6464_p2 = pnand %p6463_p1, %p6457_p9 }
  0x5a   : > { %6467 = shalt.err (!%p6464_p2)
}
  0x5b   : > { %s6672_s18 = smov 32   ;;  %s6673_s16 = smov 2  }
  0x5c   : > { %6019 = dma.hbm_to_vmem [thread:$0]  (!%p6852_p11), %s8141_s9, 64, %s6856_s1, [#allocation9], %s6672_s18, %s6672_s18, %s6673_s16  }
  0x5d   : > { %s6674_s0 = smov [#allocation10]   ;;  %s6675_s30 = smov [#allocation11]  }
  0x5e   : > { %s580_s28 = sshll.u32 %s6674_s0, 4  ;;  %s593_s23 = sshll.u32 %s6675_s30, 4  ;;  %s581_s28 = int_to_ptr.vmem [resolvable:$true] %s580_s28  ;;  %s6913_s23 = int_to_ptr.vmem [resolvable:$true] %s593_s23 }
  0x5f   : > { %s8142_s10 = sld [smem:[#allocation31_spill]] }
  0x65   : > { %s6468_s24 = scalar_lea.hbm %s8142_s10, 4096 }
  0x66   : > { %p6469_p6 = scmp.ne.s32.totalorder %s8142_s10, %s6468_s24  ;;  %p6475_p5 = scmp.lt.u32.totalorder %s6468_s24, %s8142_s10 }
  0x68   : > { %p6471_p10 = pnand %p6469_p6, %p6866_p13 }
  0x6a   : > { %p6472_p3 = pneg %p6471_p10 }
  0x6c   : > { %p6477_p7 = pnand %p6475_p5, %p6472_p3 }
  0x6e   : > { %6480 = shalt.err (!%p6477_p7)
}
  0x6f   : > { %s6481_s18 = scalar_lea.vmem %s581_s28, 4096  ;;  %p6489_p1 = scmp.lt.s32.totalorder %s581_s28, %s581_s28 }
  0x70   : > { %p6482_p9 = scmp.ne.s32.totalorder %s581_s28, %s6481_s18  ;;  %p6490_p2 = scmp.lt.s32.totalorder %s6481_s18, %s6481_s18 }
  0x72   : > { %p6484_p12 = pnand %p6482_p9, %p6866_p13  ;;  %p6491_p4 = por %p6490_p2, %p6489_p1 }
  0x74   : > { %p6485_p0 = pneg %p6484_p12 }
  0x76   : > { %p6492_p8 = pnand %p6491_p4, %p6485_p0 }
  0x78   : > { %6495 = shalt.err (!%p6492_p8)
}
  0x79   : > { %s8143_s6 = smov 4   ;;  %s8144_s19 = smov 64  }
  0x7a   : > { %6022 = dma.hbm_to_vmem [thread:$0]  (!%p6852_p11), %s8142_s10, 4096, %s581_s28, [#allocation9], %s8144_s19, %s8144_s19, %s8143_s6  }
  0x7b   : > { %s8145_s11 = sld [smem:[#allocation32_spill]] }
  0x81   : > { %s6496_s30 = scalar_lea.hbm %s8145_s11, 32 }
  0x82   : > { %p6497_p6 = scmp.ne.s32.totalorder %s8145_s11, %s6496_s30  ;;  %p6503_p10 = scmp.lt.u32.totalorder %s6496_s30, %s8145_s11 }
  0x84   : > { %p6499_p4 = pnand %p6497_p6, %p6866_p13 }
  0x86   : > { %p6500_p8 = pneg %p6499_p4 }
  0x88   : > { %p6505_p3 = pnand %p6503_p10, %p6500_p8 }
  0x8a   : > { %6508 = shalt.err (!%p6505_p3)
}
  0x8b   : > { %s6509_s28 = scalar_lea.vmem %s6913_s23, 32  ;;  %p6517_p12 = scmp.lt.s32.totalorder %s6913_s23, %s6913_s23 }
  0x8c   : > { %p6510_p5 = scmp.ne.s32.totalorder %s6913_s23, %s6509_s28  ;;  %p6518_p0 = scmp.lt.s32.totalorder %s6509_s28, %s6509_s28 }
  0x8e   : > { %p6512_p7 = pnand %p6510_p5, %p6866_p13  ;;  %p6519_p1 = por %p6518_p0, %p6517_p12 }
  0x90   : > { %p6513_p9 = pneg %p6512_p7 }
  0x92   : > { %p6520_p2 = pnand %p6519_p1, %p6513_p9 }
  0x94   : > { %6523 = shalt.err (!%p6520_p2)
}
  0x95   : > { %s6676_s18 = smov 16   ;;  %s6677_s21 = smov 1  }
  0x96   : > { %6025 = dma.hbm_to_vmem [thread:$0]  (!%p6852_p11), %s8145_s11, 32, %s6913_s23, [#allocation12], %s6676_s18, %s6676_s18, %s6677_s21  }
  0x97   : > { %s6960_s16 = sadd.s32 1, %s6666_s27   ;;  %s49_s20 = sadd.s32 1, %s6662_s26 }
  0x98   : > { %s46_s24 = ssub.s32 %s6666_s27, %s6960_s16  ;;  %p56_p6 = scmp.ne.s32.totalorder %s6662_s26, %s6658_s25 }
  0x99   : > { %p47_p13 = scmp.eq.s32.totalorder %s46_s24, 0  ;;  %p57_p4 = scmp.eq.s32.totalorder %s6666_s27, 0 }
  0x9a   : > { %p8147_p10 = scmp.eq.s32.totalorder %s6822_s3, 1  ;;  %p6041_p5 = scmp.lt.s32.totalorder %s6666_s27, 2 }
  0x9b   : > { %s6969_s0 = scalar_select %p47_p13, %s6662_s26, %s49_s20  }
  0x9c   : > { %p58_p8 = por %p57_p4, %p56_p6  ;;  %p6973_p3 = por %p8147_p10, %p56_p6 }
  0x9d   : > { %8146 = sst [smem:[#allocation22_spill]] %s6969_s0  ;;  %s634_s22 = sand.u32 1, %s6662_s26  }
  0x9e   : > { %s6979_s2 = sshll.u32 %s634_s22, 4  ;;  %s8110_s23 = sshll.u32 %s6666_s27, 8 }
  0x9f   : > { %s8149_s1 = sld [smem:[#allocation23_spill]]  ;;  %s638_s18 = scalar_lea.vmem [#allocation2], %s6979_s2 }
  0xa0   : > { %s645_s21 = sshll.u32 %s638_s18, 4  ;;  %p6992_p11 = pnand %p6041_p5, %p58_p8  ;;  %s6990_s21 = int_to_ptr.vmem [resolvable:$true] %s645_s21 }
  0xa1   : > { %s6996_s19 = scalar_lea.sflag [#allocation3], %s634_s22 }
  0xa2   : > { %p6526_p9 = pneg %p6992_p11 }
  0xa5   : > { %s6987_s28 = scalar_lea.hbm %s8149_s1, %s8110_s23  ;;  %s6529_s17 = scalar_lea.hbm %s8149_s1, 512 }
  0xa6   : > { %s6524_s24 = scalar_lea.hbm %s6987_s28, 256  ;;  %p6530_p1 = scmp.lt.u32.totalorder %s6987_s28, %s8149_s1 }
  0xa7   : > { %p6525_p7 = scmp.ne.s32.totalorder %s6987_s28, %s6524_s24  ;;  %p6531_p2 = scmp.lt.u32.totalorder %s6529_s17, %s6524_s24 }
  0xa8   : > { %p6533_p6 = scmp.lt.u32.totalorder %s6524_s24, %s6987_s28 }
  0xa9   : > { %p6527_p12 = pnand %p6526_p9, %p6525_p7  ;;  %p6532_p13 = por %p6531_p2, %p6530_p1 }
  0xab   : > { %p6528_p0 = pneg %p6527_p12  ;;  %p6534_p4 = por %p6533_p6, %p6532_p13 }
  0xad   : > { %p6535_p8 = pnand %p6534_p4, %p6528_p0 }
  0xaf   : > { %6538 = shalt.err (!%p6535_p8)
}
  0xb0   : > { %s6539_s22 = scalar_lea.vmem %s6990_s21, 256  ;;  %s6678_s20 = smov [#allocation2]  }
  0xb1   : > { %p6540_p10 = scmp.ne.s32.totalorder %s6990_s21, %s6539_s22  ;;  %s6544_s5 = sshll.u32 %s6678_s20, 4  ;;  %s6545_s5 = int_to_ptr.vmem [resolvable:$false] %s6544_s5 }
  0xb2   : > { %s6546_s23 = scalar_lea.vmem %s6545_s5, 512  ;;  %p6547_p12 = scmp.lt.s32.totalorder %s6990_s21, %s6545_s5 }
  0xb3   : > { %p6542_p5 = pnand %p6540_p10, %p6526_p9  ;;  %p6548_p1 = scmp.lt.s32.totalorder %s6546_s23, %s6539_s22 }
  0xb5   : > { %p6543_p7 = pneg %p6542_p5  ;;  %p6549_p2 = por %p6548_p1, %p6547_p12 }
  0xb7   : > { %p6550_p13 = pnand %p6549_p2, %p6543_p7 }
  0xb9   : > { %6553 = shalt.err (!%p6550_p13)
}
  0xba   : > { %s6679_s24 = smov 128   ;;  %s6680_s17 = smov 8  }
  0xbb   : > { %6029 = dma.hbm_to_vmem [thread:$0]  (!%p6992_p11), %s6987_s28, 256, %s6990_s21, %s6996_s19, %s6679_s24, %s6679_s24, %s6680_s17  }
  0xbc   : > { %s8151_s18 = sshll.u32 %s6666_s27, 8  ;;  %s8152_s5 = sld [smem:[#allocation24_spill]] }
  0xbd   : > { %s659_s1 = scalar_lea.vmem [#allocation5], %s6979_s2  ;;  %s655_s10 = sand.u32 1, %s6666_s27  }
  0xbe   : > { %s666_s9 = sshll.u32 %s659_s1, 4  ;;  %s7038_s11 = scalar_lea.sflag [#allocation6], %s655_s10  ;;  %s7035_s9 = int_to_ptr.vmem [resolvable:$true] %s666_s9 }
  0xc2   : > { %s7032_s23 = scalar_lea.hbm %s8152_s5, %s8151_s18  ;;  %s6559_s19 = scalar_lea.hbm %s8152_s5, 512 }
  0xc3   : > { %s6554_s0 = scalar_lea.hbm %s7032_s23, 256  ;;  %p6560_p8 = scmp.lt.u32.totalorder %s7032_s23, %s8152_s5 }
  0xc4   : > { %p6555_p0 = scmp.ne.s32.totalorder %s7032_s23, %s6554_s0  ;;  %p6561_p10 = scmp.lt.u32.totalorder %s6559_s19, %s6554_s0 }
  0xc5   : > { %p6563_p7 = scmp.lt.u32.totalorder %s6554_s0, %s7032_s23 }
  0xc6   : > { %p6557_p6 = pnand %p6555_p0, %p6526_p9  ;;  %p6562_p5 = por %p6561_p10, %p6560_p8 }
  0xc8   : > { %p6558_p4 = pneg %p6557_p6  ;;  %p6564_p12 = por %p6563_p7, %p6562_p5 }
  0xca   : > { %p6565_p1 = pnand %p6564_p12, %p6558_p4 }
  0xcc   : > { %6568 = shalt.err (!%p6565_p1)
}
  0xcd   : > { %s6569_s10 = scalar_lea.vmem %s7035_s9, 256  ;;  %s6681_s2 = smov [#allocation5]  }
  0xce   : > { %p6570_p2 = scmp.ne.s32.totalorder %s7035_s9, %s6569_s10  ;;  %s6574_s1 = sshll.u32 %s6681_s2, 4  ;;  %s6575_s1 = int_to_ptr.vmem [resolvable:$false] %s6574_s1 }
  0xcf   : > { %s6576_s20 = scalar_lea.vmem %s6575_s1, 512  ;;  %p6577_p6 = scmp.lt.s32.totalorder %s7035_s9, %s6575_s1 }
  0xd0   : > { %p6572_p13 = pnand %p6570_p2, %p6526_p9  ;;  %p6578_p8 = scmp.lt.s32.totalorder %s6576_s20, %s6569_s10 }
  0xd2   : > { %p6573_p0 = pneg %p6572_p13  ;;  %p6579_p10 = por %p6578_p8, %p6577_p6 }
  0xd4   : > { %p6580_p5 = pnand %p6579_p10, %p6573_p0 }
  0xd6   : > { %6583 = shalt.err (!%p6580_p5)
}
  0xd7   : > { %6032 = dma.hbm_to_vmem [thread:$0]  (!%p6992_p11), %s7032_s23, 256, %s7035_s9, %s7038_s11, %s6679_s24, %s6679_s24, %s6680_s17  }
  0xd8   : > { %p8153_p9 = scmp.ne.s32.totalorder %s8137_s4, 0 }
  0xd9   : > { %s7070_s0 = sand.u32 (!%p8153_p9), 1, %s6658_s25   ;;  %p8154_p4 = scmp.ne.s32.totalorder (!%p8153_p9), %s8134_s29, 0 }
  0xda   : > { %678 = sbr.rel (%p8153_p9) target bundleno = 9465 (0x24f9), region = 104  ;;  %s7073_s28 = sshll.u32 (!%p8153_p9), %s7070_s0, 4 }
  0xdb   : > { %s681_s6 = scalar_lea.sflag (!%p8153_p9), [#allocation3], %s7070_s0  ;;  %s7077_s21 = scalar_lea.vmem (!%p8153_p9), [#allocation2], %s7073_s28 }
  0xe1   : > { %6629 = dma.done.wait (%p8154_p4), %s681_s6, 256  }
  0xe2   : > { %6631 = vsyncadd (%p8154_p4), %s681_s6, 4294967040  ;;  %s689_s9 = sand.u32 1, %s6822_s3   ;;  %s7085_s4 = scalar_lea.vmem [#allocation5], %s7073_s28 }
  0xe3   : > { %s690_s11 = scalar_lea.sflag [#allocation6], %s689_s9 }
  0xe4   : > { %6633 = dma.done.wait (%p8154_p4), %s690_s11, 256  }
  0xe5   : > { %6635 = vsyncadd (%p8154_p4), %s690_s11, 4294967040  ;;  %p8155_p11 = scmp.eq.s32.totalorder %s6822_s3, 0 }
  0xe7   : > { %6637 = dma.done.wait (%p8155_p11), [#allocation6], 2048   ;;  %p8156_p7 = pmov %p8155_p11 }
  0xe9   : > { %6639 = vsyncadd (%p8156_p7), [#allocation6], 4294965248  ;;  %p8157_p12 = pmov %p8156_p7 }
  0xea   : > { %p8158_p1 = pmov %p8156_p7 }
  0xeb   : > { %6641 = dma.done.wait (%p8157_p12), [#allocation9], 4160  }
  0xec   : > { %6643 = vsyncadd (%p8158_p1), [#allocation9], 4294963136  ;;  %p8159_p2 = pmov %p8158_p1 }
  0xed   : > { %p8160_p13 = pmov %p8158_p1 }
  0xee   : > { %6645 = dma.done.wait (%p8159_p2), [#allocation12], 32  }
  0xef   : > { %6647 = vsyncadd (%p8160_p13), [#allocation12], 4294967264  ;;  %v774_v0 = vld [vmem:[%s7077_s21] sm:$0xff]  ;;  %v775_v1 = vld [vmem:[%s7077_s21 + $0x8] sm:$0xff]  ;;  %s8161_s17 = sld [smem:[#allocation27_spill]]  ;;  %s8162_s18 = sld [smem:[#allocation25_spill]]  ;;  %v840_v58 = vlaneseq }
  0xf0   : > { %780 = vadd.xlane.f32.xlu0 %v774_v0  ;;  %v6682_v5 = vmov 0.0   ;;  %vm6683_vm0 = vmmov 0   ;;  %v6684_v35 = vmov 0   ;;  %v5005_v43 = vld [vmem:[%s8083_s12] ss:$0 sm:$0xff]  ;;  %v777_v52 = vld [vmem:[%s7085_s4 + $0x8] sm:$0xff] }
  0xf1   : > { %5609 = vmatprep.subr.bf16.mxu1 %v6682_v5  ;;  %5625 = vmatprep.mubr.msk.bf16.mxu1 %vm6683_vm0, %v6682_v5  ;;  %v5006_v47 = vld [vmem:[%s8084_s13] ss:$0 sm:$0xff]  ;;  %v841_v59 = vshrl.u32 %v840_v58, 7  ;;  %s8163_s2 = sld [smem:[#allocation26_spill]]  ;;  %s8165_s9 = sld [smem:[#allocation28_spill]]  ;;  %vm1089_vm1 = vcmask 261120  }
  0xf2   : > { %962 = vmatprep.mubr.bf16.mxu0 %v6684_v35  ;;  %6099 = vset.pattern.permute.xlu0 %v6684_v35  ;;  %v776_v51 = vld [vmem:[%s7085_s4] sm:$0xff]  ;;  %vm1137_vm2 = vcmask 130048   ;;  %s6685_s11 = smov 96   ;;  %s8114_s29 = smov 64   ;;  %vm4833_vm3 = vcmask 523264  }
  0xf3   : > { %6100 = vset.pattern.permute.xlu1 %v6684_v35  ;;  %v7214_v60 = vsub.s32 0, %v841_v59  ;;  %v7219_v62 = vsub.s32 1, %v841_v59  ;;  %s8112_s24 = smov 32   ;;  %s8169_s10 = sld [smem:[#allocation34_spill]] }
  0xf4   : > { %782 = vadd.xlane.f32.xlu0 %v775_v1  ;;  %s8171_s19 = sld [smem:[#allocation37_spill]]  ;;  %s8172_s22 = sld [smem:[#allocation36_spill]] }
  0xf5   : > { %v6101_v2 = vld [vmem:[%s8161_s17] sm:$0xff]   ;;  %v6105_v14 = vld [vmem:[%s8161_s17 + $0x8] sm:$0xff]   ;;  %v6106_v15 = vld [vmem:[%s8162_s18 + $0x14] ss:$8 sps:$4 sm:$0xff]   ;;  %s772_s20 = scalar_lea.vmem [#allocation13], %s7073_s28  ;;  %s5413_s6 = sshll.u32 %s6822_s3, 8 }
  0xf6   : > { %v6102_v3 = vld [vmem:[%s8162_s18 + $0x4] ss:$8 sps:$4 sm:$0xff]   ;;  %v6104_v4 = vld [vmem:[%s8162_s18] ss:$8 sps:$4 sm:$0xff]   ;;  %5610 = vmatpush3.bf16.msra.mxu1 %v6101_v2  ;;  %v6108_v16 = vld [vmem:[%s8162_s18 + $0x10] ss:$8 sps:$4 sm:$0xff]  }
  0xf7   : > { %930 = vmatprep.subr.bf16.mxu0 %v6102_v3  ;;  %5611 = vmatprep.subr.bf16.mxu1 %v6682_v5  ;;  %v6109_v17 = vld [vmem:[%s8161_s17 + $0x10] sm:$0xff]   ;;  %v6110_v18 = vld [vmem:[%s8162_s18 + $0x24] ss:$8 sps:$4 sm:$0xff]   ;;  %v6112_v19 = vld [vmem:[%s8162_s18 + $0x20] ss:$8 sps:$4 sm:$0xff]   ;;  %s8164_s1 = smov %s8163_s2  ;;  %s6688_s3 = smov [#allocation13]  }
  0xf8   : > { %931 = vmatpush1.bf16.msra.mxu0 %v6104_v4  ;;  %v6113_v20 = vld [vmem:[%s8161_s17 + $0x18] sm:$0xff]   ;;  %v6117_v23 = vld [vmem:[%s8161_s17 + $0x20] sm:$0xff]   ;;  %v6121_v27 = vld [vmem:[%s8161_s17 + $0x28] sm:$0xff]  }
  0xf9   : > { %932 = vmatprep.subr.bf16.mxu0 %v6106_v15  ;;  %v6114_v21 = vld [vmem:[%s8162_s18 + $0x34] ss:$8 sps:$4 sm:$0xff]   ;;  %v6116_v22 = vld [vmem:[%s8162_s18 + $0x30] ss:$8 sps:$4 sm:$0xff]   ;;  %v6118_v24 = vld [vmem:[%s8162_s18 + $0x44] ss:$8 sps:$4 sm:$0xff]  }
  0xfa   : > { %5612 = vmatpush3.bf16.msra.mxu1 %v6105_v14  ;;  %v6120_v25 = vld [vmem:[%s8162_s18 + $0x40] ss:$8 sps:$4 sm:$0xff]   ;;  %v6122_v26 = vld [vmem:[%s8162_s18 + $0x54] ss:$8 sps:$4 sm:$0xff]   ;;  %v6124_v28 = vld [vmem:[%s8162_s18 + $0x50] ss:$8 sps:$4 sm:$0xff]  }
  0xfb   : > { %5613 = vmatprep.subr.bf16.mxu1 %v6682_v5  ;;  %v6126_v29 = vld [vmem:[%s8162_s18 + $0x64] ss:$8 sps:$4 sm:$0xff]   ;;  %v6125_v30 = vld [vmem:[%s8161_s17 + $0x30] sm:$0xff]   ;;  %v6128_v31 = vld [vmem:[%s8162_s18 + $0x60] ss:$8 sps:$4 sm:$0xff]  }
  0xfc   : > { %933 = vmatpush1.bf16.msra.mxu0 %v6108_v16  ;;  %v6130_v32 = vld [vmem:[%s8162_s18 + $0x74] ss:$8 sps:$4 sm:$0xff]   ;;  %v6132_v34 = vld [vmem:[%s8162_s18 + $0x70] ss:$8 sps:$4 sm:$0xff]   ;;  %v838_v61 = vld [vmem:[%s8163_s2] sm:$0x3] }
  0xfd   : > { %934 = vmatprep.subr.bf16.mxu0 %v6110_v18  ;;  %v6129_v33 = vld [vmem:[%s8161_s17 + $0x38] sm:$0xff]   ;;  %v5023_v63 = vld [vmem:[%s8165_s9] ss:$0 sm:$0xff]  ;;  %v843_v2 = vrot.slane %v838_v61, %v7214_v60  ;;  %s6588_s2 = sshll.u32 %s6688_s3, 4  ;;  %s6589_s2 = int_to_ptr.vmem [resolvable:$false] %s6588_s2 }
  0xfe   : > { %5614 = vmatpush3.bf16.msra.mxu1 %v6109_v17  ;;  %s6590_s23 = scalar_lea.vmem %s6589_s2, 512 }
  0xff   : > { %5615 = vmatprep.subr.bf16.mxu1 %v6682_v5 }
 0x100   : > { %935 = vmatpush1.bf16.msra.mxu0 %v6112_v19 }
 0x101   : > { %936 = vmatprep.subr.bf16.mxu0 %v6114_v21 }
 0x102   : > { %5616 = vmatpush3.bf16.msra.mxu1 %v6113_v20 }
 0x103   : > { %5617 = vmatprep.subr.bf16.mxu1 %v6682_v5 }
 0x104   : > { %937 = vmatpush1.bf16.msra.mxu0 %v6116_v22 }
 0x105   : > { %938 = vmatprep.subr.bf16.mxu0 %v6118_v24 }
 0x106   : > { %5618 = vmatpush3.bf16.msra.mxu1 %v6117_v23 }
 0x107   : > { %5619 = vmatprep.subr.bf16.mxu1 %v6682_v5 }
 0x108   : > { %939 = vmatpush1.bf16.msra.mxu0 %v6120_v25 }
 0x109   : > { %940 = vmatprep.subr.bf16.mxu0 %v6122_v26 }
 0x10a   : > { %5620 = vmatpush3.bf16.msra.mxu1 %v6121_v27 }
 0x10b   : > { %5621 = vmatprep.subr.bf16.mxu1 %v6682_v5 }
 0x10c   : > { %941 = vmatpush1.bf16.msra.mxu0 %v6124_v28 }
 0x10d   : > { %942 = vmatprep.subr.bf16.mxu0 %v6126_v29 }
 0x10e   : > { %5622 = vmatpush3.bf16.msra.mxu1 %v6125_v30 }
 0x10f   : > { %5623 = vmatprep.subr.bf16.mxu1 %v6682_v5 }
 0x110   : > { %943 = vmatpush1.bf16.msra.mxu0 %v6128_v31 }
 0x111   : > { %944 = vmatprep.subr.bf16.mxu0 %v6130_v32 }
 0x112   : > { %5624 = vmatpush3.bf16.msra.mxu1 %v6129_v33 }
 0x113   : > { %5647 = vmatprep.subr.bf16.mxu1 %v6682_v5 }
 0x114   : > { %945 = vmatpush1.bf16.msra.mxu0 %v6132_v34 }
 0x115   : > { %5629 = vmatprep.subr.bf16.mxu0 %v6682_v5 }
 0x17d   : > { %v781_v6 = vpop.xlane.xlu0 %780 }
 0x17e   : > { %v785_v7 = vmul.f32 0.0078125, %v781_v6  ;;  %v847_v6 = vrot.slane %v838_v61, %v7219_v62 }
 0x180   : > { %v7116_v8 = vsub.f32 %v774_v0, %v785_v7 }
 0x181   : > { %v783_v9 = vpop.xlane.xlu0 %782 }
 0x182   : > { %v786_v10 = vmul.f32 0.0078125, %v783_v9  ;;  %v789_v11 = vmul.f32 %v7116_v8, %v7116_v8 }
 0x184   : > { %v7120_v12 = vsub.f32 %v775_v1, %v786_v10  ;;  %791 = vadd.xlane.f32.xlu1 %v789_v11 }
 0x186   : > { %v790_v13 = vmul.f32 %v7120_v12, %v7120_v12 }
 0x188   : > { %793 = vadd.xlane.f32.xlu1 %v790_v13 }
 0x211   : > { %v792_v36 = vpop.xlane.xlu1 %791 }
 0x212   : > { %v795_v37 = vmul.f32 0.0078125, %v792_v36 }
 0x214   : > { %v797_v38 = vadd.f32 1e-05, %v795_v37 }
 0x215   : > { %v794_v39 = vpop.xlane.xlu1 %793 }
 0x216   : > { %6324 = vrsqrt.f32 %v797_v38  ;;  %v796_v40 = vmul.f32 0.0078125, %v794_v39 }
 0x218   : > { %v798_v41 = vadd.f32 1e-05, %v796_v40 }
 0x21a   : > { %6326 = vrsqrt.f32 %v798_v41 }
 0x220   : > { %v6325_v42 = vpop.eup %6324 }
 0x221   : > { %v801_v44 = vmul.f32 %v6325_v42, %v7116_v8 }
 0x223   : > { %v809_v45 = vmul.f32 %v5005_v43, %v801_v44 }
 0x224   : > { %v6327_v46 = vpop.eup %6326 }
 0x225   : > { %v802_v48 = vmul.f32 %v6327_v46, %v7120_v12  ;;  %v817_v50 = vadd.f32 %v5006_v47, %v809_v45 }
 0x227   : > { %v810_v49 = vmul.f32 %v5005_v43, %v802_v48  ;;  %v819_v55 = vadd.f32 %v817_v50, %v776_v51 }
 0x229   : > { %v818_v53 = vadd.f32 %v5006_v47, %v810_v49 }
 0x22b   : > { %v973_v54 = vpack.c.bf16 %v818_v53, %v817_v50  ;;  %v820_v56 = vadd.f32 %v818_v53, %v777_v52 }
 0x22d   : > { %5626 = vmatmul.mubr.bf16.vlgmr.msra.gmra.mrb[0].mxu1 %v973_v54  ;;  %v821_v57 = vpack.c.bf16 %v820_v56, %v819_v55 }
 0x22e   : > { %5649 = vmatprep.mubr.msk.bf16.mxu1 %vm6683_vm0, %v6682_v5 }
 0x22f   : > { %963 = vmatmul.mubr.bf16.vlgmr.msra.gmra.mrb[0].mxu0 %v821_v57 }
 0x230   : > { %5631 = vmatprep.mubr.msk.bf16.mxu0 %vm6683_vm0, %v6682_v5 }
 0x300   : > { %v1079_v0 = vpop.f32.mrb[0].mxu1 }
 0x301   : > { %v5627_v1 = vpop.f32.mrb[1].mxu1  ;;  %v1080_v7 = vadd.f32 %v5023_v63, %v1079_v0 }
 0x302   : > { %v964_v3 = vpop.f32.mrb[0].mxu0  ;;  %v1082_v4 = vpop.f32.mrb[2].mxu1 }
 0x303   : > { %v1083_v8 = vadd.f32 %v5023_v63, %v1082_v4  ;;  %v966_v9 = vpop.f32.mrb[1].mxu0  ;;  %v5628_v10 = vpop.f32.mrb[3].mxu1  ;;  %v965_v12 = vadd.f32 %v964_v3, %v843_v2 }
 0x304   : > { %v968_v11 = vpop.f32.mrb[2].mxu0  ;;  %v967_v16 = vadd.f32 %v966_v9, %v847_v6  ;;  %v6136_v9 = vld [vmem:[#allocation7 + $0x18] sm:$0xff]  }
 0x305   : > { %v7226_v13 = vpack.c.bf16 %v1083_v8, %v1080_v7  ;;  %v969_v14 = vadd.f32 %v968_v11, %v843_v2  ;;  %v970_v15 = vpop.f32.mrb[3].mxu0  ;;  %v6135_v8 = vld [vmem:[#allocation7 + $0x10] sm:$0xff]  }
 0x306   : > { %v971_v17 = vadd.f32 %v970_v15, %v847_v6 }
 0x307   : > { %v7228_v18 = vpack.c.bf16 %v969_v14, %v965_v12 }
 0x308   : > { %v7230_v19 = vpack.c.bf16 %v971_v17, %v967_v16 }
 0x30a   : > { %v1094_v20 = vsel %vm1089_vm1, %v7230_v19, 0 }
 0x30b   : > { %5630 = vmatpush3.bf16.xpose.msra.mxu0 %v1094_v20  ;;  %v6133_v20 = vld [vmem:[#allocation7] sm:$0xff]  }
 0x30c   : > { %5635 = vmatprep.subr.bf16.mxu0 %v6682_v5 }
 0x312   : > { %5632 = vmatmul.mubr.msk.bf16.vlgmr.msra.gmra.mrb[4].mxu0 %vm1089_vm1, %v7228_v18 }
 0x313   : > { %5636 = vmatpush3.bf16.msra.mxu0 %v7226_v13  ;;  %5637 = vmatprep.mubr.msk.bf16.mxu0 %vm6683_vm0, %v6682_v5 }
 0x314   : > { %5641 = vmatprep.subr.bf16.mxu0 %v6682_v5 }
 0x3e5   : > { %v1130_v21 = vpop.f32.mrb[4].mxu0 }
 0x3e6   : > { %v5633_v22 = vpop.f32.mrb[5].mxu0  ;;  %v1138_v23 = vsel %vm1137_vm2, %v1130_v21, -inf }
 0x3e7   : > { %1139 = vmax.xlane.f32.xlu0 %v1138_v23  ;;  %v1133_v24 = vpop.f32.mrb[6].mxu0  ;;  %v6134_v22 = vld [vmem:[#allocation7 + $0x8] sm:$0xff]  }
 0x3e8   : > { %v5634_v25 = vpop.f32.mrb[7].mxu0  ;;  %v1141_v26 = vsel %vm1137_vm2, %v1133_v24, -inf }
 0x3e9   : > { %1142 = vmax.xlane.f32.xlu1 %v1141_v26 }
 0x474   : > { %v1140_v27 = vpop.xlane.xlu0 %1139 }
 0x475   : > { %v1144_v28 = vsub.f32 %v1130_v21, %v1140_v27 }
 0x476   : > { %v1143_v29 = vpop.xlane.xlu1 %1142 }
 0x477   : > { %v1146_v30 = vmul.f32 1.442695, %v1144_v28  ;;  %v1145_v31 = vsub.f32 %v1133_v24, %v1143_v29 }
 0x479   : > { %6328 = vpow2.f32 %v1146_v30  ;;  %v1148_v32 = vmul.f32 1.442695, %v1145_v31 }
 0x47b   : > { %6330 = vpow2.f32 %v1148_v32 }
 0x483   : > { %v6329_v33 = vpop.eup %6328 }
 0x484   : > { %v1150_v34 = vsel %vm1137_vm2, %v6329_v33, 0.0 }
 0x485   : > { %v6331_v36 = vpop.eup %6330  ;;  %1151 = vadd.xlane.f32.xlu0 %v1150_v34 }
 0x486   : > { %v1153_v37 = vsel %vm1137_vm2, %v6331_v36, 0.0 }
 0x487   : > { %1154 = vadd.xlane.f32.xlu1 %v1153_v37 }
 0x498   : > { %1211 = vrot.lane.b32.xlu1 %v7228_v18, %s6685_s11 }
 0x49b   : > { %1214 = vrot.lane.b32.xlu0 %v7230_v19, %s6685_s11 }
 0x512   : > { %v1152_v38 = vpop.xlane.xlu0 %1151 }
 0x513   : > { %6332 = vrcp.f32 %v1152_v38 }
 0x514   : > { %v1155_v39 = vpop.xlane.xlu1 %1154 }
 0x515   : > { %6334 = vrcp.f32 %v1155_v39 }
 0x516   : > { %v1215_v44 = vpop.permute.xlu0 %1214 }
 0x517   : > { %v1220_v46 = vsel %vm1089_vm1, %v1215_v44, 0 }
 0x518   : > { %v1212_v47 = vpop.permute.xlu1 %1211 }
 0x51d   : > { %v6333_v40 = vpop.eup %6332 }
 0x51e   : > { %v1158_v42 = vmul.f32 %v6333_v40, %v6329_v33 }
 0x51f   : > { %v6335_v41 = vpop.eup %6334 }
 0x520   : > { %v1159_v43 = vmul.f32 %v6335_v41, %v6331_v36 }
 0x522   : > { %v1160_v45 = vpack.c.bf16 %v1159_v43, %v1158_v42 }
 0x524   : > { %5638 = vmatmul.mubr.msk.bf16.vlgmr.msra.gmra.mrb[8].mxu0 %vm1137_vm2, %v1160_v45 }
 0x525   : > { %5642 = vmatpush3.bf16.xpose.msra.mxu0 %v1220_v46  ;;  %5643 = vmatprep.mubr.msk.bf16.mxu0 %vm6683_vm0, %v6682_v5 }
 0x526   : > { %5653 = vmatprep.subr.bf16.mxu0 %v6682_v5 }
 0x52c   : > { %5644 = vmatmul.mubr.msk.bf16.vlgmr.msra.gmra.mrb[12].mxu0 %vm1089_vm1, %v1212_v47 }
 0x52d   : > { %5657 = vmatprep.mubr.msk.bf16.mxu0 %vm6683_vm0, %v6682_v5  ;;  %5654 = vmatpush3.bf16.msra.mxu0 %v6135_v8 }
 0x52e   : > { %5655 = vmatprep.subr.bf16.mxu0 %v6682_v5 }
 0x531   : > { %5656 = vmatpush3.bf16.msra.mxu0 %v6136_v9 }
 0x532   : > { %5669 = vmatprep.subr.bf16.mxu0 %v6682_v5 }
 0x5f7   : > { %v1198_v48 = vpop.f32.mrb[8].mxu0 }
 0x5f8   : > { %v5639_v49 = vpop.f32.mrb[9].mxu0 }
 0x5f9   : > { %v1201_v50 = vpop.f32.mrb[10].mxu0 }
 0x5fa   : > { %v1205_v51 = vpack.c.bf16 %v1201_v50, %v1198_v48  ;;  %v5640_v52 = vpop.f32.mrb[11].mxu0 }
 0x5ff   : > { %v1256_v53 = vpop.f32.mrb[12].mxu0 }
 0x600   : > { %v5645_v54 = vpop.f32.mrb[13].mxu0  ;;  %v1263_v55 = vsel %vm1137_vm2, %v1256_v53, -inf }
 0x601   : > { %1264 = vmax.xlane.f32.xlu1 %v1263_v55  ;;  %v1259_v56 = vpop.f32.mrb[14].mxu0 }
 0x602   : > { %v5646_v57 = vpop.f32.mrb[15].mxu0  ;;  %v1266_v58 = vsel %vm1137_vm2, %v1259_v56, -inf }
 0x603   : > { %1267 = vmax.xlane.f32.xlu0 %v1266_v58 }
 0x68e   : > { %v1265_v59 = vpop.xlane.xlu1 %1264 }
 0x68f   : > { %v1269_v61 = vsub.f32 %v1256_v53, %v1265_v59 }
 0x690   : > { %v1268_v63 = vpop.xlane.xlu0 %1267 }
 0x691   : > { %v1271_v0 = vmul.f32 1.442695, %v1269_v61  ;;  %v1270_v1 = vsub.f32 %v1259_v56, %v1268_v63 }
 0x693   : > { %6336 = vpow2.f32 %v1271_v0  ;;  %v1273_v2 = vmul.f32 1.442695, %v1270_v1 }
 0x695   : > { %6338 = vpow2.f32 %v1273_v2 }
 0x69d   : > { %v6337_v3 = vpop.eup %6336 }
 0x69e   : > { %v1275_v4 = vsel %vm1137_vm2, %v6337_v3, 0.0 }
 0x69f   : > { %v6339_v6 = vpop.eup %6338  ;;  %1276 = vadd.xlane.f32.xlu0 %v1275_v4 }
 0x6a0   : > { %v1278_v7 = vsel %vm1137_vm2, %v6339_v6, 0.0 }
 0x6a1   : > { %1279 = vadd.xlane.f32.xlu1 %v1278_v7  ;;  %v6138_v7 = vld [vmem:[#allocation7 + $0x28] sm:$0xff]  }
 0x6b2   : > { %1454 = vrot.lane.b32.xlu1 %v7230_v19, %s8114_s29 }
 0x6b5   : > { %1287 = vrot.lane.b32.xlu0 %v7226_v13, %s6685_s11 }
 0x6b6   : > { %1452 = vrot.lane.b32.xlu1 %v7228_v18, %s8114_s29 }
 0x72c   : > { %v1277_v10 = vpop.xlane.xlu0 %1276 }
 0x72d   : > { %6340 = vrcp.f32 %v1277_v10 }
 0x72e   : > { %v1280_v11 = vpop.xlane.xlu1 %1279 }
 0x72f   : > { %6342 = vrcp.f32 %v1280_v11 }
 0x730   : > { %v1288_v12 = vpop.permute.xlu0 %1287 }
 0x731   : > { %5648 = vmatpush3.bf16.msra.mxu1 %v1288_v12 }
 0x732   : > { %5661 = vmatprep.subr.bf16.mxu1 %v6682_v5  ;;  %v1455_v25 = vpop.permute.xlu1 %1454 }
 0x733   : > { %v1460_v29 = vsel %vm1089_vm1, %v1455_v25, 0 }
 0x736   : > { %v1453_v34 = vpop.permute.xlu1 %1452 }
 0x737   : > { %v6341_v14 = vpop.eup %6340 }
 0x738   : > { %v1283_v16 = vmul.f32 %v6341_v14, %v6337_v3 }
 0x739   : > { %v6343_v15 = vpop.eup %6342 }
 0x73a   : > { %v1284_v17 = vmul.f32 %v6343_v15, %v6339_v6 }
 0x73c   : > { %v1285_v21 = vpack.c.bf16 %v1284_v17, %v1283_v16 }
 0x73e   : > { %5650 = vmatmul.mubr.msk.bf16.vlgmr.msra.gmra.mrb[4].mxu1 %vm1137_vm2, %v1285_v21 }
 0x73f   : > { %5662 = vmatpush3.bf16.msra.mxu1 %v6133_v20  ;;  %5665 = vmatprep.mubr.msk.bf16.mxu1 %vm6683_vm0, %v6682_v5 }
 0x740   : > { %5663 = vmatprep.subr.bf16.mxu1 %v6682_v5 }
 0x743   : > { %5664 = vmatpush3.bf16.msra.mxu1 %v6134_v22 }
 0x744   : > { %5675 = vmatprep.subr.bf16.mxu1 %v6682_v5 }
 0x746   : > { %5666 = vmatmul.mubr.msk.bf16.vlgmr.msra.gmra.mrb[8].mxu1 %vm1089_vm1, %v1205_v51 }
 0x747   : > { %5677 = vmatprep.mubr.msk.bf16.mxu1 %vm6683_vm0, %v6682_v5 }
 0x811   : > { %v1327_v23 = vpop.f32.mrb[4].mxu1 }
 0x812   : > { %v5651_v24 = vpop.f32.mrb[5].mxu1 }
 0x813   : > { %v1330_v26 = vpop.f32.mrb[6].mxu1 }
 0x814   : > { %v1334_v27 = vpack.c.bf16 %v1330_v26, %v1327_v23  ;;  %v5652_v28 = vpop.f32.mrb[7].mxu1 }
 0x816   : > { %5658 = vmatmul.mubr.msk.bf16.vlgmr.msra.gmra.mrb[16].mxu0 %vm1089_vm1, %v1334_v27 }
 0x817   : > { %5670 = vmatpush3.bf16.xpose.msra.mxu0 %v1460_v29  ;;  %5671 = vmatprep.mubr.msk.bf16.mxu0 %vm6683_vm0, %v6682_v5 }
 0x818   : > { %5681 = vmatprep.subr.bf16.mxu0 %v6682_v5 }
 0x819   : > { %v1445_v30 = vpop.f32.mrb[8].mxu1 }
 0x81a   : > { %v5667_v31 = vpop.f32.mrb[9].mxu1 }
 0x81b   : > { %v1448_v32 = vpop.f32.mrb[10].mxu1 }
 0x81c   : > { %v5668_v33 = vpop.f32.mrb[11].mxu1 }
 0x81e   : > { %5672 = vmatmul.mubr.msk.bf16.vlgmr.msra.gmra.mrb[20].mxu0 %vm1089_vm1, %v1453_v34 }
 0x81f   : > { %5685 = vmatprep.mubr.msk.bf16.mxu0 %vm6683_vm0, %v6682_v5 }
 0x8e9   : > { %v1389_v36 = vpop.f32.mrb[16].mxu0 }
 0x8ea   : > { %v7286_v37 = vadd.f32 %v1445_v30, %v1389_v36  ;;  %v5659_v38 = vpop.f32.mrb[17].mxu0 }
 0x8eb   : > { %v1392_v39 = vpop.f32.mrb[18].mxu0 }
 0x8ec   : > { %v7288_v40 = vadd.f32 %v1448_v32, %v1392_v39  ;;  %v5660_v41 = vpop.f32.mrb[19].mxu0  ;;  %v6139_v32 = vld [vmem:[#allocation7 + $0x30] sm:$0xff]  }
 0x8f1   : > { %v1496_v42 = vpop.f32.mrb[20].mxu0 }
 0x8f2   : > { %v5673_v43 = vpop.f32.mrb[21].mxu0  ;;  %v1503_v44 = vsel %vm1137_vm2, %v1496_v42, -inf }
 0x8f3   : > { %1504 = vmax.xlane.f32.xlu1 %v1503_v44  ;;  %v1499_v45 = vpop.f32.mrb[22].mxu0 }
 0x8f4   : > { %v5674_v46 = vpop.f32.mrb[23].mxu0  ;;  %v1506_v47 = vsel %vm1137_vm2, %v1499_v45, -inf }
 0x8f5   : > { %1507 = vmax.xlane.f32.xlu0 %v1506_v47 }
 0x904   : > { %1526 = vrot.lane.b32.xlu1 %v7226_v13, %s8114_s29  ;;  %s8168_s29 = sld [smem:[#allocation33_spill]] }
 0x908   : > { %1637 = vrot.lane.b32.xlu1 %v7228_v18, %s8112_s24  ;;  %v6137_v18 = vld [vmem:[#allocation7 + $0x20] sm:$0xff]  }
 0x909   : > { %5682 = vmatpush3.bf16.msra.mxu0 %v6137_v18 }
 0x90a   : > { %5683 = vmatprep.subr.bf16.mxu0 %v6682_v5 }
 0x90d   : > { %5684 = vmatpush3.bf16.msra.mxu0 %v6138_v7 }
 0x90e   : > { %5695 = vmatprep.subr.bf16.mxu0 %v6682_v5 }
 0x980   : > { %v1505_v48 = vpop.xlane.xlu1 %1504 }
 0x981   : > { %v1509_v49 = vsub.f32 %v1496_v42, %v1505_v48 }
 0x982   : > { %v1508_v50 = vpop.xlane.xlu0 %1507 }
 0x983   : > { %v1511_v51 = vmul.f32 1.442695, %v1509_v49  ;;  %v1510_v52 = vsub.f32 %v1499_v45, %v1508_v50 }
 0x984   : > { %v1527_v53 = vpop.permute.xlu1 %1526 }
 0x985   : > { %6344 = vpow2.f32 %v1511_v51  ;;  %v1513_v54 = vmul.f32 1.442695, %v1510_v52  ;;  %5676 = vmatpush3.bf16.msra.mxu1 %v1527_v53 }
 0x986   : > { %5689 = vmatprep.subr.bf16.mxu1 %v6682_v5 }
 0x987   : > { %6346 = vpow2.f32 %v1513_v54 }
 0x98f   : > { %v6345_v55 = vpop.eup %6344 }
 0x990   : > { %v1515_v56 = vsel %vm1137_vm2, %v6345_v55, 0.0 }
 0x991   : > { %v6347_v57 = vpop.eup %6346  ;;  %1516 = vadd.xlane.f32.xlu0 %v1515_v56 }
 0x992   : > { %v1518_v58 = vsel %vm1137_vm2, %v6347_v57, 0.0 }
 0x995   : > { %1519 = vadd.xlane.f32.xlu0 %v1518_v58  ;;  %v6408_v58 = vld [vmem:[%s7077_s21] sm:$0xff] }
 0x9ab   : > { %1639 = vrot.lane.b32.xlu0 %v7230_v19, %s8112_s24  ;;  %v1638_v19 = vpop.permute.xlu1 %1637 }
 0xa1e   : > { %v1517_v59 = vpop.xlane.xlu0 %1516 }
 0xa1f   : > { %6348 = vrcp.f32 %v1517_v59 }
 0xa22   : > { %v1520_v61 = vpop.xlane.xlu0 %1519 }
 0xa23   : > { %6350 = vrcp.f32 %v1520_v61 }
 0xa26   : > { %v1640_v3 = vpop.permute.xlu0 %1639 }
 0xa27   : > { %v1645_v6 = vsel %vm1089_vm1, %v1640_v3, 0  ;;  %v6141_v3 = vld [vmem:[%s8079_s8] ss:$8 sps:$4 sm:$0xff]  }
 0xa29   : > { %v6349_v63 = vpop.eup %6348 }
 0xa2a   : > { %v1523_v1 = vmul.f32 %v6349_v63, %v6345_v55  ;;  %v6409_v63 = vld [vmem:[%s7077_s21 + $0x8] sm:$0xff] }
 0xa2d   : > { %v6351_v0 = vpop.eup %6350 }
 0xa2e   : > { %v1524_v2 = vmul.f32 %v6351_v0, %v6347_v57  ;;  %v5052_v57 = vld [vmem:[%s8078_s7] ss:$0 sm:$0xff] }
 0xa30   : > { %v1525_v4 = vpack.c.bf16 %v1524_v2, %v1523_v1 }
 0xa32   : > { %5678 = vmatmul.mubr.msk.bf16.vlgmr.msra.gmra.mrb[12].mxu1 %vm1137_vm2, %v1525_v4  ;;  %v6143_v4 = vld [vmem:[%s8079_s8 + $0x4] ss:$8 sps:$4 sm:$0xff]  }
 0xa33   : > { %5690 = vmatpush3.bf16.xpose.msra.mxu1 %v1645_v6  ;;  %5691 = vmatprep.mubr.msk.bf16.mxu1 %vm6683_vm0, %v6682_v5  ;;  %v6146_v6 = vld [vmem:[%s8079_s8 + $0x14] ss:$8 sps:$4 sm:$0xff]  }
 0xa34   : > { %5701 = vmatprep.subr.bf16.mxu1 %v6682_v5 }
 0xa3a   : > { %5692 = vmatmul.mubr.msk.bf16.vlgmr.msra.gmra.mrb[16].mxu1 %vm1089_vm1, %v1638_v19  ;;  %v6144_v19 = vld [vmem:[%s8079_s8 + $0x10] ss:$8 sps:$4 sm:$0xff]  }
 0xa3b   : > { %5705 = vmatprep.mubr.msk.bf16.mxu1 %vm6683_vm0, %v6682_v5  ;;  %5702 = vmatpush3.bf16.msra.mxu1 %v6139_v32  ;;  %v6167_v32 = vld [vmem:[#allocation10 + $0x48] sm:$0xff]  }
 0xa3c   : > { %5703 = vmatprep.subr.bf16.mxu1 %v6682_v5 }
 0xb05   : > { %v1566_v8 = vpop.f32.mrb[12].mxu1 }
 0xb06   : > { %v5679_v9 = vpop.f32.mrb[13].mxu1 }
 0xb07   : > { %v1569_v10 = vpop.f32.mrb[14].mxu1 }
 0xb08   : > { %v1573_v11 = vpack.c.bf16 %v1569_v10, %v1566_v8  ;;  %v5680_v12 = vpop.f32.mrb[15].mxu1 }
 0xb0a   : > { %5686 = vmatmul.mubr.msk.bf16.vlgmr.msra.gmra.mrb[24].mxu0 %vm1089_vm1, %v1573_v11 }
 0xb0b   : > { %5697 = vmatprep.mubr.msk.bf16.mxu0 %vm6683_vm0, %v6682_v5 }
 0xb0d   : > { %v1681_v14 = vpop.f32.mrb[16].mxu1 }
 0xb0e   : > { %v5693_v15 = vpop.f32.mrb[17].mxu1  ;;  %v1688_v16 = vsel %vm1137_vm2, %v1681_v14, -inf }
 0xb0f   : > { %1689 = vmax.xlane.f32.xlu1 %v1688_v16  ;;  %v1684_v17 = vpop.f32.mrb[18].mxu1  ;;  %v6149_v16 = vld [vmem:[%s8079_s8 + $0x24] ss:$8 sps:$4 sm:$0xff]  }
 0xb10   : > { %v5694_v20 = vpop.f32.mrb[19].mxu1  ;;  %v1691_v21 = vsel %vm1137_vm2, %v1684_v17, -inf }
 0xb11   : > { %1692 = vmax.xlane.f32.xlu0 %v1691_v21  ;;  %v6152_v20 = vld [vmem:[%s8079_s8 + $0x34] ss:$8 sps:$4 sm:$0xff]   ;;  %v6150_v21 = vld [vmem:[%s8079_s8 + $0x30] ss:$8 sps:$4 sm:$0xff]  }
 0xb9c   : > { %v1690_v22 = vpop.xlane.xlu1 %1689 }
 0xb9d   : > { %v1694_v23 = vsub.f32 %v1681_v14, %v1690_v22  ;;  %v6155_v22 = vld [vmem:[%s8079_s8 + $0x44] ss:$8 sps:$4 sm:$0xff]  }
 0xb9e   : > { %v1693_v24 = vpop.xlane.xlu0 %1692 }
 0xb9f   : > { %v1696_v25 = vmul.f32 1.442695, %v1694_v23  ;;  %v1695_v26 = vsub.f32 %v1684_v17, %v1693_v24  ;;  %v6147_v17 = vld [vmem:[%s8079_s8 + $0x20] ss:$8 sps:$4 sm:$0xff]   ;;  %v6158_v24 = vld [vmem:[%s8079_s8 + $0x54] ss:$8 sps:$4 sm:$0xff]  }
 0xba0   : > { %v6153_v23 = vld [vmem:[%s8079_s8 + $0x40] ss:$8 sps:$4 sm:$0xff]  }
 0xba1   : > { %6352 = vpow2.f32 %v1696_v25  ;;  %v1698_v27 = vmul.f32 1.442695, %v1695_v26  ;;  %v6156_v25 = vld [vmem:[%s8079_s8 + $0x50] ss:$8 sps:$4 sm:$0xff]   ;;  %v6161_v26 = vld [vmem:[%s8079_s8 + $0x64] ss:$8 sps:$4 sm:$0xff]  }
 0xba3   : > { %6354 = vpow2.f32 %v1698_v27  ;;  %v6159_v27 = vld [vmem:[%s8079_s8 + $0x60] ss:$8 sps:$4 sm:$0xff]  }
 0xbab   : > { %v6353_v28 = vpop.eup %6352 }
 0xbac   : > { %v1700_v29 = vsel %vm1137_vm2, %v6353_v28, 0.0 }
 0xbad   : > { %v6355_v30 = vpop.eup %6354  ;;  %1701 = vadd.xlane.f32.xlu0 %v1700_v29  ;;  %v6162_v29 = vld [vmem:[%s8079_s8 + $0x70] ss:$8 sps:$4 sm:$0xff]  }
 0xbae   : > { %v1703_v31 = vsel %vm1137_vm2, %v6355_v30, 0.0 }
 0xbaf   : > { %1704 = vadd.xlane.f32.xlu1 %v1703_v31  ;;  %v6166_v31 = vld [vmem:[#allocation10] sm:$0xff]  }
 0xbc3   : > { %1711 = vrot.lane.b32.xlu0 %v7226_v13, %s8112_s24 }
 0xbdd   : > { %v1628_v33 = vpop.f32.mrb[24].mxu0 }
 0xbde   : > { %v1635_v34 = vadd.f32 %v1628_v33, %v7286_v37  ;;  %v5687_v36 = vpop.f32.mrb[25].mxu0  ;;  %v6140_v37 = vld [vmem:[#allocation7 + $0x38] sm:$0xff]   ;;  %v6168_v33 = vld [vmem:[#allocation10 + $0x8] sm:$0xff]  }
 0xbdf   : > { %v1631_v38 = vpop.f32.mrb[26].mxu0  ;;  %5704 = vmatpush3.bf16.msra.mxu1 %v6140_v37  ;;  %v6170_v36 = vld [vmem:[#allocation10 + $0x10] sm:$0xff]  }
 0xbe0   : > { %v1636_v39 = vadd.f32 %v1631_v38, %v7288_v40  ;;  %v5688_v41 = vpop.f32.mrb[27].mxu0  ;;  %v6171_v38 = vld [vmem:[#allocation10 + $0x58] sm:$0xff]  }
 0xbe1   : > { %v6173_v41 = vld [vmem:[#allocation10 + $0x60] sm:$0xff]  }
 0xc3a   : > { %v1702_v42 = vpop.xlane.xlu0 %1701 }
 0xc3b   : > { %6356 = vrcp.f32 %v1702_v42  ;;  %v6174_v42 = vld [vmem:[#allocation10 + $0x20] sm:$0xff]  }
 0xc3c   : > { %v1705_v43 = vpop.xlane.xlu1 %1704 }
 0xc3d   : > { %6358 = vrcp.f32 %v1705_v43  ;;  %v6175_v43 = vld [vmem:[#allocation10 + $0x68] sm:$0xff]  }
 0xc3e   : > { %v1712_v44 = vpop.permute.xlu0 %1711 }
 0xc3f   : > { %5696 = vmatpush3.bf16.msra.mxu0 %v1712_v44 }
 0xc40   : > { %1982 = vmatprep.subr.bf16.mxu0 %v6143_v4 }
 0xc45   : > { %v6357_v45 = vpop.eup %6356 }
 0xc46   : > { %v1708_v46 = vmul.f32 %v6357_v45, %v6353_v28  ;;  %v6164_v28 = vld [vmem:[%s8079_s8 + $0x74] ss:$8 sps:$4 sm:$0xff]  }
 0xc47   : > { %v6359_v13 = vpop.eup %6358 }
 0xc48   : > { %v1709_v47 = vmul.f32 %v6359_v13, %v6355_v30  ;;  %v6165_v30 = vld [vmem:[#allocation10 + $0x40] sm:$0xff]  }
 0xc49   : > { %5451 = vmatprep.subr.bf16.mxu1 %v6165_v30 }
 0xc4a   : > { %v1710_v48 = vpack.c.bf16 %v1709_v47, %v1708_v46 }
 0xc4c   : > { %5698 = vmatmul.mubr.msk.bf16.vlgmr.msra.gmra.mrb[28].mxu0 %vm1137_vm2, %v1710_v48 }
 0xc4d   : > { %2014 = vmatprep.mubr.bf16.mxu0 %v6684_v35  ;;  %1983 = vmatpush1.bf16.msra.mxu0 %v6141_v3 }
 0xc4e   : > { %1984 = vmatprep.subr.bf16.mxu0 %v6146_v6 }
 0xc51   : > { %1985 = vmatpush1.bf16.msra.mxu0 %v6144_v19 }
 0xc52   : > { %1986 = vmatprep.subr.bf16.mxu0 %v6149_v16 }
 0xc55   : > { %1987 = vmatpush1.bf16.msra.mxu0 %v6147_v17 }
 0xc56   : > { %1988 = vmatprep.subr.bf16.mxu0 %v6152_v20 }
 0xc59   : > { %1989 = vmatpush1.bf16.msra.mxu0 %v6150_v21 }
 0xc5a   : > { %1990 = vmatprep.subr.bf16.mxu0 %v6155_v22 }
 0xc5d   : > { %1991 = vmatpush1.bf16.msra.mxu0 %v6153_v23 }
 0xc5e   : > { %1992 = vmatprep.subr.bf16.mxu0 %v6158_v24 }
 0xc61   : > { %1993 = vmatpush1.bf16.msra.mxu0 %v6156_v25 }
 0xc62   : > { %1994 = vmatprep.subr.bf16.mxu0 %v6161_v26 }
 0xc65   : > { %1995 = vmatpush1.bf16.msra.mxu0 %v6159_v27  ;;  %v5087_v27 = vld [vmem:[#allocation11] ss:$0 sm:$0xff] }
 0xc66   : > { %1996 = vmatprep.subr.bf16.mxu0 %v6164_v28 }
 0xc69   : > { %1997 = vmatpush1.bf16.msra.mxu0 %v6162_v29 }
 0xd1f   : > { %v1751_v40 = vpop.f32.mrb[28].mxu0 }
 0xd20   : > { %v5699_v49 = vpop.f32.mrb[29].mxu0 }
 0xd21   : > { %v1754_v50 = vpop.f32.mrb[30].mxu0  ;;  %v5053_v49 = vld [vmem:[%s8085_s14] ss:$0 sm:$0xff] }
 0xd22   : > { %v1758_v51 = vpack.c.bf16 %v1754_v50, %v1751_v40  ;;  %v5700_v52 = vpop.f32.mrb[31].mxu0 }
 0xd24   : > { %5706 = vmatmul.mubr.msk.bf16.vlgmr.msra.gmra.mrb[20].mxu1 %vm1089_vm1, %v1758_v51 }
 0xd25   : > { %5452 = vmatpush3.bf16.msra.mxu1 %v6166_v31 }
 0xd26   : > { %5453 = vmatprep.subr.bf16.mxu1 %v6167_v32 }
 0xd29   : > { %5454 = vmatpush3.bf16.msra.mxu1 %v6168_v33  ;;  %v6181_v33 = vld [vmem:[%s8161_s17 + $0x40] sm:$0xff]  }
 0xdf7   : > { %v1813_v53 = vpop.f32.mrb[20].mxu1 }
 0xdf8   : > { %v1820_v54 = vadd.f32 %v1813_v53, %v1635_v34  ;;  %v5707_v55 = vpop.f32.mrb[21].mxu1  ;;  %v6169_v34 = vld [vmem:[#allocation10 + $0x50] sm:$0xff]   ;;  %v5054_v53 = vld [vmem:[%s8086_s15] ss:$0 sm:$0xff] }
 0xdf9   : > { %v1816_v56 = vpop.f32.mrb[22].mxu1  ;;  %5455 = vmatprep.subr.bf16.mxu1 %v6169_v34  ;;  %v6182_v34 = vld [vmem:[%s8162_s18 + $0x80] ss:$8 sps:$4 sm:$0xff]  }
 0xdfa   : > { %v1822_v18 = vadd.f32 %v6408_v58, %v1820_v54  ;;  %v1821_v59 = vadd.f32 %v1816_v56, %v1636_v39  ;;  %v5708_v61 = vpop.f32.mrb[23].mxu1  ;;  %5456 = vmatpush3.bf16.msra.mxu1 %v6170_v36  ;;  %v6172_v39 = vld [vmem:[#allocation10 + $0x18] sm:$0xff]   ;;  %v6176_v58 = vld [vmem:[#allocation10 + $0x28] sm:$0xff]  }
 0xdfb   : > { %5457 = vmatprep.subr.bf16.mxu1 %v6171_v38  ;;  %v6179_v61 = vld [vmem:[#allocation10 + $0x78] sm:$0xff]  }
 0xdfc   : > { %v1823_v0 = vadd.f32 %v6409_v63, %v1821_v59  ;;  %v7331_v1 = vadd.f32 %v5052_v57, %v1822_v18  ;;  %v6177_v18 = vld [vmem:[#allocation10 + $0x70] sm:$0xff]   ;;  %v6180_v63 = vld [vmem:[#allocation10 + $0x38] sm:$0xff]  }
 0xdfd   : > { %v6178_v59 = vld [vmem:[#allocation10 + $0x30] sm:$0xff]  }
 0xdfe   : > { %1835 = vadd.xlane.f32.xlu1 %v7331_v1  ;;  %v7334_v2 = vadd.f32 %v5052_v57, %v1823_v0  ;;  %5458 = vmatpush3.bf16.msra.mxu1 %v6172_v39  ;;  %v1890_v0 = vld [vmem:[#allocation8] sm:$0x3] }
 0xdff   : > { %5459 = vmatprep.subr.bf16.mxu1 %v6173_v41  ;;  %v1895_v3 = vrot.slane %v1890_v0, %v7214_v60  ;;  %v1899_v4 = vrot.slane %v1890_v0, %v7219_v62 }
 0xe02   : > { %1837 = vadd.xlane.f32.xlu1 %v7334_v2  ;;  %5460 = vmatpush3.bf16.msra.mxu1 %v6174_v42 }
 0xe03   : > { %5461 = vmatprep.subr.bf16.mxu1 %v6175_v43 }
 0xe06   : > { %5462 = vmatpush3.bf16.msra.mxu1 %v6176_v58  ;;  %v6206_v58 = vld [vmem:[%s8162_s18 + $0xe0] ss:$8 sps:$4 sm:$0xff]  }
 0xe07   : > { %5463 = vmatprep.subr.bf16.mxu1 %v6177_v18  ;;  %v6208_v18 = vld [vmem:[%s8162_s18 + $0xe4] ss:$8 sps:$4 sm:$0xff]  }
 0xe0a   : > { %5464 = vmatpush3.bf16.msra.mxu1 %v6178_v59  ;;  %v6212_v59 = vld [vmem:[%s8162_s18 + $0xf4] ss:$8 sps:$4 sm:$0xff]  }
 0xe0b   : > { %5465 = vmatprep.subr.bf16.mxu1 %v6179_v61  ;;  %v6209_v61 = vld [vmem:[%s8161_s17 + $0x78] sm:$0xff]  }
 0xe0e   : > { %5466 = vmatpush3.bf16.msra.mxu1 %v6180_v63  ;;  %v6210_v63 = vld [vmem:[%s8162_s18 + $0xf0] ss:$8 sps:$4 sm:$0xff]  }
 0xe0f   : > { %5709 = vmatprep.subr.bf16.mxu1 %v6682_v5 }
 0xe8b   : > { %v1836_v7 = vpop.xlane.xlu1 %1835 }
 0xe8c   : > { %v1839_v8 = vmul.f32 0.0078125, %v1836_v7 }
 0xe8e   : > { %v7350_v9 = vsub.f32 %v7331_v1, %v1839_v8 }
 0xe8f   : > { %v1838_v10 = vpop.xlane.xlu1 %1837 }
 0xe90   : > { %v1840_v11 = vmul.f32 0.0078125, %v1838_v10  ;;  %v1843_v12 = vmul.f32 %v7350_v9, %v7350_v9 }
 0xe92   : > { %v1842_v14 = vsub.f32 %v7334_v2, %v1840_v11  ;;  %1845 = vadd.xlane.f32.xlu1 %v1843_v12 }
 0xe94   : > { %v1844_v15 = vmul.f32 %v1842_v14, %v1842_v14 }
 0xe96   : > { %1847 = vadd.xlane.f32.xlu1 %v1844_v15 }
 0xf1f   : > { %v1846_v44 = vpop.xlane.xlu1 %1845 }
 0xf20   : > { %v1849_v45 = vmul.f32 0.0078125, %v1846_v44 }
 0xf22   : > { %v1851_v13 = vadd.f32 1e-05, %v1849_v45  ;;  %v6185_v45 = vld [vmem:[%s8161_s17 + $0x48] sm:$0xff]  }
 0xf23   : > { %v1848_v46 = vpop.xlane.xlu1 %1847 }
 0xf24   : > { %6360 = vrsqrt.f32 %v1851_v13  ;;  %v1850_v47 = vmul.f32 0.0078125, %v1848_v46  ;;  %v6188_v13 = vld [vmem:[%s8162_s18 + $0x94] ss:$8 sps:$4 sm:$0xff]   ;;  %v6186_v46 = vld [vmem:[%s8162_s18 + $0x90] ss:$8 sps:$4 sm:$0xff]  }
 0xf26   : > { %v1852_v48 = vadd.f32 1e-05, %v1850_v47  ;;  %v6189_v47 = vld [vmem:[%s8161_s17 + $0x50] sm:$0xff]  }
 0xf28   : > { %6362 = vrsqrt.f32 %v1852_v48  ;;  %v6192_v48 = vld [vmem:[%s8162_s18 + $0xa4] ss:$8 sps:$4 sm:$0xff]  }
 0xf2e   : > { %v6361_v37 = vpop.eup %6360 }
 0xf2f   : > { %v1855_v40 = vmul.f32 %v6361_v37, %v7350_v9  ;;  %v6190_v37 = vld [vmem:[%s8162_s18 + $0xa0] ss:$8 sps:$4 sm:$0xff]  }
 0xf31   : > { %v1863_v52 = vmul.f32 %v5053_v49, %v1855_v40  ;;  %v6193_v40 = vld [vmem:[%s8161_s17 + $0x58] sm:$0xff]  }
 0xf32   : > { %v6363_v50 = vpop.eup %6362 }
 0xf33   : > { %v1856_v51 = vmul.f32 %v6363_v50, %v1842_v14  ;;  %v1871_v55 = vadd.f32 %v5054_v53, %v1863_v52  ;;  %v6194_v50 = vld [vmem:[%s8162_s18 + $0xb0] ss:$8 sps:$4 sm:$0xff]   ;;  %v6200_v52 = vld [vmem:[%s8162_s18 + $0xc4] ss:$8 sps:$4 sm:$0xff]  }
 0xf35   : > { %v1864_v54 = vmul.f32 %v5053_v49, %v1856_v51  ;;  %v6196_v49 = vld [vmem:[%s8162_s18 + $0xb4] ss:$8 sps:$4 sm:$0xff]   ;;  %v6197_v51 = vld [vmem:[%s8161_s17 + $0x60] sm:$0xff]  }
 0xf37   : > { %v1872_v56 = vadd.f32 %v5054_v53, %v1864_v54  ;;  %v6198_v53 = vld [vmem:[%s8162_s18 + $0xc0] ss:$8 sps:$4 sm:$0xff]  }
 0xf38   : > { %v6201_v54 = vld [vmem:[%s8161_s17 + $0x68] sm:$0xff]  }
 0xf39   : > { %v1873_v57 = vpack.c.bf16 %v1872_v56, %v1871_v55  ;;  %v6204_v55 = vld [vmem:[%s8162_s18 + $0xd4] ss:$8 sps:$4 sm:$0xff]   ;;  %v6202_v56 = vld [vmem:[%s8162_s18 + $0xd0] ss:$8 sps:$4 sm:$0xff]  }
 0xf3b   : > { %2015 = vmatmul.mubr.bf16.vlgmr.msra.gmra.mrb[32].mxu0 %v1873_v57  ;;  %v6205_v57 = vld [vmem:[%s8161_s17 + $0x70] sm:$0xff]  }
 0xf3c   : > { %2398 = vmatprep.mubr.bf16.mxu0 %v6684_v35 }
0x100e   : > { %v2016_v6 = vpop.f32.mrb[32].mxu0 }
0x100f   : > { %v2017_v19 = vadd.f32 %v2016_v6, %v1895_v3  ;;  %v2018_v7 = vpop.f32.mrb[33].mxu0 }
0x1010   : > { %v2019_v8 = vadd.f32 %v2018_v7, %v1899_v4  ;;  %v2020_v9 = vpop.f32.mrb[34].mxu0 }
0x1011   : > { %v2021_v10 = vadd.f32 %v2020_v9, %v1895_v3  ;;  %v2022_v11 = vpop.f32.mrb[35].mxu0  ;;  %v2025_v14 = vmax.f32 %v2017_v19, 0.0  ;;  %v5090_v9 = vld [vmem:[%s8083_s12 + $0x1] ss:$0 sm:$0xff] }
0x1012   : > { %v2023_v12 = vadd.f32 %v2022_v11, %v1899_v4  ;;  %v2026_v16 = vmax.f32 %v2019_v8, 0.0 }
0x1013   : > { %v2027_v15 = vmax.f32 %v2021_v10, 0.0 }
0x1014   : > { %v2028_v17 = vmax.f32 %v2023_v12, 0.0 }
0x1015   : > { %v2029_v20 = vpack.c.bf16 %v2027_v15, %v2025_v14  ;;  %v5091_v14 = vld [vmem:[%s8084_s13 + $0x1] ss:$0 sm:$0xff] }
0x1016   : > { %v2030_v21 = vpack.c.bf16 %v2028_v17, %v2026_v16 }
0x1018   : > { %2191 = vmatprep.mubr.bf16.mxu1 %v2030_v21 }
0x1019   : > { %2192 = vmatmul.mubr.bf16.vlgmr.msra.gmra.mrb[24].mxu1 %v2029_v20 }
0x101a   : > { %5725 = vmatprep.mubr.msk.bf16.mxu1 %vm6683_vm0, %v6682_v5  ;;  %5710 = vmatpush3.bf16.msra.mxu1 %v6181_v33 }
0x101b   : > { %5711 = vmatprep.subr.bf16.mxu1 %v6682_v5 }
0x101e   : > { %5712 = vmatpush3.bf16.msra.mxu1 %v6185_v45 }
0x101f   : > { %5713 = vmatprep.subr.bf16.mxu1 %v6682_v5 }
0x1022   : > { %5714 = vmatpush3.bf16.msra.mxu1 %v6189_v47 }
0x1023   : > { %5715 = vmatprep.subr.bf16.mxu1 %v6682_v5 }
0x1026   : > { %5716 = vmatpush3.bf16.msra.mxu1 %v6193_v40 }
0x1027   : > { %5717 = vmatprep.subr.bf16.mxu1 %v6682_v5 }
0x102a   : > { %5718 = vmatpush3.bf16.msra.mxu1 %v6197_v51 }
0x102b   : > { %5719 = vmatprep.subr.bf16.mxu1 %v6682_v5 }
0x102e   : > { %5720 = vmatpush3.bf16.msra.mxu1 %v6201_v54 }
0x102f   : > { %5721 = vmatprep.subr.bf16.mxu1 %v6682_v5 }
0x1032   : > { %5722 = vmatpush3.bf16.msra.mxu1 %v6205_v57 }
0x1033   : > { %5723 = vmatprep.subr.bf16.mxu1 %v6682_v5 }
0x1036   : > { %5724 = vmatpush3.bf16.msra.mxu1 %v6209_v61 }
0x1037   : > { %5735 = vmatprep.subr.bf16.mxu1 %v6682_v5 }
0x10ec   : > { %v5467_v22 = vpop.f32.mrb[24].mxu1 }
0x10ed   : > { %v5468_v23 = vpop.f32.mrb[25].mxu1 }
0x10ee   : > { %v5469_v24 = vadd.f32 %v5468_v23, %v5467_v22  ;;  %v5470_v25 = vpop.f32.mrb[26].mxu1  ;;  %v6410_v22 = vld [vmem:[%s7085_s4] sm:$0xff] }
0x10ef   : > { %v5471_v26 = vpop.f32.mrb[27].mxu1 }
0x10f0   : > { %v2200_v28 = vadd.f32 %v5469_v24, %v7331_v1  ;;  %v5472_v29 = vadd.f32 %v5471_v26, %v5470_v25  ;;  %v6184_v1 = vld [vmem:[%s8162_s18 + $0x84] ss:$8 sps:$4 sm:$0xff]  }
0x10f1   : > { %2366 = vmatprep.subr.bf16.mxu0 %v6184_v1  ;;  %v6411_v24 = vld [vmem:[%s7085_s4 + $0x8] sm:$0xff]  ;;  %s8166_s4 = smov 64  }
0x10f2   : > { %v2201_v30 = vadd.f32 %v5472_v29, %v7334_v2  ;;  %v7406_v31 = vadd.f32 %v5087_v27, %v2200_v28  ;;  %2367 = vmatpush1.bf16.msra.mxu0 %v6182_v34  ;;  %v5142_v28 = vld [vmem:[%s8165_s9 + $0x1] ss:$0 sm:$0xff] }
0x10f3   : > { %2368 = vmatprep.subr.bf16.mxu0 %v6188_v13 }
0x10f4   : > { %2215 = vadd.xlane.f32.xlu1 %v7406_v31  ;;  %v7409_v32 = vadd.f32 %v5087_v27, %v2201_v30  ;;  %v5108_v27 = vld [vmem:[%s8164_s1 + $0x2] sm:$0x3] }
0x10f5   : > { %v2279_v33 = vrot.slane %v5108_v27, %v7214_v60 }
0x10f6   : > { %2369 = vmatpush1.bf16.msra.mxu0 %v6186_v46 }
0x10f7   : > { %2370 = vmatprep.subr.bf16.mxu0 %v6192_v48 }
0x10f8   : > { %2217 = vadd.xlane.f32.xlu1 %v7409_v32 }
0x10fa   : > { %2371 = vmatpush1.bf16.msra.mxu0 %v6190_v37 }
0x10fb   : > { %2372 = vmatprep.subr.bf16.mxu0 %v6196_v49 }
0x10fe   : > { %2373 = vmatpush1.bf16.msra.mxu0 %v6194_v50 }
0x10ff   : > { %2374 = vmatprep.subr.bf16.mxu0 %v6200_v52 }
0x1102   : > { %2375 = vmatpush1.bf16.msra.mxu0 %v6198_v53 }
0x1103   : > { %2376 = vmatprep.subr.bf16.mxu0 %v6204_v55 }
0x1106   : > { %2377 = vmatpush1.bf16.msra.mxu0 %v6202_v56 }
0x1107   : > { %2378 = vmatprep.subr.bf16.mxu0 %v6208_v18 }
0x110a   : > { %2379 = vmatpush1.bf16.msra.mxu0 %v6206_v58 }
0x110b   : > { %2380 = vmatprep.subr.bf16.mxu0 %v6212_v59 }
0x110e   : > { %2381 = vmatpush1.bf16.msra.mxu0 %v6210_v63 }
0x110f   : > { %5729 = vmatprep.subr.bf16.mxu0 %v6682_v5 }
0x1181   : > { %v2216_v2 = vpop.xlane.xlu1 %2215 }
0x1182   : > { %v2219_v36 = vmul.f32 0.0078125, %v2216_v2  ;;  %v2283_v2 = vrot.slane %v5108_v27, %v7219_v62 }
0x1184   : > { %v7423_v38 = vsub.f32 %v7406_v31, %v2219_v36 }
0x1185   : > { %v2218_v39 = vpop.xlane.xlu1 %2217 }
0x1186   : > { %v2220_v41 = vmul.f32 0.0078125, %v2218_v39  ;;  %v2223_v42 = vmul.f32 %v7423_v38, %v7423_v38 }
0x1188   : > { %v7428_v43 = vsub.f32 %v7409_v32, %v2220_v41  ;;  %2225 = vadd.xlane.f32.xlu0 %v2223_v42 }
0x118a   : > { %v2224_v44 = vmul.f32 %v7428_v43, %v7428_v43 }
0x118c   : > { %2227 = vadd.xlane.f32.xlu1 %v2224_v44 }
0x1215   : > { %v2226_v0 = vpop.xlane.xlu0 %2225 }
0x1216   : > { %v2229_v3 = vmul.f32 0.0078125, %v2226_v0 }
0x1218   : > { %v2231_v4 = vadd.f32 1e-05, %v2229_v3 }
0x1219   : > { %v2228_v6 = vpop.xlane.xlu1 %2227 }
0x121a   : > { %6364 = vrsqrt.f32 %v2231_v4  ;;  %v2230_v19 = vmul.f32 0.0078125, %v2228_v6 }
0x121c   : > { %v2232_v7 = vadd.f32 1e-05, %v2230_v19 }
0x121e   : > { %6366 = vrsqrt.f32 %v2232_v7 }
0x1224   : > { %v6365_v8 = vpop.eup %6364 }
0x1225   : > { %v2235_v10 = vmul.f32 %v6365_v8, %v7423_v38 }
0x1227   : > { %v2243_v11 = vmul.f32 %v5090_v9, %v2235_v10 }
0x1228   : > { %v6367_v12 = vpop.eup %6366 }
0x1229   : > { %v2236_v15 = vmul.f32 %v6367_v12, %v7428_v43  ;;  %v2251_v17 = vadd.f32 %v5091_v14, %v2243_v11 }
0x122b   : > { %v2244_v16 = vmul.f32 %v5090_v9, %v2236_v15  ;;  %v2253_v23 = vadd.f32 %v6410_v22, %v2251_v17 }
0x122d   : > { %v2252_v20 = vadd.f32 %v5091_v14, %v2244_v16 }
0x122f   : > { %v2409_v21 = vpack.c.bf16 %v2252_v20, %v2251_v17  ;;  %v2254_v25 = vadd.f32 %v6411_v24, %v2252_v20 }
0x1231   : > { %5726 = vmatmul.mubr.bf16.vlgmr.msra.gmra.mrb[28].mxu1 %v2409_v21  ;;  %v2255_v26 = vpack.c.bf16 %v2254_v25, %v2253_v23 }
0x1232   : > { %5737 = vmatprep.mubr.msk.bf16.mxu1 %vm6683_vm0, %v6682_v5 }
0x1233   : > { %2399 = vmatmul.mubr.bf16.vlgmr.msra.gmra.mrb[36].mxu0 %v2255_v26 }
0x1234   : > { %5731 = vmatprep.mubr.msk.bf16.mxu0 %vm6683_vm0, %v6682_v5 }
0x1304   : > { %v2517_v29 = vpop.f32.mrb[28].mxu1 }
0x1305   : > { %v5727_v30 = vpop.f32.mrb[29].mxu1  ;;  %v2518_v36 = vadd.f32 %v5142_v28, %v2517_v29 }
0x1306   : > { %v2400_v34 = vpop.f32.mrb[36].mxu0  ;;  %v2520_v1 = vpop.f32.mrb[30].mxu1 }
0x1307   : > { %v2521_v38 = vadd.f32 %v5142_v28, %v2520_v1  ;;  %v2402_v39 = vpop.f32.mrb[37].mxu0  ;;  %v5728_v41 = vpop.f32.mrb[31].mxu1  ;;  %v2401_v43 = vadd.f32 %v2400_v34, %v2279_v33  ;;  %v6215_v1 = vld [vmem:[#allocation7 + $0x50] sm:$0xff]  }
0x1308   : > { %v2404_v42 = vpop.f32.mrb[38].mxu0  ;;  %v2403_v46 = vadd.f32 %v2402_v39, %v2283_v2 }
0x1309   : > { %v7525_v44 = vpack.c.bf16 %v2521_v38, %v2518_v36  ;;  %v2405_v45 = vadd.f32 %v2404_v42, %v2279_v33  ;;  %v2406_v13 = vpop.f32.mrb[39].mxu0 }
0x130a   : > { %v2407_v47 = vadd.f32 %v2406_v13, %v2283_v2  ;;  %v6216_v2 = vld [vmem:[#allocation7 + $0x58] sm:$0xff]   ;;  %v6213_v13 = vld [vmem:[#allocation7 + $0x40] sm:$0xff]  }
0x130b   : > { %v7527_v48 = vpack.c.bf16 %v2405_v45, %v2401_v43  ;;  %5736 = vmatpush3.bf16.msra.mxu1 %v7525_v44 }
0x130c   : > { %v7530_v37 = vpack.c.bf16 %v2407_v47, %v2403_v46  ;;  %5747 = vmatprep.subr.bf16.mxu1 %v6682_v5  ;;  %v6214_v47 = vld [vmem:[#allocation7 + $0x48] sm:$0xff]  }
0x130e   : > { %2651 = vrot.lane.b32.xlu1 %v7530_v37, %s6685_s11  ;;  %v2531_v40 = vsel %vm1089_vm1, %v7530_v37, 0 }
0x130f   : > { %5730 = vmatpush3.bf16.xpose.msra.mxu0 %v2531_v40 }
0x1310   : > { %5741 = vmatprep.subr.bf16.mxu0 %v6682_v5 }
0x1312   : > { %2648 = vrot.lane.b32.xlu1 %v7527_v48, %s6685_s11 }
0x1316   : > { %5732 = vmatmul.mubr.msk.bf16.vlgmr.msra.gmra.mrb[40].mxu0 %vm1089_vm1, %v7527_v48 }
0x1317   : > { %5743 = vmatprep.mubr.msk.bf16.mxu0 %vm6683_vm0, %v6682_v5 }
0x1380   : > { %v2652_v49 = vpop.permute.xlu1 %2651 }
0x1381   : > { %v2657_v50 = vsel %vm1089_vm1, %v2652_v49, 0 }
0x1382   : > { %5742 = vmatpush3.bf16.xpose.msra.mxu0 %v2657_v50 }
0x1383   : > { %5753 = vmatprep.subr.bf16.mxu0 %v6682_v5 }
0x1384   : > { %v2649_v51 = vpop.permute.xlu1 %2648 }
0x1389   : > { %5744 = vmatmul.mubr.msk.bf16.vlgmr.msra.gmra.mrb[44].mxu0 %vm1089_vm1, %v2649_v51 }
0x138a   : > { %5757 = vmatprep.mubr.msk.bf16.mxu0 %vm6683_vm0, %v6682_v5  ;;  %5754 = vmatpush3.bf16.msra.mxu0 %v6215_v1 }
0x138b   : > { %5755 = vmatprep.subr.bf16.mxu0 %v6682_v5 }
0x138e   : > { %5756 = vmatpush3.bf16.msra.mxu0 %v6216_v2 }
0x138f   : > { %5769 = vmatprep.subr.bf16.mxu0 %v6682_v5 }
0x13e9   : > { %v2567_v52 = vpop.f32.mrb[40].mxu0 }
0x13ea   : > { %v5733_v53 = vpop.f32.mrb[41].mxu0  ;;  %v2574_v54 = vsel %vm1137_vm2, %v2567_v52, -inf }
0x13eb   : > { %2575 = vmax.xlane.f32.xlu1 %v2574_v54  ;;  %v2570_v55 = vpop.f32.mrb[42].mxu0 }
0x13ec   : > { %v5734_v56 = vpop.f32.mrb[43].mxu0  ;;  %v2577_v57 = vsel %vm1137_vm2, %v2570_v55, -inf }
0x13ed   : > { %2578 = vmax.xlane.f32.xlu0 %v2577_v57 }
0x13fc   : > { %2891 = vrot.lane.b32.xlu1 %v7530_v37, %s8166_s4 }
0x1400   : > { %2889 = vrot.lane.b32.xlu1 %v7527_v48, %s8166_s4 }
0x145c   : > { %v2693_v58 = vpop.f32.mrb[44].mxu0 }
0x145d   : > { %v5745_v18 = vpop.f32.mrb[45].mxu0  ;;  %v2700_v59 = vsel %vm1137_vm2, %v2693_v58, -inf }
0x145e   : > { %2701 = vmax.xlane.f32.xlu0 %v2700_v59  ;;  %v2696_v61 = vpop.f32.mrb[46].mxu0 }
0x145f   : > { %v5746_v63 = vpop.f32.mrb[47].mxu0  ;;  %v2703_v0 = vsel %vm1137_vm2, %v2696_v61, -inf }
0x1462   : > { %2704 = vmax.xlane.f32.xlu0 %v2703_v0 }
0x1478   : > { %v2576_v3 = vpop.xlane.xlu1 %2575 }
0x1479   : > { %v2580_v4 = vsub.f32 %v2567_v52, %v2576_v3 }
0x147a   : > { %v2579_v6 = vpop.xlane.xlu0 %2578 }
0x147b   : > { %v2582_v19 = vmul.f32 1.442695, %v2580_v4  ;;  %v2581_v7 = vsub.f32 %v2570_v55, %v2579_v6 }
0x147c   : > { %v2892_v55 = vpop.permute.xlu1 %2891 }
0x147d   : > { %6368 = vpow2.f32 %v2582_v19  ;;  %v2584_v8 = vmul.f32 1.442695, %v2581_v7  ;;  %v2897_v18 = vsel %vm1089_vm1, %v2892_v55, 0 }
0x147f   : > { %6370 = vpow2.f32 %v2584_v8 }
0x1480   : > { %v2890_v59 = vpop.permute.xlu1 %2889 }
0x1487   : > { %v6369_v9 = vpop.eup %6368 }
0x1488   : > { %v2586_v10 = vsel %vm1137_vm2, %v6369_v9, 0.0 }
0x1489   : > { %v6371_v11 = vpop.eup %6370  ;;  %2587 = vadd.xlane.f32.xlu0 %v2586_v10 }
0x148a   : > { %v2589_v12 = vsel %vm1137_vm2, %v6371_v11, 0.0 }
0x148d   : > { %2590 = vadd.xlane.f32.xlu0 %v2589_v12 }
0x14eb   : > { %v2702_v14 = vpop.xlane.xlu0 %2701 }
0x14ec   : > { %v2706_v15 = vsub.f32 %v2693_v58, %v2702_v14 }
0x14ee   : > { %v2708_v16 = vmul.f32 1.442695, %v2706_v15 }
0x14ef   : > { %v2705_v17 = vpop.xlane.xlu0 %2704 }
0x14f0   : > { %6372 = vpow2.f32 %v2708_v16  ;;  %v2707_v20 = vsub.f32 %v2696_v61, %v2705_v17 }
0x14f2   : > { %v2710_v21 = vmul.f32 1.442695, %v2707_v20 }
0x14f4   : > { %6374 = vpow2.f32 %v2710_v21 }
0x14fa   : > { %v6373_v22 = vpop.eup %6372 }
0x14fb   : > { %v2712_v23 = vsel %vm1137_vm2, %v6373_v22, 0.0 }
0x14fc   : > { %2713 = vadd.xlane.f32.xlu0 %v2712_v23 }
0x14fe   : > { %v6375_v24 = vpop.eup %6374 }
0x14ff   : > { %v2715_v25 = vsel %vm1137_vm2, %v6375_v24, 0.0 }
0x1500   : > { %2716 = vadd.xlane.f32.xlu0 %v2715_v25 }
0x1516   : > { %2724 = vrot.lane.b32.xlu0 %v7525_v44, %s6685_s11  ;;  %v2588_v26 = vpop.xlane.xlu0 %2587  ;;  %s8167_s11 = smov 32  }
0x1517   : > { %6376 = vrcp.f32 %v2588_v26 }
0x151a   : > { %v2591_v27 = vpop.xlane.xlu0 %2590 }
0x151b   : > { %6378 = vrcp.f32 %v2591_v27 }
0x1521   : > { %v6377_v28 = vpop.eup %6376 }
0x1522   : > { %v2594_v30 = vmul.f32 %v6377_v28, %v6369_v9 }
0x1525   : > { %v6379_v29 = vpop.eup %6378 }
0x1526   : > { %v2595_v33 = vmul.f32 %v6379_v29, %v6371_v11 }
0x1528   : > { %v2596_v34 = vpack.c.bf16 %v2595_v33, %v2594_v30 }
0x152a   : > { %5738 = vmatmul.mubr.msk.bf16.vlgmr.msra.gmra.mrb[32].mxu1 %vm1137_vm2, %v2596_v34 }
0x152b   : > { %5749 = vmatprep.mubr.msk.bf16.mxu1 %vm6683_vm0, %v6682_v5 }
0x1589   : > { %v2714_v36 = vpop.xlane.xlu0 %2713 }
0x158a   : > { %6380 = vrcp.f32 %v2714_v36 }
0x158d   : > { %v2717_v38 = vpop.xlane.xlu0 %2716 }
0x158e   : > { %6382 = vrcp.f32 %v2717_v38 }
0x1591   : > { %v2725_v39 = vpop.permute.xlu0 %2724 }
0x1592   : > { %5748 = vmatpush3.bf16.msra.mxu1 %v2725_v39 }
0x1593   : > { %5761 = vmatprep.subr.bf16.mxu1 %v6682_v5 }
0x1594   : > { %v6381_v41 = vpop.eup %6380 }
0x1595   : > { %v2720_v43 = vmul.f32 %v6381_v41, %v6373_v22 }
0x1598   : > { %v6383_v42 = vpop.eup %6382 }
0x1599   : > { %v2721_v45 = vmul.f32 %v6383_v42, %v6375_v24  ;;  %v6218_v42 = vld [vmem:[#allocation7 + $0x68] sm:$0xff]  }
0x159b   : > { %v2722_v46 = vpack.c.bf16 %v2721_v45, %v2720_v43 }
0x159d   : > { %5750 = vmatmul.mubr.msk.bf16.vlgmr.msra.gmra.mrb[36].mxu1 %vm1137_vm2, %v2722_v46 }
0x159e   : > { %5762 = vmatpush3.bf16.msra.mxu1 %v6213_v13  ;;  %5765 = vmatprep.mubr.msk.bf16.mxu1 %vm6683_vm0, %v6682_v5 }
0x159f   : > { %5763 = vmatprep.subr.bf16.mxu1 %v6682_v5 }
0x15a2   : > { %5764 = vmatpush3.bf16.msra.mxu1 %v6214_v47 }
0x15a3   : > { %5775 = vmatprep.subr.bf16.mxu1 %v6682_v5 }
0x15fd   : > { %v2634_v40 = vpop.f32.mrb[32].mxu1 }
0x15fe   : > { %v5739_v49 = vpop.f32.mrb[33].mxu1 }
0x15ff   : > { %v2637_v50 = vpop.f32.mrb[34].mxu1 }
0x1600   : > { %v2641_v51 = vpack.c.bf16 %v2637_v50, %v2634_v40  ;;  %v5740_v52 = vpop.f32.mrb[35].mxu1 }
0x1602   : > { %5766 = vmatmul.mubr.msk.bf16.vlgmr.msra.gmra.mrb[40].mxu1 %vm1089_vm1, %v2641_v51 }
0x1603   : > { %5777 = vmatprep.mubr.msk.bf16.mxu1 %vm6683_vm0, %v6682_v5 }
0x1670   : > { %v2764_v53 = vpop.f32.mrb[36].mxu1 }
0x1671   : > { %v5751_v54 = vpop.f32.mrb[37].mxu1 }
0x1672   : > { %v2767_v56 = vpop.f32.mrb[38].mxu1 }
0x1673   : > { %v2771_v57 = vpack.c.bf16 %v2767_v56, %v2764_v53  ;;  %v5752_v58 = vpop.f32.mrb[39].mxu1 }
0x1675   : > { %5758 = vmatmul.mubr.msk.bf16.vlgmr.msra.gmra.mrb[48].mxu0 %vm1089_vm1, %v2771_v57 }
0x1676   : > { %5770 = vmatpush3.bf16.xpose.msra.mxu0 %v2897_v18  ;;  %5771 = vmatprep.mubr.msk.bf16.mxu0 %vm6683_vm0, %v6682_v5 }
0x1677   : > { %5781 = vmatprep.subr.bf16.mxu0 %v6682_v5 }
0x167d   : > { %5772 = vmatmul.mubr.msk.bf16.vlgmr.msra.gmra.mrb[52].mxu0 %vm1089_vm1, %v2890_v59 }
0x167e   : > { %5785 = vmatprep.mubr.msk.bf16.mxu0 %vm6683_vm0, %v6682_v5 }
0x16d5   : > { %v2882_v61 = vpop.f32.mrb[40].mxu1 }
0x16d6   : > { %v5767_v63 = vpop.f32.mrb[41].mxu1 }
0x16d7   : > { %v2885_v0 = vpop.f32.mrb[42].mxu1 }
0x16d8   : > { %v5768_v3 = vpop.f32.mrb[43].mxu1 }
0x1748   : > { %v2826_v4 = vpop.f32.mrb[48].mxu0 }
0x1749   : > { %v7585_v6 = vadd.f32 %v2882_v61, %v2826_v4  ;;  %v5759_v19 = vpop.f32.mrb[49].mxu0  ;;  %v6219_v4 = vld [vmem:[#allocation7 + $0x70] sm:$0xff]  }
0x174a   : > { %v2829_v7 = vpop.f32.mrb[50].mxu0 }
0x174b   : > { %v7587_v8 = vadd.f32 %v2885_v0, %v2829_v7  ;;  %v5760_v9 = vpop.f32.mrb[51].mxu0 }
0x1750   : > { %v2933_v10 = vpop.f32.mrb[52].mxu0 }
0x1751   : > { %v5773_v11 = vpop.f32.mrb[53].mxu0  ;;  %v2940_v12 = vsel %vm1137_vm2, %v2933_v10, -inf }
0x1752   : > { %2941 = vmax.xlane.f32.xlu0 %v2940_v12  ;;  %v2936_v14 = vpop.f32.mrb[54].mxu0 }
0x1753   : > { %v5774_v15 = vpop.f32.mrb[55].mxu0  ;;  %v2943_v16 = vsel %vm1137_vm2, %v2936_v14, -inf }
0x1754   : > { %2944 = vmax.xlane.f32.xlu1 %v2943_v16 }
0x1765   : > { %3076 = vrot.lane.b32.xlu1 %v7530_v37, %s8167_s11 }
0x1769   : > { %3074 = vrot.lane.b32.xlu1 %v7527_v48, %s8167_s11  ;;  %v6217_v48 = vld [vmem:[#allocation7 + $0x60] sm:$0xff]  }
0x176a   : > { %5782 = vmatpush3.bf16.msra.mxu0 %v6217_v48 }
0x176b   : > { %5783 = vmatprep.subr.bf16.mxu0 %v6682_v5 }
0x176e   : > { %5784 = vmatpush3.bf16.msra.mxu0 %v6218_v42 }
0x176f   : > { %5795 = vmatprep.subr.bf16.mxu0 %v6682_v5 }
0x17df   : > { %v2942_v17 = vpop.xlane.xlu0 %2941 }
0x17e0   : > { %v2946_v20 = vsub.f32 %v2933_v10, %v2942_v17 }
0x17e1   : > { %v2945_v21 = vpop.xlane.xlu1 %2944 }
0x17e2   : > { %v2948_v22 = vmul.f32 1.442695, %v2946_v20  ;;  %v2947_v23 = vsub.f32 %v2936_v14, %v2945_v21 }
0x17e4   : > { %6384 = vpow2.f32 %v2948_v22  ;;  %v2950_v24 = vmul.f32 1.442695, %v2947_v23  ;;  %v6220_v22 = vld [vmem:[#allocation7 + $0x78] sm:$0xff]  }
0x17e5   : > { %v3077_v36 = vpop.permute.xlu1 %3076 }
0x17e6   : > { %6386 = vpow2.f32 %v2950_v24  ;;  %v3082_v39 = vsel %vm1089_vm1, %v3077_v36, 0  ;;  %v6224_v36 = vld [vmem:[%s8079_s8 + $0x90] ss:$8 sps:$4 sm:$0xff]  }
0x17e9   : > { %v3075_v41 = vpop.permute.xlu1 %3074 }
0x17ee   : > { %v6385_v25 = vpop.eup %6384 }
0x17ef   : > { %v2952_v26 = vsel %vm1137_vm2, %v6385_v25, 0.0 }
0x17f0   : > { %v6387_v27 = vpop.eup %6386  ;;  %2953 = vadd.xlane.f32.xlu0 %v2952_v26 }
0x17f1   : > { %v2955_v28 = vsel %vm1137_vm2, %v6387_v27, 0.0 }
0x17f4   : > { %2956 = vadd.xlane.f32.xlu0 %v2955_v28 }
0x180a   : > { %2963 = vrot.lane.b32.xlu0 %v7525_v44, %s8166_s4  ;;  %s8170_s4 = sld [smem:[#allocation35_spill]] }
0x187d   : > { %v2954_v37 = vpop.xlane.xlu0 %2953 }
0x187e   : > { %6388 = vrcp.f32 %v2954_v37  ;;  %v5172_v37 = vld [vmem:[%s8078_s7 + $0x1] ss:$0 sm:$0xff] }
0x1881   : > { %v2957_v29 = vpop.xlane.xlu0 %2956 }
0x1882   : > { %6390 = vrcp.f32 %v2957_v29 }
0x1885   : > { %v2964_v30 = vpop.permute.xlu0 %2963 }
0x1886   : > { %5776 = vmatpush3.bf16.msra.mxu1 %v2964_v30 }
0x1887   : > { %5789 = vmatprep.subr.bf16.mxu1 %v6682_v5 }
0x1888   : > { %v6389_v33 = vpop.eup %6388 }
0x1889   : > { %v2960_v1 = vmul.f32 %v6389_v33, %v6385_v25 }
0x188c   : > { %v6391_v34 = vpop.eup %6390 }
0x188d   : > { %v2961_v2 = vmul.f32 %v6391_v34, %v6387_v27 }
0x188f   : > { %v2962_v38 = vpack.c.bf16 %v2961_v2, %v2960_v1  ;;  %v6221_v2 = vld [vmem:[%s8079_s8 + $0x80] ss:$8 sps:$4 sm:$0xff]  }
0x1891   : > { %5778 = vmatmul.mubr.msk.bf16.vlgmr.msra.gmra.mrb[44].mxu1 %vm1137_vm2, %v2962_v38 }
0x1892   : > { %5790 = vmatpush3.bf16.xpose.msra.mxu1 %v3082_v39  ;;  %5791 = vmatprep.mubr.msk.bf16.mxu1 %vm6683_vm0, %v6682_v5 }
0x1893   : > { %5801 = vmatprep.subr.bf16.mxu1 %v6682_v5 }
0x1899   : > { %5792 = vmatmul.mubr.msk.bf16.vlgmr.msra.gmra.mrb[48].mxu1 %vm1089_vm1, %v3075_v41 }
0x189a   : > { %5805 = vmatprep.mubr.msk.bf16.mxu1 %vm6683_vm0, %v6682_v5  ;;  %5802 = vmatpush3.bf16.msra.mxu1 %v6219_v4  ;;  %v6251_v4 = vld [vmem:[#allocation10 + $0xd8] sm:$0xff]  }
0x189b   : > { %5803 = vmatprep.subr.bf16.mxu1 %v6682_v5 }
0x189e   : > { %5804 = vmatpush3.bf16.msra.mxu1 %v6220_v22 }
0x1964   : > { %v3003_v43 = vpop.f32.mrb[44].mxu1 }
0x1965   : > { %v5779_v45 = vpop.f32.mrb[45].mxu1 }
0x1966   : > { %v3006_v13 = vpop.f32.mrb[46].mxu1 }
0x1967   : > { %v3010_v46 = vpack.c.bf16 %v3006_v13, %v3003_v43  ;;  %v5780_v47 = vpop.f32.mrb[47].mxu1 }
0x1968   : > { %v6229_v47 = vld [vmem:[%s8079_s8 + $0xa4] ss:$8 sps:$4 sm:$0xff]  }
0x1969   : > { %5786 = vmatmul.mubr.msk.bf16.vlgmr.msra.gmra.mrb[56].mxu0 %vm1089_vm1, %v3010_v46 }
0x196a   : > { %5797 = vmatprep.mubr.msk.bf16.mxu0 %vm6683_vm0, %v6682_v5 }
0x196c   : > { %v3118_v40 = vpop.f32.mrb[48].mxu1 }
0x196d   : > { %v5793_v49 = vpop.f32.mrb[49].mxu1  ;;  %v3125_v50 = vsel %vm1137_vm2, %v3118_v40, -inf }
0x196e   : > { %3126 = vmax.xlane.f32.xlu1 %v3125_v50  ;;  %v3121_v51 = vpop.f32.mrb[50].mxu1  ;;  %v6232_v49 = vld [vmem:[%s8079_s8 + $0xb4] ss:$8 sps:$4 sm:$0xff]   ;;  %v6230_v50 = vld [vmem:[%s8079_s8 + $0xb0] ss:$8 sps:$4 sm:$0xff]  }
0x196f   : > { %v5794_v52 = vpop.f32.mrb[51].mxu1  ;;  %v3128_v53 = vsel %vm1137_vm2, %v3121_v51, -inf }
0x1970   : > { %3129 = vmax.xlane.f32.xlu0 %v3128_v53  ;;  %v6233_v52 = vld [vmem:[%s8079_s8 + $0xc0] ss:$8 sps:$4 sm:$0xff]   ;;  %v6238_v53 = vld [vmem:[%s8079_s8 + $0xd4] ss:$8 sps:$4 sm:$0xff]  }
0x197f   : > { %3148 = vrot.lane.b32.xlu1 %v7525_v44, %s8167_s11  ;;  %s4850_s11 = sshll.u32 %s772_s20, 4  ;;  %s8027_s11 = int_to_ptr.vmem [resolvable:$true] %s4850_s11 }
0x1980   : > { %p6591_p10 = scmp.lt.s32.totalorder %s8027_s11, %s6589_s2 }
0x19fb   : > { %v3127_v54 = vpop.xlane.xlu1 %3126 }
0x19fc   : > { %v3131_v55 = vsub.f32 %v3118_v40, %v3127_v54  ;;  %v6227_v40 = vld [vmem:[%s8079_s8 + $0xa0] ss:$8 sps:$4 sm:$0xff]   ;;  %v6236_v54 = vld [vmem:[%s8079_s8 + $0xd0] ss:$8 sps:$4 sm:$0xff]  }
0x19fd   : > { %v3130_v56 = vpop.xlane.xlu0 %3129 }
0x19fe   : > { %v3133_v57 = vmul.f32 1.442695, %v3131_v55  ;;  %v3132_v58 = vsub.f32 %v3121_v51, %v3130_v56  ;;  %v6235_v51 = vld [vmem:[%s8079_s8 + $0xc4] ss:$8 sps:$4 sm:$0xff]   ;;  %v6239_v56 = vld [vmem:[%s8079_s8 + $0xe0] ss:$8 sps:$4 sm:$0xff]  }
0x19ff   : > { %v3149_v18 = vpop.permute.xlu1 %3148  ;;  %v6241_v55 = vld [vmem:[%s8079_s8 + $0xe4] ss:$8 sps:$4 sm:$0xff]  }
0x1a00   : > { %6392 = vpow2.f32 %v3133_v57  ;;  %v3135_v59 = vmul.f32 1.442695, %v3132_v58  ;;  %5796 = vmatpush3.bf16.msra.mxu0 %v3149_v18  ;;  %v6244_v57 = vld [vmem:[%s8079_s8 + $0xf4] ss:$8 sps:$4 sm:$0xff]   ;;  %v6242_v58 = vld [vmem:[%s8079_s8 + $0xf0] ss:$8 sps:$4 sm:$0xff]  }
0x1a01   : > { %v6245_v18 = vld [vmem:[#allocation10 + $0xc0] sm:$0xff]  }
0x1a02   : > { %6394 = vpow2.f32 %v3135_v59  ;;  %v6246_v59 = vld [vmem:[#allocation10 + $0x80] sm:$0xff]   ;;  %5510 = vmatprep.subr.bf16.mxu1 %v6245_v18 }
0x1a0a   : > { %v6393_v61 = vpop.eup %6392 }
0x1a0b   : > { %v3137_v63 = vsel %vm1137_vm2, %v6393_v61, 0.0 }
0x1a0c   : > { %v6395_v0 = vpop.eup %6394  ;;  %3138 = vadd.xlane.f32.xlu0 %v3137_v63  ;;  %v6248_v63 = vld [vmem:[#allocation10 + $0x88] sm:$0xff]  }
0x1a0d   : > { %v3140_v3 = vsel %vm1137_vm2, %v6395_v0, 0.0 }
0x1a10   : > { %3141 = vadd.xlane.f32.xlu0 %v3140_v3  ;;  %v6250_v3 = vld [vmem:[#allocation10 + $0x90] sm:$0xff]  }
0x1a3c   : > { %v3065_v44 = vpop.f32.mrb[56].mxu0 }
0x1a3d   : > { %v3072_v19 = vadd.f32 %v3065_v44, %v7585_v6  ;;  %v5787_v7 = vpop.f32.mrb[57].mxu0  ;;  %v6252_v44 = vld [vmem:[#allocation10 + $0x98] sm:$0xff]  }
0x1a3e   : > { %v3068_v9 = vpop.f32.mrb[58].mxu0  ;;  %v6254_v7 = vld [vmem:[#allocation10 + $0xa0] sm:$0xff]  }
0x1a3f   : > { %v3073_v10 = vadd.f32 %v3068_v9, %v7587_v8  ;;  %v5788_v11 = vpop.f32.mrb[59].mxu0  ;;  %v6255_v9 = vld [vmem:[#allocation10 + $0xe8] sm:$0xff]  }
0x1a99   : > { %v3139_v12 = vpop.xlane.xlu0 %3138 }
0x1a9a   : > { %6396 = vrcp.f32 %v3139_v12 }
0x1a9d   : > { %v3142_v14 = vpop.xlane.xlu0 %3141 }
0x1a9e   : > { %6398 = vrcp.f32 %v3142_v14 }
0x1aa4   : > { %v6397_v15 = vpop.eup %6396 }
0x1aa5   : > { %v3145_v17 = vmul.f32 %v6397_v15, %v6393_v61  ;;  %v6247_v61 = vld [vmem:[#allocation10 + $0xc8] sm:$0xff]  }
0x1aa8   : > { %v6399_v16 = vpop.eup %6398 }
0x1aa9   : > { %v3146_v20 = vmul.f32 %v6399_v16, %v6395_v0  ;;  %v6249_v0 = vld [vmem:[#allocation10 + $0xd0] sm:$0xff]  }
0x1aab   : > { %v3147_v21 = vpack.c.bf16 %v3146_v20, %v3145_v17 }
0x1aad   : > { %5798 = vmatmul.mubr.msk.bf16.vlgmr.msra.gmra.mrb[60].mxu0 %vm1137_vm2, %v3147_v21  ;;  %v5175_v21 = vld [vmem:[%s8085_s14 + $0x1] ss:$0 sm:$0xff] }
0x1aae   : > { %3456 = vmatprep.mubr.bf16.mxu0 %v6684_v35 }
0x1b80   : > { %v3188_v6 = vpop.f32.mrb[60].mxu0 }
0x1b81   : > { %v5799_v23 = vpop.f32.mrb[61].mxu0 }
0x1b82   : > { %v3191_v24 = vpop.f32.mrb[62].mxu0 }
0x1b83   : > { %v3195_v8 = vpack.c.bf16 %v3191_v24, %v3188_v6  ;;  %v5800_v25 = vpop.f32.mrb[63].mxu0  ;;  %v5176_v24 = vld [vmem:[%s8086_s15 + $0x1] ss:$0 sm:$0xff] }
0x1b85   : > { %5806 = vmatmul.mubr.msk.bf16.vlgmr.msra.gmra.mrb[52].mxu1 %vm1089_vm1, %v3195_v8 }
0x1b86   : > { %5511 = vmatpush3.bf16.msra.mxu1 %v6246_v59 }
0x1b87   : > { %5512 = vmatprep.subr.bf16.mxu1 %v6247_v61 }
0x1b8a   : > { %5513 = vmatpush3.bf16.msra.mxu1 %v6248_v63 }
0x1b8b   : > { %5514 = vmatprep.subr.bf16.mxu1 %v6249_v0 }
0x1b8e   : > { %5515 = vmatpush3.bf16.msra.mxu1 %v6250_v3 }
0x1b8f   : > { %5516 = vmatprep.subr.bf16.mxu1 %v6251_v4 }
0x1b92   : > { %5517 = vmatpush3.bf16.msra.mxu1 %v6252_v44 }
0x1c58   : > { %v3250_v26 = vpop.f32.mrb[52].mxu1 }
0x1c59   : > { %v3257_v27 = vadd.f32 %v3250_v26, %v3072_v19  ;;  %v5807_v28 = vpop.f32.mrb[53].mxu1  ;;  %v6253_v19 = vld [vmem:[#allocation10 + $0xe0] sm:$0xff]  }
0x1c5a   : > { %v3253_v48 = vpop.f32.mrb[54].mxu1  ;;  %5518 = vmatprep.subr.bf16.mxu1 %v6253_v19  ;;  %v6256_v28 = vld [vmem:[#allocation10 + $0xa8] sm:$0xff]  }
0x1c5b   : > { %v3259_v29 = vadd.f32 %v3257_v27, %v7406_v31  ;;  %v3258_v35 = vadd.f32 %v3253_v48, %v3073_v10  ;;  %v5808_v30 = vpop.f32.mrb[55].mxu1  ;;  %v6223_v31 = vld [vmem:[%s8079_s8 + $0x84] ss:$8 sps:$4 sm:$0xff]   ;;  %5519 = vmatpush3.bf16.msra.mxu1 %v6254_v7  ;;  %v6257_v48 = vld [vmem:[#allocation10 + $0xf0] sm:$0xff]  }
0x1c5c   : > { %3424 = vmatprep.subr.bf16.mxu0 %v6223_v31  ;;  %5520 = vmatprep.subr.bf16.mxu1 %v6255_v9  ;;  %v3332_v30 = vld [vmem:[#allocation8 + $0x2] sm:$0x3] }
0x1c5d   : > { %v3260_v33 = vadd.f32 %v3258_v35, %v7409_v32  ;;  %v7630_v34 = vadd.f32 %v5172_v37, %v3259_v29  ;;  %v6226_v32 = vld [vmem:[%s8079_s8 + $0x94] ss:$8 sps:$4 sm:$0xff]   ;;  %3425 = vmatpush1.bf16.msra.mxu0 %v6221_v2  ;;  %v3341_v2 = vrot.slane %v3332_v30, %v7219_v62 }
0x1c5e   : > { %3426 = vmatprep.subr.bf16.mxu0 %v6226_v32  ;;  %v6259_v29 = vld [vmem:[#allocation10 + $0xf8] sm:$0xff]  }
0x1c5f   : > { %3275 = vadd.xlane.f32.xlu0 %v7630_v34  ;;  %v7633_v1 = vadd.f32 %v5172_v37, %v3260_v33  ;;  %5521 = vmatpush3.bf16.msra.mxu1 %v6256_v28  ;;  %v6258_v37 = vld [vmem:[#allocation10 + $0xb0] sm:$0xff]   ;;  %v6260_v35 = vld [vmem:[#allocation10 + $0xb8] sm:$0xff]   ;;  %v3337_v33 = vrot.slane %v3332_v30, %v7214_v60  ;;  %v6266_v28 = vld [vmem:[%s8171_s19 + $0x8] sm:$0xff]  }
0x1c60   : > { %5522 = vmatprep.subr.bf16.mxu1 %v6257_v48  ;;  %v6267_v48 = vld [vmem:[%s8171_s19 + $0x50] sm:$0xff]   ;;  %v6271_v30 = vld [vmem:[%s8171_s19 + $0x60] sm:$0xff]  }
0x1c61   : > { %3427 = vmatpush1.bf16.msra.mxu0 %v6224_v36 }
0x1c62   : > { %3428 = vmatprep.subr.bf16.mxu0 %v6229_v47 }
0x1c63   : > { %3277 = vadd.xlane.f32.xlu0 %v7633_v1  ;;  %5523 = vmatpush3.bf16.msra.mxu1 %v6258_v37  ;;  %v6268_v37 = vld [vmem:[%s8171_s19 + $0x10] sm:$0xff]  }
0x1c64   : > { %5524 = vmatprep.subr.bf16.mxu1 %v6259_v29  ;;  %v6269_v29 = vld [vmem:[%s8171_s19 + $0x58] sm:$0xff]  }
0x1c65   : > { %3429 = vmatpush1.bf16.msra.mxu0 %v6227_v40 }
0x1c66   : > { %3430 = vmatprep.subr.bf16.mxu0 %v6232_v49 }
0x1c67   : > { %5525 = vmatpush3.bf16.msra.mxu1 %v6260_v35  ;;  %v6270_v35 = vld [vmem:[%s8171_s19 + $0x18] sm:$0xff]  }
0x1c68   : > { %5815 = vmatprep.subr.bf16.mxu1 %v6682_v5 }
0x1c69   : > { %3431 = vmatpush1.bf16.msra.mxu0 %v6230_v50 }
0x1c6a   : > { %3432 = vmatprep.subr.bf16.mxu0 %v6235_v51 }
0x1c6d   : > { %3433 = vmatpush1.bf16.msra.mxu0 %v6233_v52 }
0x1c6e   : > { %3434 = vmatprep.subr.bf16.mxu0 %v6238_v53  ;;  %v5225_v53 = vld [vmem:[#allocation11 + $0x1] ss:$0 sm:$0xff] }
0x1c71   : > { %3435 = vmatpush1.bf16.msra.mxu0 %v6236_v54 }
0x1c72   : > { %3436 = vmatprep.subr.bf16.mxu0 %v6241_v55 }
0x1c75   : > { %3437 = vmatpush1.bf16.msra.mxu0 %v6239_v56 }
0x1c76   : > { %3438 = vmatprep.subr.bf16.mxu0 %v6244_v57 }
0x1c79   : > { %3439 = vmatpush1.bf16.msra.mxu0 %v6242_v58 }
0x1c7a   : > { %5809 = vmatprep.subr.bf16.mxu0 %v6682_v5 }
0x1cec   : > { %v3276_v38 = vpop.xlane.xlu0 %3275 }
0x1ced   : > { %v3279_v39 = vmul.f32 0.0078125, %v3276_v38 }
0x1cef   : > { %v7649_v41 = vsub.f32 %v7630_v34, %v3279_v39 }
0x1cf0   : > { %v3278_v42 = vpop.xlane.xlu0 %3277 }
0x1cf1   : > { %v3280_v43 = vmul.f32 0.0078125, %v3278_v42  ;;  %v3283_v45 = vmul.f32 %v7649_v41, %v7649_v41 }
0x1cf3   : > { %v7654_v13 = vsub.f32 %v7633_v1, %v3280_v43  ;;  %3285 = vadd.xlane.f32.xlu0 %v3283_v45 }
0x1cf5   : > { %v3284_v46 = vmul.f32 %v7654_v13, %v7654_v13 }
0x1cf7   : > { %3287 = vadd.xlane.f32.xlu0 %v3284_v46 }
0x1d80   : > { %v3286_v10 = vpop.xlane.xlu0 %3285 }
0x1d81   : > { %v3289_v11 = vmul.f32 0.0078125, %v3286_v10 }
0x1d83   : > { %v3291_v12 = vadd.f32 1e-05, %v3289_v11 }
0x1d84   : > { %v3288_v14 = vpop.xlane.xlu0 %3287 }
0x1d85   : > { %6400 = vrsqrt.f32 %v3291_v12  ;;  %v3290_v15 = vmul.f32 0.0078125, %v3288_v14  ;;  %v5226_v14 = vld [vmem:[%s8168_s29] ss:$0 sm:$0xff]  ;;  %s8173_s29 = sld [smem:[#allocation38_spill]] }
0x1d87   : > { %v3292_v16 = vadd.f32 1e-05, %v3290_v15 }
0x1d89   : > { %6402 = vrsqrt.f32 %v3292_v16 }
0x1d8b   : > { %s8025_s24 = scalar_lea.hbm %s8173_s29, %s5413_s6 }
0x1d8f   : > { %v6401_v17 = vpop.eup %6400 }
0x1d90   : > { %v3295_v20 = vmul.f32 %v6401_v17, %v7649_v41 }
0x1d92   : > { %v3303_v23 = vmul.f32 %v5175_v21, %v3295_v20  ;;  %v5227_v20 = vld [vmem:[%s8169_s10] ss:$0 sm:$0xff]  ;;  %s6584_s10 = scalar_lea.vmem %s8027_s11, 256 }
0x1d93   : > { %v6403_v22 = vpop.eup %6402  ;;  %p6585_p0 = scmp.ne.s32.totalorder %s8027_s11, %s6584_s10  ;;  %p6592_p5 = scmp.lt.s32.totalorder %s6590_s23, %s6584_s10 }
0x1d94   : > { %v3296_v6 = vmul.f32 %v6403_v22, %v7654_v13  ;;  %v3311_v25 = vadd.f32 %v5176_v24, %v3303_v23 }
0x1d95   : > { %p6586_p6 = pnand %p6585_p0, %p6973_p3  ;;  %p6593_p9 = por %p6592_p5, %p6591_p10 }
0x1d96   : > { %v3304_v8 = vmul.f32 %v5175_v21, %v3296_v6 }
0x1d97   : > { %p6587_p8 = pneg %p6586_p6 }
0x1d98   : > { %v3312_v26 = vadd.f32 %v5176_v24, %v3304_v8  ;;  %v6261_v24 = vld [vmem:[%s8170_s4 + $0x8] sm:$0xff]   ;;  %v6262_v8 = vld [vmem:[%s8170_s4] sm:$0xff]  }
0x1d99   : > { %p6594_p4 = pnand %p6593_p9, %p6587_p8 }
0x1d9a   : > { %v3313_v27 = vpack.c.bf16 %v3312_v26, %v3311_v25  ;;  %v6263_v25 = vld [vmem:[%s8171_s19 + $0x40] sm:$0xff]  }
0x1d9b   : > { %v6264_v26 = vld [vmem:[%s8171_s19] sm:$0xff]  }
0x1d9c   : > { %3457 = vmatmul.mubr.bf16.vlgmr.msra.gmra.mrb[64].mxu0 %v3313_v27  ;;  %v6265_v27 = vld [vmem:[%s8171_s19 + $0x48] sm:$0xff]  }
0x1d9d   : > { %5811 = vmatprep.mubr.msk.bf16.mxu0 %vm6683_vm0, %v6682_v5 }
0x1e6f   : > { %v3458_v31 = vpop.f32.mrb[64].mxu0 }
0x1e70   : > { %v3459_v32 = vadd.f32 %v3458_v31, %v3337_v33  ;;  %v3460_v36 = vpop.f32.mrb[65].mxu0  ;;  %v6274_v31 = vld [vmem:[%s8171_s19 + $0x28] sm:$0xff]  }
0x1e71   : > { %v3461_v38 = vadd.f32 %v3460_v36, %v3341_v2  ;;  %v3462_v39 = vpop.f32.mrb[66].mxu0  ;;  %v6276_v36 = vld [vmem:[%s8171_s19 + $0x30] sm:$0xff]  }
0x1e72   : > { %v3463_v41 = vadd.f32 %v3462_v39, %v3337_v33  ;;  %v3464_v42 = vpop.f32.mrb[67].mxu0  ;;  %v3467_v45 = vmax.f32 %v3459_v32, 0.0  ;;  %v6272_v33 = vld [vmem:[%s8171_s19 + $0x20] sm:$0xff]   ;;  %v6275_v32 = vld [vmem:[%s8171_s19 + $0x70] sm:$0xff]   ;;  %v6278_v39 = vld [vmem:[%s8171_s19 + $0x38] sm:$0xff]  }
0x1e73   : > { %v3465_v43 = vadd.f32 %v3464_v42, %v3341_v2  ;;  %v3468_v46 = vmax.f32 %v3461_v38, 0.0  ;;  %v6273_v2 = vld [vmem:[%s8171_s19 + $0x68] sm:$0xff]   ;;  %v6277_v38 = vld [vmem:[%s8171_s19 + $0x78] sm:$0xff]  }
0x1e74   : > { %v3469_v13 = vmax.f32 %v3463_v41, 0.0 }
0x1e75   : > { %v3470_v47 = vmax.f32 %v3465_v43, 0.0 }
0x1e76   : > { %v3471_v40 = vpack.c.bf16 %v3469_v13, %v3467_v45 }
0x1e77   : > { %v3472_v49 = vpack.c.bf16 %v3470_v47, %v3468_v46 }
0x1e79   : > { %3634 = vmatprep.mubr.bf16.mxu1 %v3472_v49 }
0x1e7a   : > { %3635 = vmatmul.mubr.bf16.vlgmr.msra.gmra.mrb[56].mxu1 %v3471_v40 }
0x1e7b   : > { %5817 = vmatprep.mubr.msk.bf16.mxu1 %vm6683_vm0, %v6682_v5 }
0x1f4d   : > { %v5526_v60 = vpop.f32.mrb[56].mxu1 }
0x1f4e   : > { %v5527_v62 = vpop.f32.mrb[57].mxu1 }
0x1f4f   : > { %v5528_v50 = vadd.f32 %v5527_v62, %v5526_v60  ;;  %v5529_v51 = vpop.f32.mrb[58].mxu1  ;;  %v6281_v62 = vld [vmem:[%s8171_s19 + $0x80] sm:$0xff]  }
0x1f50   : > { %v5530_v52 = vpop.f32.mrb[59].mxu1 }
0x1f51   : > { %v3643_v54 = vadd.f32 %v5528_v50, %v7630_v34  ;;  %v5531_v55 = vadd.f32 %v5530_v52, %v5529_v51  ;;  %v6282_v50 = vld [vmem:[%s8171_s19 + $0x88] sm:$0xff]   ;;  %v6279_v51 = vld [vmem:[%s8170_s4 + $0x10] sm:$0xff]  }
0x1f52   : > { %v6283_v52 = vld [vmem:[%s8171_s19 + $0x90] sm:$0xff]  }
0x1f53   : > { %v3644_v56 = vadd.f32 %v5531_v55, %v7633_v1  ;;  %v3653_v57 = vadd.f32 %v5225_v53, %v3643_v54  ;;  %v6280_v54 = vld [vmem:[%s8170_s4 + $0x18] sm:$0xff]   ;;  %v6284_v55 = vld [vmem:[%s8171_s19 + $0xc0] sm:$0xff]  }
0x1f55   : > { %3657 = vadd.xlane.f32.xlu1 %v3653_v57  ;;  %v3654_v58 = vadd.f32 %v5225_v53, %v3644_v56  ;;  %v6285_v53 = vld [vmem:[%s8171_s19 + $0x98] sm:$0xff]   ;;  %v6287_v56 = vld [vmem:[%s8171_s19 + $0xa0] sm:$0xff]  }
0x1f57   : > { %3659 = vadd.xlane.f32.xlu0 %v3654_v58 }
0x1fe2   : > { %v3658_v18 = vpop.xlane.xlu1 %3657 }
0x1fe3   : > { %v3661_v59 = vmul.f32 0.0078125, %v3658_v18  ;;  %v6289_v18 = vld [vmem:[%s8171_s19 + $0xa8] sm:$0xff]  }
0x1fe4   : > { %v3660_v61 = vpop.xlane.xlu0 %3659 }
0x1fe5   : > { %v3663_v63 = vsub.f32 %v3653_v57, %v3661_v59  ;;  %v3662_v0 = vmul.f32 0.0078125, %v3660_v61  ;;  %v6286_v57 = vld [vmem:[%s8171_s19 + $0xc8] sm:$0xff]   ;;  %v6290_v59 = vld [vmem:[%s8171_s19 + $0xd8] sm:$0xff]   ;;  %v6291_v61 = vld [vmem:[%s8171_s19 + $0xb0] sm:$0xff]  }
0x1fe7   : > { %v3664_v3 = vsub.f32 %v3654_v58, %v3662_v0  ;;  %v3665_v4 = vmul.f32 %v3663_v63, %v3663_v63  ;;  %v6288_v58 = vld [vmem:[%s8171_s19 + $0xd0] sm:$0xff]   ;;  %v6293_v0 = vld [vmem:[%s8171_s19 + $0xb8] sm:$0xff]  }
0x1fe9   : > { %3667 = vadd.xlane.f32.xlu0 %v3665_v4  ;;  %v3666_v44 = vmul.f32 %v3664_v3, %v3664_v3  ;;  %v6295_v4 = vld [vmem:[%s8171_s19 + $0xf0] sm:$0xff]  }
0x1fed   : > { %3669 = vadd.xlane.f32.xlu0 %v3666_v44  ;;  %v6296_v44 = vld [vmem:[%s8171_s19 + $0xf8] sm:$0xff]  }
0x2076   : > { %v3668_v19 = vpop.xlane.xlu0 %3667 }
0x2077   : > { %v3671_v7 = vmul.f32 0.0078125, %v3668_v19 }
0x2079   : > { %v3673_v34 = vadd.f32 1e-05, %v3671_v7 }
0x207a   : > { %v3670_v9 = vpop.xlane.xlu0 %3669 }
0x207b   : > { %6404 = vrsqrt.f32 %v3673_v34  ;;  %v3672_v1 = vmul.f32 0.0078125, %v3670_v9 }
0x207d   : > { %v3674_v10 = vadd.f32 1e-05, %v3672_v1 }
0x207f   : > { %6406 = vrsqrt.f32 %v3674_v10 }
0x2085   : > { %v6405_v11 = vpop.eup %6404 }
0x2086   : > { %v3677_v12 = vmul.f32 %v6405_v11, %v3663_v63  ;;  %v6292_v63 = vld [vmem:[%s8171_s19 + $0xe0] sm:$0xff]  }
0x2088   : > { %v3685_v16 = vmul.f32 %v5226_v14, %v3677_v12 }
0x2089   : > { %v6407_v15 = vpop.eup %6406 }
0x208a   : > { %v3678_v17 = vmul.f32 %v6407_v15, %v3664_v3  ;;  %v3693_v22 = vadd.f32 %v5227_v20, %v3685_v16  ;;  %v6294_v3 = vld [vmem:[%s8171_s19 + $0xe8] sm:$0xff]  }
0x208c   : > { %v3686_v21 = vmul.f32 %v5226_v14, %v3678_v17 }
0x208e   : > { %v3694_v6 = vadd.f32 %v5227_v20, %v3686_v21 }
0x2090   : > { %v7718_v23 = vpack.c.bf16 %v3694_v6, %v3693_v22 }
0x2092   : > { %5810 = vmatpush3.bf16.msra.mxu0 %v7718_v23  ;;  %5816 = vmatpush3.bf16.msra.mxu1 %v7718_v23 }
0x2093   : > { %5821 = vmatprep.subr.bf16.mxu0 %v6682_v5  ;;  %5841 = vmatprep.subr.bf16.mxu1 %v6682_v5 }
0x2095   : > { %5818 = vmatmul.mubr.msk.bf16.vlgmr.msra.gmra.mrb[60].mxu1 %vm1137_vm2, %v6261_v24  ;;  %5812 = vmatmul.mubr.msk.bf16.vlgmr.msra.gmra.mrb[68].mxu0 %vm1137_vm2, %v6262_v8  ;;  %v6297_v8 = vld [vmem:[%s8170_s4 + $0x20] sm:$0xff]  }
0x2096   : > { %5822 = vmatpush3.bf16.msra.mxu0 %v6263_v25  ;;  %5842 = vmatpush3.bf16.msra.mxu1 %v6264_v26 }
0x2097   : > { %5823 = vmatprep.subr.bf16.mxu0 %v6682_v5  ;;  %5843 = vmatprep.subr.bf16.mxu1 %v6682_v5 }
0x2098   : > { %5837 = vmatprep.mubr.msk.bf16.mxu0 %vm6683_vm0, %v6682_v5  ;;  %5857 = vmatprep.mubr.msk.bf16.mxu1 %vm6683_vm0, %v6682_v5 }
0x209a   : > { %5824 = vmatpush3.bf16.msra.mxu0 %v6265_v27  ;;  %5844 = vmatpush3.bf16.msra.mxu1 %v6266_v28  ;;  %v6299_v27 = vld [vmem:[%s8171_s19 + $0x100] sm:$0xff]  }
0x209b   : > { %5825 = vmatprep.subr.bf16.mxu0 %v6682_v5  ;;  %5845 = vmatprep.subr.bf16.mxu1 %v6682_v5 }
0x209e   : > { %5826 = vmatpush3.bf16.msra.mxu0 %v6267_v48  ;;  %5846 = vmatpush3.bf16.msra.mxu1 %v6268_v37  ;;  %v6300_v48 = vld [vmem:[%s8171_s19 + $0x108] sm:$0xff]  }
0x209f   : > { %5827 = vmatprep.subr.bf16.mxu0 %v6682_v5  ;;  %5847 = vmatprep.subr.bf16.mxu1 %v6682_v5  ;;  %v6298_v37 = vld [vmem:[%s8170_s4 + $0x28] sm:$0xff]  }
0x20a2   : > { %5828 = vmatpush3.bf16.msra.mxu0 %v6269_v29  ;;  %5848 = vmatpush3.bf16.msra.mxu1 %v6270_v35  ;;  %v6302_v29 = vld [vmem:[%s8171_s19 + $0x140] sm:$0xff]   ;;  %v6301_v35 = vld [vmem:[%s8171_s19 + $0x110] sm:$0xff]  }
0x20a3   : > { %5829 = vmatprep.subr.bf16.mxu0 %v6682_v5  ;;  %5849 = vmatprep.subr.bf16.mxu1 %v6682_v5 }
0x20a6   : > { %5830 = vmatpush3.bf16.msra.mxu0 %v6271_v30  ;;  %5850 = vmatpush3.bf16.msra.mxu1 %v6272_v33  ;;  %v6304_v30 = vld [vmem:[%s8171_s19 + $0x148] sm:$0xff]   ;;  %v6303_v33 = vld [vmem:[%s8171_s19 + $0x118] sm:$0xff]  }
0x20a7   : > { %5831 = vmatprep.subr.bf16.mxu0 %v6682_v5  ;;  %5851 = vmatprep.subr.bf16.mxu1 %v6682_v5 }
0x20aa   : > { %5832 = vmatpush3.bf16.msra.mxu0 %v6273_v2  ;;  %5852 = vmatpush3.bf16.msra.mxu1 %v6274_v31  ;;  %v6306_v2 = vld [vmem:[%s8171_s19 + $0x150] sm:$0xff]   ;;  %v6305_v31 = vld [vmem:[%s8171_s19 + $0x120] sm:$0xff]  }
0x20ab   : > { %5833 = vmatprep.subr.bf16.mxu0 %v6682_v5  ;;  %5853 = vmatprep.subr.bf16.mxu1 %v6682_v5 }
0x20ae   : > { %5834 = vmatpush3.bf16.msra.mxu0 %v6275_v32  ;;  %5854 = vmatpush3.bf16.msra.mxu1 %v6276_v36  ;;  %v6307_v32 = vld [vmem:[%s8171_s19 + $0x128] sm:$0xff]   ;;  %v6308_v36 = vld [vmem:[%s8171_s19 + $0x158] sm:$0xff]  }
0x20af   : > { %5835 = vmatprep.subr.bf16.mxu0 %v6682_v5  ;;  %5855 = vmatprep.subr.bf16.mxu1 %v6682_v5 }
0x20b2   : > { %5836 = vmatpush3.bf16.msra.mxu0 %v6277_v38  ;;  %5856 = vmatpush3.bf16.msra.mxu1 %v6278_v39  ;;  %v6309_v38 = vld [vmem:[%s8171_s19 + $0x130] sm:$0xff]   ;;  %v6310_v39 = vld [vmem:[%s8171_s19 + $0x160] sm:$0xff]  }
0x20b3   : > { %5861 = vmatprep.subr.bf16.mxu0 %v6682_v5  ;;  %5867 = vmatprep.subr.bf16.mxu1 %v6682_v5 }
0x2168   : > { %v3809_v41 = vpop.f32.mrb[60].mxu1  ;;  %v3740_v42 = vpop.f32.mrb[68].mxu0 }
0x2169   : > { %v5819_v43 = vpop.f32.mrb[61].mxu1  ;;  %v5813_v45 = vpop.f32.mrb[69].mxu0 }
0x216a   : > { %v3812_v13 = vpop.f32.mrb[62].mxu1  ;;  %v3743_v46 = vpop.f32.mrb[70].mxu0  ;;  %v6313_v43 = vld [vmem:[%s8171_s19 + $0x170] sm:$0xff]   ;;  %v6314_v45 = vld [vmem:[%s8171_s19 + $0x178] sm:$0xff]  }
0x216b   : > { %v3816_v47 = vpack.c.bf16 %v3812_v13, %v3809_v41  ;;  %v3747_v40 = vpack.c.bf16 %v3743_v46, %v3740_v42  ;;  %v5820_v49 = vpop.f32.mrb[63].mxu1  ;;  %v5814_v60 = vpop.f32.mrb[71].mxu0  ;;  %v6311_v41 = vld [vmem:[%s8171_s19 + $0x138] sm:$0xff]   ;;  %v6312_v42 = vld [vmem:[%s8171_s19 + $0x168] sm:$0xff]  }
0x216d   : > { %5838 = vmatmul.mubr.bf16.vlgmr.msra.gmra.mrb[72].mxu0 %v3816_v47  ;;  %5858 = vmatmul.mubr.bf16.vlgmr.msra.gmra.mrb[64].mxu1 %v3747_v40 }
0x216e   : > { %5862 = vmatpush3.bf16.msra.mxu0 %v7718_v23  ;;  %5863 = vmatprep.mubr.msk.bf16.mxu0 %vm6683_vm0, %v6682_v5 }
0x216f   : > { %5887 = vmatprep.subr.bf16.mxu0 %v6682_v5  ;;  %5868 = vmatpush3.bf16.msra.mxu1 %v6281_v62 }
0x2170   : > { %5869 = vmatprep.subr.bf16.mxu1 %v6682_v5  ;;  %5883 = vmatprep.mubr.msk.bf16.mxu1 %vm6683_vm0, %v6682_v5 }
0x2173   : > { %5870 = vmatpush3.bf16.msra.mxu1 %v6282_v50 }
0x2174   : > { %5871 = vmatprep.subr.bf16.mxu1 %v6682_v5 }
0x2175   : > { %5864 = vmatmul.mubr.msk.bf16.vlgmr.msra.gmra.mrb[76].mxu0 %vm1137_vm2, %v6279_v51 }
0x2176   : > { %5888 = vmatpush3.bf16.msra.mxu0 %v7718_v23  ;;  %5889 = vmatprep.mubr.msk.bf16.mxu0 %vm6683_vm0, %v6682_v5 }
0x2177   : > { %5893 = vmatprep.subr.bf16.mxu0 %v6682_v5  ;;  %5872 = vmatpush3.bf16.msra.mxu1 %v6283_v52 }
0x2178   : > { %5873 = vmatprep.subr.bf16.mxu1 %v6682_v5 }
0x217b   : > { %5874 = vmatpush3.bf16.msra.mxu1 %v6285_v53 }
0x217c   : > { %5875 = vmatprep.subr.bf16.mxu1 %v6682_v5 }
0x217d   : > { %5890 = vmatmul.mubr.msk.bf16.vlgmr.msra.gmra.mrb[80].mxu0 %vm1137_vm2, %v6280_v54 }
0x217e   : > { %5894 = vmatpush3.bf16.msra.mxu0 %v6284_v55  ;;  %5909 = vmatprep.mubr.msk.bf16.mxu0 %vm6683_vm0, %v6682_v5 }
0x217f   : > { %5895 = vmatprep.subr.bf16.mxu0 %v6682_v5  ;;  %5876 = vmatpush3.bf16.msra.mxu1 %v6287_v56 }
0x2180   : > { %5877 = vmatprep.subr.bf16.mxu1 %v6682_v5 }
0x2182   : > { %5896 = vmatpush3.bf16.msra.mxu0 %v6286_v57 }
0x2183   : > { %5897 = vmatprep.subr.bf16.mxu0 %v6682_v5  ;;  %5878 = vmatpush3.bf16.msra.mxu1 %v6289_v18 }
0x2184   : > { %5879 = vmatprep.subr.bf16.mxu1 %v6682_v5 }
0x2186   : > { %5898 = vmatpush3.bf16.msra.mxu0 %v6288_v58 }
0x2187   : > { %5899 = vmatprep.subr.bf16.mxu0 %v6682_v5  ;;  %5880 = vmatpush3.bf16.msra.mxu1 %v6291_v61 }
0x2188   : > { %5881 = vmatprep.subr.bf16.mxu1 %v6682_v5 }
0x218a   : > { %5900 = vmatpush3.bf16.msra.mxu0 %v6290_v59 }
0x218b   : > { %5901 = vmatprep.subr.bf16.mxu0 %v6682_v5  ;;  %5882 = vmatpush3.bf16.msra.mxu1 %v6293_v0 }
0x218c   : > { %5913 = vmatprep.subr.bf16.mxu1 %v6682_v5 }
0x218e   : > { %5902 = vmatpush3.bf16.msra.mxu0 %v6292_v63  ;;  %v6315_v63 = vld [vmem:[%s8170_s4 + $0x30] sm:$0xff]  }
0x218f   : > { %5903 = vmatprep.subr.bf16.mxu0 %v6682_v5 }
0x2192   : > { %5904 = vmatpush3.bf16.msra.mxu0 %v6294_v3  ;;  %v6316_v3 = vld [vmem:[%s8171_s19 + $0x180] sm:$0xff]  }
0x2193   : > { %5905 = vmatprep.subr.bf16.mxu0 %v6682_v5 }
0x2196   : > { %5906 = vmatpush3.bf16.msra.mxu0 %v6295_v4 }
0x2197   : > { %5907 = vmatprep.subr.bf16.mxu0 %v6682_v5 }
0x219a   : > { %5908 = vmatpush3.bf16.msra.mxu0 %v6296_v44 }
0x219b   : > { %5939 = vmatprep.subr.bf16.mxu0 %v6682_v5 }
0x2240   : > { %v3916_v19 = vpop.f32.mrb[72].mxu0  ;;  %v4005_v7 = vpop.f32.mrb[64].mxu1 }
0x2241   : > { %v5839_v34 = vpop.f32.mrb[73].mxu0  ;;  %v7884_v9 = vadd.f32 %v4005_v7, %v3916_v19  ;;  %v5859_v1 = vpop.f32.mrb[65].mxu1  ;;  %v6318_v19 = vld [vmem:[%s8171_s19 + $0x190] sm:$0xff]   ;;  %v6319_v7 = vld [vmem:[%s8171_s19 + $0x198] sm:$0xff]  }
0x2242   : > { %v3919_v10 = vpop.f32.mrb[74].mxu0  ;;  %v4008_v11 = vpop.f32.mrb[66].mxu1  ;;  %v6320_v34 = vld [vmem:[%s8171_s19 + $0x1a0] sm:$0xff]   ;;  %v6322_v1 = vld [vmem:[%s8171_s19 + $0x1b0] sm:$0xff]  }
0x2243   : > { %v5840_v12 = vpop.f32.mrb[75].mxu0  ;;  %v7886_v14 = vadd.f32 %v4008_v11, %v3919_v10  ;;  %v5860_v15 = vpop.f32.mrb[67].mxu1  ;;  %v6323_v10 = vld [vmem:[%s8171_s19 + $0x1b8] sm:$0xff]   ;;  %v4817_v11 = vld [vmem:[%s8172_s22] sm:$0xff] }
0x2244   : > { %v4818_v12 = vld [vmem:[%s8172_s22 + $0x8] sm:$0xff]  ;;  %4821 = vperm.xlu0 %6099, %v4817_v11  }
0x2245   : > { %4826 = vperm.xlu1 %6100, %v4818_v12  }
0x2248   : > { %v4057_v16 = vpop.f32.mrb[76].mxu0 }
0x2249   : > { %v5865_v17 = vpop.f32.mrb[77].mxu0 }
0x224a   : > { %v4060_v20 = vpop.f32.mrb[78].mxu0 }
0x224b   : > { %v4064_v21 = vpack.c.bf16 %v4060_v20, %v4057_v16  ;;  %v5866_v22 = vpop.f32.mrb[79].mxu0 }
0x224d   : > { %5884 = vmatmul.mubr.bf16.vlgmr.msra.gmra.mrb[68].mxu1 %v4064_v21 }
0x224e   : > { %5914 = vmatpush3.bf16.msra.mxu1 %v7718_v23  ;;  %5915 = vmatprep.mubr.msk.bf16.mxu1 %vm6683_vm0, %v6682_v5 }
0x224f   : > { %5919 = vmatprep.subr.bf16.mxu1 %v6682_v5 }
0x2250   : > { %v4218_v6 = vpop.f32.mrb[80].mxu0 }
0x2251   : > { %v5891_v24 = vpop.f32.mrb[81].mxu0 }
0x2252   : > { %v4221_v25 = vpop.f32.mrb[82].mxu0 }
0x2253   : > { %v4225_v26 = vpack.c.bf16 %v4221_v25, %v4218_v6  ;;  %v5892_v28 = vpop.f32.mrb[83].mxu0 }
0x2255   : > { %5910 = vmatmul.mubr.bf16.vlgmr.msra.gmra.mrb[84].mxu0 %v4225_v26  ;;  %5916 = vmatmul.mubr.msk.bf16.vlgmr.msra.gmra.mrb[72].mxu1 %vm1137_vm2, %v6297_v8 }
0x2256   : > { %5940 = vmatpush3.bf16.msra.mxu0 %v7718_v23  ;;  %5941 = vmatprep.mubr.msk.bf16.mxu0 %vm6683_vm0, %v6682_v5 }
0x2257   : > { %5920 = vmatpush3.bf16.msra.mxu1 %v6299_v27  ;;  %5945 = vmatprep.subr.bf16.mxu0 %v6682_v5 }
0x2258   : > { %5921 = vmatprep.subr.bf16.mxu1 %v6682_v5  ;;  %5935 = vmatprep.mubr.msk.bf16.mxu1 %vm6683_vm0, %v6682_v5 }
0x225b   : > { %5922 = vmatpush3.bf16.msra.mxu1 %v6300_v48 }
0x225c   : > { %5923 = vmatprep.subr.bf16.mxu1 %v6682_v5 }
0x225d   : > { %5942 = vmatmul.mubr.msk.bf16.vlgmr.msra.gmra.mrb[88].mxu0 %vm1137_vm2, %v6298_v37 }
0x225e   : > { %5946 = vmatpush3.bf16.msra.mxu0 %v6302_v29  ;;  %5961 = vmatprep.mubr.msk.bf16.mxu0 %vm6683_vm0, %v6682_v5 }
0x225f   : > { %5924 = vmatpush3.bf16.msra.mxu1 %v6301_v35  ;;  %5947 = vmatprep.subr.bf16.mxu0 %v6682_v5 }
0x2260   : > { %5925 = vmatprep.subr.bf16.mxu1 %v6682_v5 }
0x2262   : > { %5948 = vmatpush3.bf16.msra.mxu0 %v6304_v30 }
0x2263   : > { %5926 = vmatpush3.bf16.msra.mxu1 %v6303_v33  ;;  %5949 = vmatprep.subr.bf16.mxu0 %v6682_v5 }
0x2264   : > { %5927 = vmatprep.subr.bf16.mxu1 %v6682_v5 }
0x2266   : > { %5950 = vmatpush3.bf16.msra.mxu0 %v6306_v2 }
0x2267   : > { %5928 = vmatpush3.bf16.msra.mxu1 %v6305_v31  ;;  %5951 = vmatprep.subr.bf16.mxu0 %v6682_v5 }
0x2268   : > { %5929 = vmatprep.subr.bf16.mxu1 %v6682_v5 }
0x226a   : > { %5952 = vmatpush3.bf16.msra.mxu0 %v6308_v36 }
0x226b   : > { %5930 = vmatpush3.bf16.msra.mxu1 %v6307_v32  ;;  %5953 = vmatprep.subr.bf16.mxu0 %v6682_v5 }
0x226c   : > { %5931 = vmatprep.subr.bf16.mxu1 %v6682_v5 }
0x226e   : > { %5954 = vmatpush3.bf16.msra.mxu0 %v6310_v39 }
0x226f   : > { %5932 = vmatpush3.bf16.msra.mxu1 %v6309_v38  ;;  %5955 = vmatprep.subr.bf16.mxu0 %v6682_v5 }
0x2270   : > { %5933 = vmatprep.subr.bf16.mxu1 %v6682_v5 }
0x2272   : > { %5956 = vmatpush3.bf16.msra.mxu0 %v6312_v42 }
0x2273   : > { %5934 = vmatpush3.bf16.msra.mxu1 %v6311_v41  ;;  %5957 = vmatprep.subr.bf16.mxu0 %v6682_v5 }
0x2274   : > { %5965 = vmatprep.subr.bf16.mxu1 %v6682_v5 }
0x2276   : > { %5958 = vmatpush3.bf16.msra.mxu0 %v6313_v43 }
0x2277   : > { %5959 = vmatprep.subr.bf16.mxu0 %v6682_v5 }
0x227a   : > { %5960 = vmatpush3.bf16.msra.mxu0 %v6314_v45 }
0x22c3   : > { %v4822_v35 = vpop.permute.xlu0 %4821 }
0x22c4   : > { %v4827_v31 = vpop.permute.xlu1 %4826 }
0x2320   : > { %v4164_v13 = vpop.f32.mrb[68].mxu1 }
0x2321   : > { %v4171_v46 = vadd.f32 %v4164_v13, %v7884_v9  ;;  %v5885_v47 = vpop.f32.mrb[69].mxu1  ;;  %v6321_v9 = vld [vmem:[%s8171_s19 + $0x1a8] sm:$0xff]  }
0x2322   : > { %v4167_v40 = vpop.f32.mrb[70].mxu1 }
0x2323   : > { %v4172_v49 = vadd.f32 %v4167_v40, %v7886_v14  ;;  %v5886_v60 = vpop.f32.mrb[71].mxu1 }
0x2328   : > { %v4325_v62 = vpop.f32.mrb[84].mxu0  ;;  %v4379_v50 = vpop.f32.mrb[72].mxu1 }
0x2329   : > { %v4332_v51 = vadd.f32 %v4325_v62, %v4171_v46  ;;  %v5911_v52 = vpop.f32.mrb[85].mxu0  ;;  %v5917_v53 = vpop.f32.mrb[73].mxu1 }
0x232a   : > { %v4328_v54 = vpop.f32.mrb[86].mxu0  ;;  %v4382_v55 = vpop.f32.mrb[74].mxu1 }
0x232b   : > { %v4333_v56 = vadd.f32 %v4328_v54, %v4172_v49  ;;  %v4386_v57 = vpack.c.bf16 %v4382_v55, %v4379_v50  ;;  %v5918_v58 = vpop.f32.mrb[75].mxu1  ;;  %v5912_v18 = vpop.f32.mrb[87].mxu0 }
0x232d   : > { %5936 = vmatmul.mubr.bf16.vlgmr.msra.gmra.mrb[76].mxu1 %v4386_v57 }
0x232e   : > { %5966 = vmatpush3.bf16.msra.mxu1 %v7718_v23  ;;  %5967 = vmatprep.mubr.msk.bf16.mxu1 %vm6683_vm0, %v6682_v5  ;;  %v6317_v23 = vld [vmem:[%s8171_s19 + $0x188] sm:$0xff]  }
0x232f   : > { %5971 = vmatprep.subr.bf16.mxu1 %v6682_v5 }
0x2330   : > { %v4540_v59 = vpop.f32.mrb[88].mxu0 }
0x2331   : > { %v5943_v61 = vpop.f32.mrb[89].mxu0 }
0x2332   : > { %v4543_v0 = vpop.f32.mrb[90].mxu0 }
0x2333   : > { %v4547_v4 = vpack.c.bf16 %v4543_v0, %v4540_v59  ;;  %v5944_v44 = vpop.f32.mrb[91].mxu0 }
0x2335   : > { %5962 = vmatmul.mubr.bf16.vlgmr.msra.gmra.mrb[92].mxu0 %v4547_v4  ;;  %5968 = vmatmul.mubr.msk.bf16.vlgmr.msra.gmra.mrb[80].mxu1 %vm1137_vm2, %v6315_v63 }
0x2336   : > { %5972 = vmatpush3.bf16.msra.mxu1 %v6316_v3  ;;  %5987 = vmatprep.mubr.msk.bf16.mxu1 %vm6683_vm0, %v6682_v5 }
0x2337   : > { %5973 = vmatprep.subr.bf16.mxu1 %v6682_v5 }
0x233a   : > { %5974 = vmatpush3.bf16.msra.mxu1 %v6317_v23 }
0x233b   : > { %5975 = vmatprep.subr.bf16.mxu1 %v6682_v5 }
0x233e   : > { %5976 = vmatpush3.bf16.msra.mxu1 %v6318_v19 }
0x233f   : > { %5977 = vmatprep.subr.bf16.mxu1 %v6682_v5 }
0x2342   : > { %5978 = vmatpush3.bf16.msra.mxu1 %v6319_v7 }
0x2343   : > { %5979 = vmatprep.subr.bf16.mxu1 %v6682_v5 }
0x2346   : > { %5980 = vmatpush3.bf16.msra.mxu1 %v6320_v34 }
0x2347   : > { %5981 = vmatprep.subr.bf16.mxu1 %v6682_v5 }
0x234a   : > { %5982 = vmatpush3.bf16.msra.mxu1 %v6321_v9 }
0x234b   : > { %5983 = vmatprep.subr.bf16.mxu1 %v6682_v5 }
0x234e   : > { %5984 = vmatpush3.bf16.msra.mxu1 %v6322_v1 }
0x234f   : > { %5985 = vmatprep.subr.bf16.mxu1 %v6682_v5 }
0x2352   : > { %5986 = vmatpush3.bf16.msra.mxu1 %v6323_v10 }
0x2400   : > { %v4486_v14 = vpop.f32.mrb[76].mxu1 }
0x2401   : > { %v4493_v15 = vadd.f32 %v4486_v14, %v4332_v51  ;;  %v5937_v16 = vpop.f32.mrb[77].mxu1 }
0x2402   : > { %v4489_v17 = vpop.f32.mrb[78].mxu1 }
0x2403   : > { %v4494_v5 = vadd.f32 %v4489_v17, %v4333_v56  ;;  %v5938_v20 = vpop.f32.mrb[79].mxu1 }
0x2408   : > { %v4647_v21 = vpop.f32.mrb[92].mxu0  ;;  %v4701_v22 = vpop.f32.mrb[80].mxu1 }
0x2409   : > { %v4654_v6 = vadd.f32 %v4647_v21, %v4493_v15  ;;  %v5963_v24 = vpop.f32.mrb[93].mxu0  ;;  %v5969_v8 = vpop.f32.mrb[81].mxu1 }
0x240a   : > { %v4650_v25 = vpop.f32.mrb[94].mxu0  ;;  %v4704_v26 = vpop.f32.mrb[82].mxu1 }
0x240b   : > { %v4655_v27 = vadd.f32 %v4650_v25, %v4494_v5  ;;  %v4708_v28 = vpack.c.bf16 %v4704_v26, %v4701_v22  ;;  %v5970_v48 = vpop.f32.mrb[83].mxu1  ;;  %v5964_v37 = vpop.f32.mrb[95].mxu0 }
0x240d   : > { %5988 = vmatmul.mubr.bf16.vlgmr.msra.gmra.mrb[84].mxu1 %v4708_v28 }
0x24e0   : > { %v4808_v29 = vpop.f32.mrb[84].mxu1 }
0x24e1   : > { %v4815_v30 = vadd.f32 %v4808_v29, %v4654_v6  ;;  %v5989_v33 = vpop.f32.mrb[85].mxu1 }
0x24e2   : > { %v4811_v2 = vpop.f32.mrb[86].mxu1 }
0x24e3   : > { %v4816_v32 = vadd.f32 %v4811_v2, %v4655_v27  ;;  %v4829_v36 = vadd.f32 %v4822_v35, %v4815_v30  ;;  %v5990_v38 = vpop.f32.mrb[87].mxu1 }
0x24e5   : > { %v4831_v39 = vmax.f32 %v4829_v36, 0.0  ;;  %v4830_v41 = vadd.f32 %v4827_v31, %v4816_v32 }
0x24e7   : > { %4834 = vst.msk [vmem:[%s772_s20] sm:$0xff] %vm4833_vm3, %v4831_v39  ;;  %v4832_v42 = vmax.f32 %v4830_v41, 0.0 }
0x24e9   : > { %4835 = vst.msk [vmem:[%s772_s20 + $0x8] sm:$0xff] %vm4833_vm3, %v4832_v42 }
0x24ea   : > { %6597 = shalt.err (!%p6594_p4)
}
0x24eb   : > { %s6598_s20 = scalar_lea.hbm %s8025_s24, 256  ;;  %s6602_s3 = scalar_lea.hbm %s8173_s29, 512 }
0x24ec   : > { %p6599_p11 = scmp.ne.s32.totalorder %s8025_s24, %s6598_s20  ;;  %p6603_p1 = scmp.lt.u32.totalorder %s8025_s24, %s8173_s29 }
0x24ed   : > { %p6604_p2 = scmp.lt.u32.totalorder %s6602_s3, %s6598_s20  ;;  %p6606_p0 = scmp.lt.u32.totalorder %s6598_s20, %s8025_s24 }
0x24ee   : > { %p6600_p7 = pnand %p6599_p11, %p6973_p3 }
0x24ef   : > { %p6605_p13 = por %p6604_p2, %p6603_p1 }
0x24f0   : > { %p6601_p12 = pneg %p6600_p7 }
0x24f1   : > { %p6607_p6 = por %p6606_p0, %p6605_p13 }
0x24f3   : > { %p6608_p8 = pnand %p6607_p6, %p6601_p12 }
0x24f5   : > { %6611 = shalt.err (!%p6608_p8)
}
0x24f6   : > { %s6689_s10 = smov 128   ;;  %s6690_s23 = smov 8  }
0x24f7   : > { %s8174_s1 = scalar_lea.sflag [#allocation4], %s7070_s0 }
0x24f8   : > { %6011 = dma.vmem_to_hbm [thread:$0]  (%p6973_p3), %s8027_s11, 256, %s8025_s24, %s8174_s1, %s6689_s10, %s6689_s10, %s6690_s23  }
0x24f9 PF: > { %s8175_s6 = sld [smem:[#allocation20_spill]]  ;;  %s8176_s21 = sld [smem:[#allocation21_spill]] }
0x24fa   : > { %p8178_p5 = scmp.ge.s32.totalorder %s6666_s27, 2 }
0x24ff   : > { %s4865_s28 = sand.u32 1, %s8175_s6   ;;  %p8177_p10 = scmp.ne.s32.totalorder %s8176_s21, 0 }
0x2500   : > { %s4866_s20 = scalar_lea.sflag [#allocation4], %s4865_s28 }
0x2501   : > { %p6034_p9 = pnand %p8178_p5, %p8177_p10 }
0x2503   : > { %6649 = dma.done.wait (!%p6034_p9), %s4866_s20, 256  }
0x2504   : > { %6651 = vsyncadd (!%p6034_p9), %s4866_s20, 4294967040  ;;  %s8179_s3 = sld [smem:[#allocation22_spill]]  ;;  %p39_p4 = scmp.ge.s32.totalorder %s6960_s16, 4  }
0x2505   : > { %s8180_s2 = smov %s6658_s25  ;;  %s8181_s25 = smov %s6662_s26 }
0x2506   : > { %s8183_s27 = smov %s6960_s16  ;;  %41 = sbr.rel (!%p39_p4) target bundleno = 26 (0x1a), region = 210 }
0x250a   : > { %s8182_s26 = smov %s8179_s3 }
0x250d   :  { %4871 = vsyncpa [#allocation3], 1 }
0x250e   :  { %4873 = vsyncpa [#allocation3 + $0x1], 1 }
0x250f   :  { %4874 = vsyncpa [#allocation6], 1 }
0x2510   :  { %4876 = vsyncpa [#allocation6 + $0x1], 1 }
0x2511   :  { %4877 = vsyncpa [#allocation9], 1 }
0x2512   :  { %4878 = vsyncpa [#allocation12], 1 }
0x2513   :  { %4879 = vsyncpa [#allocation4], 1 }
0x2514   :  { %4881 = vsyncpa [#allocation4 + $0x1], 1 }

</bundles_post_ra>
